<compile_context>
chip_gen: v7x
topology: tpu7x:2x2x1
jax: 0.10.0
libtpu: 0.0.40
codegen_flags: <defaults>
</compile_context>

<pallas_src>
import math

import jax
import jax.numpy as jnp
from jax.experimental import pallas as pl
from jax.experimental.pallas import tpu as pltpu

# ---- small GPT2-like config (stand-in for the 768-dim pretrained model) ----
D_MODEL = 128
N_HEAD = 4
D_HEAD = D_MODEL // N_HEAD
N_LAYER = 2
D_FF = 4 * D_MODEL
VOCAB = 256
MAX_POS = 64
STYLE_NUM = 3
PAD_ID = 0          # tokenizer.pad_token_id
LN_EPS = 1e-5
MASK_VAL = -1e9
ATTN_SCALE = 1.0 / math.sqrt(D_HEAD)
VOCAB_TILE = 128    # LM-head vocab tile (multiple of 128; 2048-8192 at real vocab)


# ----------------------------- helpers (in-kernel) ---------------------------

def _ln(x, g, b):
    """Layernorm over last dim. x:(M,D) f32, g/b:(1,D)."""
    mu = jnp.mean(x, axis=-1, keepdims=True)
    xc = x - mu
    var = jnp.mean(xc * xc, axis=-1, keepdims=True)
    return xc * jax.lax.rsqrt(var + LN_EPS) * g + b


def _gelu_new(x):
    """HF gelu_new (tanh approximation), f32."""
    return 0.5 * x * (1.0 + jnp.tanh(0.7978845608028654 * (x + 0.044715 * x * x * x)))


def _bf(x):
    return x.astype(jnp.bfloat16)


# ------------- fused transformer stack (embed + all layers, one call) --------

def _layer_kernel(mask_ref, tok_ref, pos_ref, se_ref, sw_ref, sb_ref,
                  ln1g_ref, ln1b_ref, attnw_ref, attnb_ref, projw_ref, projb_ref,
                  ln2g_ref, ln2b_ref, fcw_ref, fcb_ref, outw_ref, outb_ref,
                  h_ref, bias_scr, attn_scr):
    layer = pl.program_id(1)
    Bt, S, D = h_ref.shape
    M = Bt * S

    @pl.when(layer == 0)
    def _init():
        # Fused embedding assembly: residual carry = tok + pos + style_layer(style_emb).
        pos = pos_ref[0].astype(jnp.float32)                                    # (S, D)
        for b in range(Bt):
            sp = jnp.dot(_bf(se_ref[b]), sw_ref[...],
                         preferred_element_type=jnp.float32) + sb_ref[...]      # (1, D)
            h_ref[b] = tok_ref[b].astype(jnp.float32) + pos + sp
        # Causal + pad-key additive bias: built once per batch tile, reused every layer.
        key_ok = mask_ref[...] > 0.0                                            # (Bt,1,S)
        row = jax.lax.broadcasted_iota(jnp.int32, (S, S), 0)
        col = jax.lax.broadcasted_iota(jnp.int32, (S, S), 1)
        allow = (col <= row)[None] & key_ok                                     # (Bt,S,S)
        bias_scr[...] = jnp.where(allow, 0.0, MASK_VAL)

    h = h_ref[...]                                                              # (Bt,S,D) f32
    bias = bias_scr[...]                                                        # (Bt,S,S)

    # ---- ln1 + fused qkv projection (batch folded into the matmul M dim) ----
    x1 = _ln(h.reshape(M, D), ln1g_ref[0], ln1b_ref[0])
    qkv = jnp.dot(_bf(x1), attnw_ref[0],
                  preferred_element_type=jnp.float32) + attnb_ref[0]            # (M, 3D)
    qkv = _bf(qkv).reshape(Bt, S, 3 * D)          # one bf16 cast for the whole q/k/v slab
    q = qkv[..., :D]                              # 1/sqrt(Dh) already folded into weights
    k = qkv[..., D:2 * D]
    v = qkv[..., 2 * D:]

    # ---- multi-head attention: batched over batch dim, head outputs lane-dense ----
    for hh in range(N_HEAD):
        sl = slice(hh * D_HEAD, (hh + 1) * D_HEAD)
        s = jnp.einsum('bqd,bkd->bqk', q[..., sl], k[..., sl],
                       preferred_element_type=jnp.float32) + bias               # (Bt,S,S)
        m = jnp.max(s, axis=-1, keepdims=True)
        p = jnp.exp(s - m)
        p = p * pl.reciprocal(jnp.sum(p, axis=-1, keepdims=True), approx=True)
        attn_scr[:, :, sl] = jnp.einsum('bqk,bkd->bqd', _bf(p), v[..., sl],
                                        preferred_element_type=jnp.float32)     # (Bt,S,Dh)

    # ---- attention output projection + residual ----
    a = jnp.dot(_bf(attn_scr[...].reshape(M, D)), projw_ref[0],
                preferred_element_type=jnp.float32) + projb_ref[0]
    h = h + a.reshape(Bt, S, D)

    # ---- ln2 + MLP (gelu_new) + residual ----
    x2 = _ln(h.reshape(M, D), ln2g_ref[0], ln2b_ref[0])
    hm = jnp.dot(_bf(x2), fcw_ref[0], preferred_element_type=jnp.float32) + fcb_ref[0]
    hm = _gelu_new(hm)
    m2 = jnp.dot(_bf(hm), outw_ref[0], preferred_element_type=jnp.float32) + outb_ref[0]
    h = h + m2.reshape(Bt, S, D)

    h_ref[...] = h


def run_layers(mask, tok, pos, se, style_w, style_b, params, b_tiles=1):
    """Fused embed + transformer stack.

    mask:(B,1,S) f32, tok:(B,S,D) bf16, pos:(1,S,D) f32, se:(B,1,D) f32,
    style_w:(D,D) bf16, style_b:(1,D) f32  ->  pre-final-LN hidden (B,S,D) f32.

    b_tiles > 1 trades extra weight re-fetches for a >=2-wide parallel grid axis
    (v7x two-TensorCore sharding); default 1 fetches each layer's weights once.
    """
    B, S, D = tok.shape
    L = params['attn_w'].shape[0]
    assert B % b_tiles == 0
    Bt = B // b_tiles

    wmap = lambda bt, l: (l, 0, 0)       # per-layer stacked weights (fetched once per layer)
    bmap = lambda bt, l: (bt, 0, 0)      # per-batch-tile tensors / residual carry
    cmap3 = lambda bt, l: (0, 0, 0)
    cmap2 = lambda bt, l: (0, 0)

    return pl.pallas_call(
        _layer_kernel,
        out_shape=jax.ShapeDtypeStruct((B, S, D), jnp.float32),
        grid=(b_tiles, L),
        in_specs=[
            pl.BlockSpec((Bt, 1, S), bmap),             # pad mask
            pl.BlockSpec((Bt, S, D), bmap),             # token embeddings (bf16)
            pl.BlockSpec((1, S, D), cmap3),             # position embeddings
            pl.BlockSpec((Bt, 1, D), bmap),             # style embedding
            pl.BlockSpec((D, D), cmap2),                # style_layer weight (bf16)
            pl.BlockSpec((1, D), cmap2),                # style_layer bias
            pl.BlockSpec((1, 1, D), wmap),              # ln1_g
            pl.BlockSpec((1, 1, D), wmap),              # ln1_b
            pl.BlockSpec((1, D, 3 * D), wmap),          # attn_w (bf16, Q cols pre-scaled)
            pl.BlockSpec((1, 1, 3 * D), wmap),          # attn_b
            pl.BlockSpec((1, D, D), wmap),              # proj_w (bf16)
            pl.BlockSpec((1, 1, D), wmap),              # proj_b
            pl.BlockSpec((1, 1, D), wmap),              # ln2_g
            pl.BlockSpec((1, 1, D), wmap),              # ln2_b
            pl.BlockSpec((1, D, D_FF), wmap),           # fc_w (bf16)
            pl.BlockSpec((1, 1, D_FF), wmap),           # fc_b
            pl.BlockSpec((1, D_FF, D), wmap),           # out_w (bf16)
            pl.BlockSpec((1, 1, D), wmap),              # out_b
        ],
        out_specs=pl.BlockSpec((Bt, S, D), bmap),       # VMEM-resident residual across layers
        scratch_shapes=[pltpu.VMEM((Bt, S, S), jnp.float32),   # causal+pad bias (per tile)
                        pltpu.VMEM((Bt, S, D), jnp.float32)],  # lane-dense head outputs
        compiler_params=pltpu.CompilerParams(
            dimension_semantics=("parallel", "arbitrary"),
            vmem_limit_bytes=48 * 1024 * 1024),
        # TODO(synk): at GPT2-small scale (S=1024, D=768) the per-layer block needs an
        # additional sequence-tile (flash-style) grid axis to fit v7x's 64 MiB VMEM.
    )(mask, tok, pos, se, style_w, style_b,
      params['ln1_g'], params['ln1_b'], params['attn_w'], params['attn_b'],
      params['proj_w'], params['proj_b'], params['ln2_g'], params['ln2_b'],
      params['fc_w'], params['fc_b'], params['out_w'], params['out_b'])


# --------------------- final LN + tied LM head (vocab-tiled) ------------------

def _final_kernel(h_ref, g_ref, b_ref, wte_ref, hid_ref, logits_ref, xn_ref):
    B, S, D = h_ref.shape

    @pl.when(pl.program_id(0) == 0)
    def _():
        x = _ln(h_ref[...].reshape(B * S, D), g_ref[...], b_ref[...])   # (B*S, D)
        hid_ref[...] = x.reshape(B, S, D).astype(hid_ref.dtype)
        xn_ref[...] = x.astype(jnp.bfloat16)

    # logits tile = hidden @ wte_tile.T, contracting last dims (no wte.T copy)
    logits = jax.lax.dot_general(xn_ref[...], wte_ref[...],
                                 (((1,), (1,)), ((), ())),
                                 preferred_element_type=jnp.float32)    # (B*S, Vt)
    logits_ref[...] = logits.reshape(B, S, -1).astype(logits_ref.dtype)


def final_ln_logits(h, lnf_g, lnf_b, wte, vocab_tile=VOCAB_TILE):
    """h:(B,S,D) -> (hidden (B,S,D), logits (B,S,V)); wte streamed in (Vt,D) tiles."""
    B, S, D = h.shape
    V = wte.shape[0]
    vt = min(vocab_tile, V)
    assert V % vt == 0
    # TODO(synk): at real vocab (50257) emit bf16 logits / fuse argmax-top-k to halve the
    # dominant HBM write.
    return pl.pallas_call(
        _final_kernel,
        out_shape=(jax.ShapeDtypeStruct((B, S, D), jnp.float32),
                   jax.ShapeDtypeStruct((B, S, V), jnp.float32)),
        grid=(V // vt,),
        in_specs=[pl.BlockSpec((B, S, D), lambda v: (0, 0, 0)),
                  pl.BlockSpec((1, D), lambda v: (0, 0)),
                  pl.BlockSpec((1, D), lambda v: (0, 0)),
                  pl.BlockSpec((vt, D), lambda v: (v, 0))],        # wte tile (bf16)
        out_specs=(pl.BlockSpec((B, S, D), lambda v: (0, 0, 0)),
                   pl.BlockSpec((B, S, vt), lambda v: (0, 0, v))),
        scratch_shapes=[pltpu.VMEM((B * S, D), jnp.bfloat16)],      # normalized hidden (bf16)
        compiler_params=pltpu.CompilerParams(
            dimension_semantics=("arbitrary",),
            vmem_limit_bytes=48 * 1024 * 1024),
    )(h, lnf_g, lnf_b, wte)


# ------------------------------ parameters ----------------------------------

def init_params(key):
    keys = jax.random.split(key, 8)
    ki = iter(keys)
    std = 0.02

    def nrm(shape):
        return std * jax.random.normal(next(ki), shape, jnp.float32)

    L, D, F = N_LAYER, D_MODEL, D_FF

    # fold 1/sqrt(Dh) into the Q columns (weight and bias) at prep time
    attn_w = nrm((L, D, 3 * D))
    attn_w = attn_w.at[:, :, :D].multiply(ATTN_SCALE)
    attn_b = jnp.zeros((L, 1, 3 * D), jnp.float32)
    attn_b = attn_b.at[:, :, :D].multiply(ATTN_SCALE)

    params = {
        # big weights live in HBM as bf16 (halves streaming + VMEM; no in-kernel casts)
        'wte': _bf(nrm((VOCAB, D))),
        'attn_w': _bf(attn_w),
        'proj_w': _bf(nrm((L, D, D))),
        'fc_w': _bf(nrm((L, D, F))),
        'out_w': _bf(nrm((L, F, D))),
        'style_w': _bf(jnp.eye(D, dtype=jnp.float32)),   # _init_style_networks(): identity
        # small params stay f32
        'wpe': nrm((MAX_POS, D)),
        'lnf_g': jnp.ones((1, D), jnp.float32),
        'lnf_b': jnp.zeros((1, D), jnp.float32),
        'style_emb': jnp.zeros((STYLE_NUM, D), jnp.float32),   # zero-initialized
        'style_b': jnp.zeros((1, D), jnp.float32),
        'ln1_g': jnp.ones((L, 1, D), jnp.float32),
        'ln1_b': jnp.zeros((L, 1, D), jnp.float32),
        'attn_b': attn_b,
        'proj_b': jnp.zeros((L, 1, D), jnp.float32),
        'ln2_g': jnp.ones((L, 1, D), jnp.float32),
        'ln2_b': jnp.zeros((L, 1, D), jnp.float32),
        'fc_b': jnp.zeros((L, 1, F), jnp.float32),
        'out_b': jnp.zeros((L, 1, D), jnp.float32),
    }
    return params


# ------------------------------ forward pass --------------------------------

def gpt2_forward(params, x, style_id=None):
    """Mirrors GPT2.forward: returns (logits, last hidden state)."""
    B, S = x.shape
    assert S <= MAX_POS, "sequence length exceeds position-embedding table"

    # make_mask: pad positions -> 0 (used as attention key mask in-kernel)
    mask = (x != PAD_ID).astype(jnp.float32).reshape(B, 1, S)

    # embedding gathers are plain-JAX glue (no clean Pallas equivalent)
    tok = jnp.take(params['wte'], x, axis=0)                     # (B,S,D) bf16
    pos = params['wpe'][:S][None]                                # (1,S,D) f32

    if style_id is not None:
        se = jnp.take(params['style_emb'], style_id, axis=0).reshape(B, 1, D_MODEL)
        sb = params['style_b']
    else:
        # style path disabled: zero embedding/bias -> in-kernel style add is a no-op
        se = jnp.zeros((B, 1, D_MODEL), jnp.float32)
        sb = jnp.zeros((1, D_MODEL), jnp.float32)

    h = run_layers(mask, tok, pos, se, params['style_w'], sb, params)   # (B,S,D)
    hidden, logits = final_ln_logits(h, params['lnf_g'], params['lnf_b'],
                                     params['wte'])
    return logits, hidden


# TODO(synk): tokenizer-based inference()/calculate_logits() (autoregressive decode,
# string encode/decode) and pretrained-checkpoint loading / resize_token_embeddings
# have no Pallas equivalent; only the tensor forward pass is implemented.


if __name__ == "__main__":
    root = jax.random.PRNGKey(0)
    kp, kx = jax.random.split(root)

    params = init_params(kp)

    B, S = 2, 8
    x = jax.random.randint(kx, (B, S), 1, VOCAB, dtype=jnp.int32)
    x = x.at[:, -2:].set(PAD_ID)                 # some padded positions
    style_id = jnp.array([0, 1], dtype=jnp.int32)

    logits, hidden = jax.jit(gpt2_forward)(params, x, style_id)
    jax.block_until_ready((logits, hidden))

    assert logits.shape == (B, S, VOCAB)
    assert hidden.shape == (B, S, D_MODEL)
    print("KERNEL_OK")
</pallas_src>

<mosaic_0001>
module attributes {stable_mosaic.version = 11 : i64} {
  func.func @_final_kernel(%arg0: i32, %arg1: memref<2x8x128xf32, #tpu.memory_space<vmem>>, %arg2: memref<1x128xf32, #tpu.memory_space<vmem>>, %arg3: memref<1x128xf32, #tpu.memory_space<vmem>>, %arg4: memref<128x128xbf16, #tpu.memory_space<vmem>>, %arg5: memref<2x8x128xf32, #tpu.memory_space<vmem>>, %arg6: memref<2x8x128xf32, #tpu.memory_space<vmem>>, %arg7: memref<16x128xbf16, #tpu.memory_space<vmem>>) attributes {dimension_semantics = [#tpu.dimension_semantics<arbitrary>], iteration_bounds = array<i64: 2>, scalar_prefetch = 0 : i64, scratch_operands = 1 : i64, tpu.core_type = #tpu.core_type<tc>, window_params = [{pipeline_mode = #tpu.pipeline_mode<synchronous>, transform_indices = @transform_0, window_bounds = array<i64: 2, 8, 128>}, {pipeline_mode = #tpu.pipeline_mode<synchronous>, transform_indices = @transform_1, window_bounds = array<i64: 1, 128>}, {pipeline_mode = #tpu.pipeline_mode<synchronous>, transform_indices = @transform_2, window_bounds = array<i64: 1, 128>}, {transform_indices = @transform_3, window_bounds = array<i64: 128, 128>}, {pipeline_mode = #tpu.pipeline_mode<synchronous>, transform_indices = @transform_4, window_bounds = array<i64: 2, 8, 128>}, {transform_indices = @transform_5, window_bounds = array<i64: 2, 8, 128>}]} {
    %c0_i32 = arith.constant 0 : i32
    %0 = arith.cmpi eq, %arg0, %c0_i32 : i32
    %1 = arith.extui %0 : i1 to i32
    %c0_i32_0 = arith.constant 0 : i32
    %2 = arith.cmpi ne, %1, %c0_i32_0 : i32
    scf.if %2 {
      %c0_7 = arith.constant 0 : index
      %c0_8 = arith.constant 0 : index
      %c0_9 = arith.constant 0 : index
      %8 = vector.load %arg1[%c0_7, %c0_8, %c0_9] : memref<2x8x128xf32, #tpu.memory_space<vmem>>, vector<2x8x128xf32>
      %9 = vector.shape_cast %8 : vector<2x8x128xf32> to vector<16x128xf32>
      %c0_10 = arith.constant 0 : index
      %c0_11 = arith.constant 0 : index
      %10 = vector.load %arg2[%c0_10, %c0_11] : memref<1x128xf32, #tpu.memory_space<vmem>>, vector<1x128xf32>
      %c0_12 = arith.constant 0 : index
      %c0_13 = arith.constant 0 : index
      %11 = vector.load %arg3[%c0_12, %c0_13] : memref<1x128xf32, #tpu.memory_space<vmem>>, vector<1x128xf32>
      %cst_14 = arith.constant dense<0.000000e+00> : vector<16xf32>
      %12 = vector.multi_reduction <add>, %9, %cst_14 [1] : vector<16x128xf32> to vector<16xf32>
      %13 = vector.shape_cast %12 : vector<16xf32> to vector<16x1xf32>
      %cst_15 = arith.constant 1.280000e+02 : f32
      %14 = vector.broadcast %cst_15 : f32 to vector<16x1xf32>
      %15 = arith.divf %13, %14 : vector<16x1xf32>
      %16 = vector.broadcast %15 : vector<16x1xf32> to vector<16x128xf32>
      %17 = arith.subf %9, %16 : vector<16x128xf32>
      %18 = arith.mulf %17, %17 : vector<16x128xf32>
      %cst_16 = arith.constant dense<0.000000e+00> : vector<16xf32>
      %19 = vector.multi_reduction <add>, %18, %cst_16 [1] : vector<16x128xf32> to vector<16xf32>
      %20 = vector.shape_cast %19 : vector<16xf32> to vector<16x1xf32>
      %cst_17 = arith.constant 1.280000e+02 : f32
      %21 = vector.broadcast %cst_17 : f32 to vector<16x1xf32>
      %22 = arith.divf %20, %21 : vector<16x1xf32>
      %cst_18 = arith.constant 9.99999974E-6 : f32
      %23 = vector.broadcast %cst_18 : f32 to vector<16x1xf32>
      %24 = arith.addf %22, %23 : vector<16x1xf32>
      %25 = math.rsqrt %24 : vector<16x1xf32>
      %26 = vector.broadcast %25 : vector<16x1xf32> to vector<16x128xf32>
      %27 = arith.mulf %17, %26 : vector<16x128xf32>
      %28 = vector.broadcast %10 : vector<1x128xf32> to vector<16x128xf32>
      %29 = arith.mulf %27, %28 : vector<16x128xf32>
      %30 = vector.broadcast %11 : vector<1x128xf32> to vector<16x128xf32>
      %31 = arith.addf %29, %30 : vector<16x128xf32>
      %32 = vector.shape_cast %31 : vector<16x128xf32> to vector<2x8x128xf32>
      %c0_19 = arith.constant 0 : index
      %c0_20 = arith.constant 0 : index
      %c0_21 = arith.constant 0 : index
      %33 = vector.load %arg5[%c0_19, %c0_20, %c0_21] : memref<2x8x128xf32, #tpu.memory_space<vmem>>, vector<2x8x128xf32>
      tpu.vector_store %arg5[%c0_19, %c0_20, %c0_21], %32 {strides = array<i32>} : memref<2x8x128xf32, #tpu.memory_space<vmem>>, vector<2x8x128xf32>,
      %34 = arith.truncf %31 : vector<16x128xf32> to vector<16x128xbf16>
      %c0_22 = arith.constant 0 : index
      %c0_23 = arith.constant 0 : index
      %35 = vector.load %arg7[%c0_22, %c0_23] : memref<16x128xbf16, #tpu.memory_space<vmem>>, vector<16x128xbf16>
      tpu.vector_store %arg7[%c0_22, %c0_23], %34 {strides = array<i32>} : memref<16x128xbf16, #tpu.memory_space<vmem>>, vector<16x128xbf16>,
    } else {
    }
    %c0 = arith.constant 0 : index
    %c0_1 = arith.constant 0 : index
    %3 = vector.load %arg7[%c0, %c0_1] : memref<16x128xbf16, #tpu.memory_space<vmem>>, vector<16x128xbf16>
    %c0_2 = arith.constant 0 : index
    %c0_3 = arith.constant 0 : index
    %4 = vector.load %arg4[%c0_2, %c0_3] : memref<128x128xbf16, #tpu.memory_space<vmem>>, vector<128x128xbf16>
    %cst = arith.constant dense<0.000000e+00> : vector<16x128xf32>
    %5 = tpu.matmul %3, %4, %cst {dimension_numbers = #tpu.dot_dimension_numbers<[1], [1], [0], [0], [0, 0, 1, 0], [], []>} : vector<16x128xbf16>, vector<128x128xbf16>, vector<16x128xf32> -> vector<16x128xf32>
    %6 = vector.shape_cast %5 : vector<16x128xf32> to vector<2x8x128xf32>
    %c0_4 = arith.constant 0 : index
    %c0_5 = arith.constant 0 : index
    %c0_6 = arith.constant 0 : index
    %7 = vector.load %arg6[%c0_4, %c0_5, %c0_6] : memref<2x8x128xf32, #tpu.memory_space<vmem>>, vector<2x8x128xf32>
    tpu.vector_store %arg6[%c0_4, %c0_5, %c0_6], %6 {strides = array<i32>} : memref<2x8x128xf32, #tpu.memory_space<vmem>>, vector<2x8x128xf32>,
    return
  }
  func.func @transform_0(%arg0: i32) -> (i32, i32, i32) {
    %c0_i32 = arith.constant 0 : i32
    %c0_i32_0 = arith.constant 0 : i32
    %c0_i32_1 = arith.constant 0 : i32
    %c0_i32_2 = arith.constant 0 : i32
    return %c0_i32, %c0_i32_0, %c0_i32_1 : i32, i32, i32
  }
  func.func @transform_1(%arg0: i32) -> (i32, i32) {
    %c0_i32 = arith.constant 0 : i32
    %c0_i32_0 = arith.constant 0 : i32
    %c0_i32_1 = arith.constant 0 : i32
    return %c0_i32, %c0_i32_0 : i32, i32
  }
  func.func @transform_2(%arg0: i32) -> (i32, i32) {
    %c0_i32 = arith.constant 0 : i32
    %c0_i32_0 = arith.constant 0 : i32
    %c0_i32_1 = arith.constant 0 : i32
    return %c0_i32, %c0_i32_0 : i32, i32
  }
  func.func @transform_3(%arg0: i32) -> (i32, i32) {
    %c0_i32 = arith.constant 0 : i32
    %c0_i32_0 = arith.constant 0 : i32
    return %arg0, %c0_i32 : i32, i32
  }
  func.func @transform_4(%arg0: i32) -> (i32, i32, i32) {
    %c0_i32 = arith.constant 0 : i32
    %c0_i32_0 = arith.constant 0 : i32
    %c0_i32_1 = arith.constant 0 : i32
    %c0_i32_2 = arith.constant 0 : i32
    return %c0_i32, %c0_i32_0, %c0_i32_1 : i32, i32, i32
  }
  func.func @transform_5(%arg0: i32) -> (i32, i32, i32) {
    %c0_i32 = arith.constant 0 : i32
    %c0_i32_0 = arith.constant 0 : i32
    %c0_i32_1 = arith.constant 0 : i32
    return %c0_i32, %c0_i32_0, %arg0 : i32, i32, i32
  }
}

module attributes {stable_mosaic.version = 11 : i64} {
  func.func @_layer_kernel(%arg0: i32, %arg1: i32, %arg2: memref<2x1x8xf32, #tpu.memory_space<vmem>>, %arg3: memref<2x8x128xbf16, #tpu.memory_space<vmem>>, %arg4: memref<1x8x128xf32, #tpu.memory_space<vmem>>, %arg5: memref<2x1x128xf32, #tpu.memory_space<vmem>>, %arg6: memref<128x128xbf16, #tpu.memory_space<vmem>>, %arg7: memref<1x128xf32, #tpu.memory_space<vmem>>, %arg8: memref<1x1x128xf32, #tpu.memory_space<vmem>>, %arg9: memref<1x1x128xf32, #tpu.memory_space<vmem>>, %arg10: memref<1x128x384xbf16, #tpu.memory_space<vmem>>, %arg11: memref<1x1x384xf32, #tpu.memory_space<vmem>>, %arg12: memref<1x128x128xbf16, #tpu.memory_space<vmem>>, %arg13: memref<1x1x128xf32, #tpu.memory_space<vmem>>, %arg14: memref<1x1x128xf32, #tpu.memory_space<vmem>>, %arg15: memref<1x1x128xf32, #tpu.memory_space<vmem>>, %arg16: memref<1x128x512xbf16, #tpu.memory_space<vmem>>, %arg17: memref<1x1x512xf32, #tpu.memory_space<vmem>>, %arg18: memref<1x512x128xbf16, #tpu.memory_space<vmem>>, %arg19: memref<1x1x128xf32, #tpu.memory_space<vmem>>, %arg20: memref<2x8x128xf32, #tpu.memory_space<vmem>>, %arg21: memref<2x8x8xf32, #tpu.memory_space<vmem>>, %arg22: memref<2x8x128xf32, #tpu.memory_space<vmem>>) attributes {dimension_semantics = [#tpu.dimension_semantics<parallel>, #tpu.dimension_semantics<arbitrary>], iteration_bounds = array<i64: 1, 2>, scalar_prefetch = 0 : i64, scratch_operands = 2 : i64, tpu.core_type = #tpu.core_type<tc>, window_params = [{transform_indices = @transform_0, window_bounds = array<i64: 2, 1, 8>}, {transform_indices = @transform_1, window_bounds = array<i64: 2, 8, 128>}, {pipeline_mode = #tpu.pipeline_mode<synchronous>, transform_indices = @transform_2, window_bounds = array<i64: 1, 8, 128>}, {transform_indices = @transform_3, window_bounds = array<i64: 2, 1, 128>}, {pipeline_mode = #tpu.pipeline_mode<synchronous>, transform_indices = @transform_4, window_bounds = array<i64: 128, 128>}, {pipeline_mode = #tpu.pipeline_mode<synchronous>, transform_indices = @transform_5, window_bounds = array<i64: 1, 128>}, {transform_indices = @transform_6, window_bounds = array<i64: 1, 1, 128>}, {transform_indices = @transform_7, window_bounds = array<i64: 1, 1, 128>}, {transform_indices = @transform_8, window_bounds = array<i64: 1, 128, 384>}, {transform_indices = @transform_9, window_bounds = array<i64: 1, 1, 384>}, {transform_indices = @transform_10, window_bounds = array<i64: 1, 128, 128>}, {transform_indices = @transform_11, window_bounds = array<i64: 1, 1, 128>}, {transform_indices = @transform_12, window_bounds = array<i64: 1, 1, 128>}, {transform_indices = @transform_13, window_bounds = array<i64: 1, 1, 128>}, {transform_indices = @transform_14, window_bounds = array<i64: 1, 128, 512>}, {transform_indices = @transform_15, window_bounds = array<i64: 1, 1, 512>}, {transform_indices = @transform_16, window_bounds = array<i64: 1, 512, 128>}, {transform_indices = @transform_17, window_bounds = array<i64: 1, 1, 128>}, {transform_indices = @transform_18, window_bounds = array<i64: 2, 8, 128>}]} {
    %c0_i32 = arith.constant 0 : i32
    %0 = arith.cmpi eq, %arg1, %c0_i32 : i32
    %1 = arith.extui %0 : i1 to i32
    %c0_i32_0 = arith.constant 0 : i32
    %2 = arith.cmpi ne, %1, %c0_i32_0 : i32
    scf.if %2 {
      %c0_90 = arith.constant 0 : index
      %c0_91 = arith.constant 0 : index
      %c0_92 = arith.constant 0 : index
      %184 = vector.load %arg4[%c0_90, %c0_91, %c0_92] : memref<1x8x128xf32, #tpu.memory_space<vmem>>, vector<1x8x128xf32>
      %185 = vector.shape_cast %184 : vector<1x8x128xf32> to vector<8x128xf32>
      %c0_93 = arith.constant 0 : index
      %c0_94 = arith.constant 0 : index
      %c0_95 = arith.constant 0 : index
      %186 = vector.load %arg5[%c0_93, %c0_94, %c0_95] : memref<2x1x128xf32, #tpu.memory_space<vmem>>, vector<1x1x128xf32>
      %187 = vector.shape_cast %186 : vector<1x1x128xf32> to vector<1x128xf32>
      %188 = arith.truncf %187 : vector<1x128xf32> to vector<1x128xbf16>
      %c0_96 = arith.constant 0 : index
      %c0_97 = arith.constant 0 : index
      %189 = vector.load %arg6[%c0_96, %c0_97] : memref<128x128xbf16, #tpu.memory_space<vmem>>, vector<128x128xbf16>
      %cst_98 = arith.constant dense<0.000000e+00> : vector<1x128xf32>
      %190 = tpu.matmul %188, %189, %cst_98 {dimension_numbers = #tpu.dot_dimension_numbers<[1], [0], [0], [1], [0, 0, 1, 1], [], []>} : vector<1x128xbf16>, vector<128x128xbf16>, vector<1x128xf32> -> vector<1x128xf32>
      %c0_99 = arith.constant 0 : index
      %c0_100 = arith.constant 0 : index
      %191 = vector.load %arg7[%c0_99, %c0_100] : memref<1x128xf32, #tpu.memory_space<vmem>>, vector<1x128xf32>
      %192 = arith.addf %190, %191 : vector<1x128xf32>
      %c0_101 = arith.constant 0 : index
      %c0_102 = arith.constant 0 : index
      %c0_103 = arith.constant 0 : index
      %193 = vector.load %arg3[%c0_101, %c0_102, %c0_103] : memref<2x8x128xbf16, #tpu.memory_space<vmem>>, vector<1x8x128xbf16>
      %194 = vector.shape_cast %193 : vector<1x8x128xbf16> to vector<8x128xbf16>
      %195 = arith.extf %194 : vector<8x128xbf16> to vector<8x128xf32>
      %196 = arith.addf %195, %185 : vector<8x128xf32>
      %197 = vector.broadcast %192 : vector<1x128xf32> to vector<8x128xf32>
      %198 = arith.addf %196, %197 : vector<8x128xf32>
      %c0_104 = arith.constant 0 : index
      %c0_105 = arith.constant 0 : index
      %c0_106 = arith.constant 0 : index
      %199 = vector.load %arg20[%c0_104, %c0_105, %c0_106] : memref<2x8x128xf32, #tpu.memory_space<vmem>>, vector<1x8x128xf32>
      %200 = vector.shape_cast %199 : vector<1x8x128xf32> to vector<8x128xf32>
      %201 = vector.shape_cast %198 : vector<8x128xf32> to vector<1x8x128xf32>
      tpu.vector_store %arg20[%c0_104, %c0_105, %c0_106], %201 {strides = array<i32>} : memref<2x8x128xf32, #tpu.memory_space<vmem>>, vector<1x8x128xf32>,
      %c1 = arith.constant 1 : index
      %c0_107 = arith.constant 0 : index
      %c0_108 = arith.constant 0 : index
      %202 = vector.load %arg5[%c1, %c0_107, %c0_108] : memref<2x1x128xf32, #tpu.memory_space<vmem>>, vector<1x1x128xf32>
      %203 = vector.shape_cast %202 : vector<1x1x128xf32> to vector<1x128xf32>
      %204 = arith.truncf %203 : vector<1x128xf32> to vector<1x128xbf16>
      %c0_109 = arith.constant 0 : index
      %c0_110 = arith.constant 0 : index
      %205 = vector.load %arg6[%c0_109, %c0_110] : memref<128x128xbf16, #tpu.memory_space<vmem>>, vector<128x128xbf16>
      %cst_111 = arith.constant dense<0.000000e+00> : vector<1x128xf32>
      %206 = tpu.matmul %204, %205, %cst_111 {dimension_numbers = #tpu.dot_dimension_numbers<[1], [0], [0], [1], [0, 0, 1, 1], [], []>} : vector<1x128xbf16>, vector<128x128xbf16>, vector<1x128xf32> -> vector<1x128xf32>
      %c0_112 = arith.constant 0 : index
      %c0_113 = arith.constant 0 : index
      %207 = vector.load %arg7[%c0_112, %c0_113] : memref<1x128xf32, #tpu.memory_space<vmem>>, vector<1x128xf32>
      %208 = arith.addf %206, %207 : vector<1x128xf32>
      %c1_114 = arith.constant 1 : index
      %c0_115 = arith.constant 0 : index
      %c0_116 = arith.constant 0 : index
      %209 = vector.load %arg3[%c1_114, %c0_115, %c0_116] : memref<2x8x128xbf16, #tpu.memory_space<vmem>>, vector<1x8x128xbf16>
      %210 = vector.shape_cast %209 : vector<1x8x128xbf16> to vector<8x128xbf16>
      %211 = arith.extf %210 : vector<8x128xbf16> to vector<8x128xf32>
      %212 = arith.addf %211, %185 : vector<8x128xf32>
      %213 = vector.broadcast %208 : vector<1x128xf32> to vector<8x128xf32>
      %214 = arith.addf %212, %213 : vector<8x128xf32>
      %c1_117 = arith.constant 1 : index
      %c0_118 = arith.constant 0 : index
      %c0_119 = arith.constant 0 : index
      %215 = vector.load %arg20[%c1_117, %c0_118, %c0_119] : memref<2x8x128xf32, #tpu.memory_space<vmem>>, vector<1x8x128xf32>
      %216 = vector.shape_cast %215 : vector<1x8x128xf32> to vector<8x128xf32>
      %217 = vector.shape_cast %214 : vector<8x128xf32> to vector<1x8x128xf32>
      tpu.vector_store %arg20[%c1_117, %c0_118, %c0_119], %217 {strides = array<i32>} : memref<2x8x128xf32, #tpu.memory_space<vmem>>, vector<1x8x128xf32>,
      %c0_120 = arith.constant 0 : index
      %c0_121 = arith.constant 0 : index
      %c0_122 = arith.constant 0 : index
      %218 = vector.load %arg2[%c0_120, %c0_121, %c0_122] : memref<2x1x8xf32, #tpu.memory_space<vmem>>, vector<2x1x8xf32>
      %cst_123 = arith.constant 0.000000e+00 : f32
      %219 = vector.broadcast %cst_123 : f32 to vector<2x1x8xf32>
      %220 = arith.cmpf ogt, %218, %219 : vector<2x1x8xf32>
      %221 = tpu.iota {dimensions = array<i32: 0>} : vector<8x8xi32>
      %222 = tpu.iota {dimensions = array<i32: 1>} : vector<8x8xi32>
      %223 = arith.cmpi sle, %222, %221 : vector<8x8xi32>
      %224 = vector.shape_cast %223 : vector<8x8xi1> to vector<1x8x8xi1>
      %225 = vector.broadcast %224 : vector<1x8x8xi1> to vector<2x8x8xi1>
      %226 = vector.broadcast %220 : vector<2x1x8xi1> to vector<2x8x8xi1>
      %227 = arith.andi %225, %226 : vector<2x8x8xi1>
      %cst_124 = arith.constant 0.000000e+00 : f32
      %cst_125 = arith.constant -1.000000e+09 : f32
      %228 = vector.broadcast %cst_124 : f32 to vector<2x8x8xf32>
      %229 = vector.broadcast %cst_125 : f32 to vector<2x8x8xf32>
      %230 = arith.select %227, %228, %229 : vector<2x8x8xi1>, vector<2x8x8xf32>
      %c0_126 = arith.constant 0 : index
      %c0_127 = arith.constant 0 : index
      %c0_128 = arith.constant 0 : index
      %231 = vector.load %arg21[%c0_126, %c0_127, %c0_128] : memref<2x8x8xf32, #tpu.memory_space<vmem>>, vector<2x8x8xf32>
      tpu.vector_store %arg21[%c0_126, %c0_127, %c0_128], %230 {strides = array<i32>} : memref<2x8x8xf32, #tpu.memory_space<vmem>>, vector<2x8x8xf32>,
    } else {
    }
    %c0 = arith.constant 0 : index
    %c0_1 = arith.constant 0 : index
    %c0_2 = arith.constant 0 : index
    %3 = vector.load %arg20[%c0, %c0_1, %c0_2] : memref<2x8x128xf32, #tpu.memory_space<vmem>>, vector<2x8x128xf32>
    %c0_3 = arith.constant 0 : index
    %c0_4 = arith.constant 0 : index
    %c0_5 = arith.constant 0 : index
    %4 = vector.load %arg21[%c0_3, %c0_4, %c0_5] : memref<2x8x8xf32, #tpu.memory_space<vmem>>, vector<2x8x8xf32>
    %5 = vector.shape_cast %3 : vector<2x8x128xf32> to vector<16x128xf32>
    %c0_6 = arith.constant 0 : index
    %c0_7 = arith.constant 0 : index
    %c0_8 = arith.constant 0 : index
    %6 = vector.load %arg8[%c0_6, %c0_7, %c0_8] : memref<1x1x128xf32, #tpu.memory_space<vmem>>, vector<1x1x128xf32>
    %7 = vector.shape_cast %6 : vector<1x1x128xf32> to vector<1x128xf32>
    %c0_9 = arith.constant 0 : index
    %c0_10 = arith.constant 0 : index
    %c0_11 = arith.constant 0 : index
    %8 = vector.load %arg9[%c0_9, %c0_10, %c0_11] : memref<1x1x128xf32, #tpu.memory_space<vmem>>, vector<1x1x128xf32>
    %9 = vector.shape_cast %8 : vector<1x1x128xf32> to vector<1x128xf32>
    %cst = arith.constant dense<0.000000e+00> : vector<16xf32>
    %10 = vector.multi_reduction <add>, %5, %cst [1] : vector<16x128xf32> to vector<16xf32>
    %11 = vector.shape_cast %10 : vector<16xf32> to vector<16x1xf32>
    %cst_12 = arith.constant 1.280000e+02 : f32
    %12 = vector.broadcast %cst_12 : f32 to vector<16x1xf32>
    %13 = arith.divf %11, %12 : vector<16x1xf32>
    %14 = vector.broadcast %13 : vector<16x1xf32> to vector<16x128xf32>
    %15 = arith.subf %5, %14 : vector<16x128xf32>
    %16 = arith.mulf %15, %15 : vector<16x128xf32>
    %cst_13 = arith.constant dense<0.000000e+00> : vector<16xf32>
    %17 = vector.multi_reduction <add>, %16, %cst_13 [1] : vector<16x128xf32> to vector<16xf32>
    %18 = vector.shape_cast %17 : vector<16xf32> to vector<16x1xf32>
    %cst_14 = arith.constant 1.280000e+02 : f32
    %19 = vector.broadcast %cst_14 : f32 to vector<16x1xf32>
    %20 = arith.divf %18, %19 : vector<16x1xf32>
    %cst_15 = arith.constant 9.99999974E-6 : f32
    %21 = vector.broadcast %cst_15 : f32 to vector<16x1xf32>
    %22 = arith.addf %20, %21 : vector<16x1xf32>
    %23 = math.rsqrt %22 : vector<16x1xf32>
    %24 = vector.broadcast %23 : vector<16x1xf32> to vector<16x128xf32>
    %25 = arith.mulf %15, %24 : vector<16x128xf32>
    %26 = vector.broadcast %7 : vector<1x128xf32> to vector<16x128xf32>
    %27 = arith.mulf %25, %26 : vector<16x128xf32>
    %28 = vector.broadcast %9 : vector<1x128xf32> to vector<16x128xf32>
    %29 = arith.addf %27, %28 : vector<16x128xf32>
    %30 = arith.truncf %29 : vector<16x128xf32> to vector<16x128xbf16>
    %c0_16 = arith.constant 0 : index
    %c0_17 = arith.constant 0 : index
    %c0_18 = arith.constant 0 : index
    %31 = vector.load %arg10[%c0_16, %c0_17, %c0_18] : memref<1x128x384xbf16, #tpu.memory_space<vmem>>, vector<1x128x384xbf16>
    %32 = vector.shape_cast %31 : vector<1x128x384xbf16> to vector<128x384xbf16>
    %cst_19 = arith.constant dense<0.000000e+00> : vector<16x384xf32>
    %33 = tpu.matmul %30, %32, %cst_19 {dimension_numbers = #tpu.dot_dimension_numbers<[1], [0], [0], [1], [0, 0, 1, 1], [], []>} : vector<16x128xbf16>, vector<128x384xbf16>, vector<16x384xf32> -> vector<16x384xf32>
    %c0_20 = arith.constant 0 : index
    %c0_21 = arith.constant 0 : index
    %c0_22 = arith.constant 0 : index
    %34 = vector.load %arg11[%c0_20, %c0_21, %c0_22] : memref<1x1x384xf32, #tpu.memory_space<vmem>>, vector<1x1x384xf32>
    %35 = vector.shape_cast %34 : vector<1x1x384xf32> to vector<1x384xf32>
    %36 = vector.broadcast %35 : vector<1x384xf32> to vector<16x384xf32>
    %37 = arith.addf %33, %36 : vector<16x384xf32>
    %38 = arith.truncf %37 : vector<16x384xf32> to vector<16x384xbf16>
    %39 = vector.shape_cast %38 : vector<16x384xbf16> to vector<2x8x384xbf16>
    %40 = vector.extract_strided_slice %39 {offsets = [0, 0, 0], sizes = [2, 8, 128], strides = [1, 1, 1]} : vector<2x8x384xbf16> to vector<2x8x128xbf16>
    %41 = vector.extract_strided_slice %39 {offsets = [0, 0, 128], sizes = [2, 8, 128], strides = [1, 1, 1]} : vector<2x8x384xbf16> to vector<2x8x128xbf16>
    %42 = vector.extract_strided_slice %39 {offsets = [0, 0, 256], sizes = [2, 8, 128], strides = [1, 1, 1]} : vector<2x8x384xbf16> to vector<2x8x128xbf16>
    %43 = vector.extract_strided_slice %40 {offsets = [0, 0, 0], sizes = [2, 8, 32], strides = [1, 1, 1]} : vector<2x8x128xbf16> to vector<2x8x32xbf16>
    %44 = vector.extract_strided_slice %41 {offsets = [0, 0, 0], sizes = [2, 8, 32], strides = [1, 1, 1]} : vector<2x8x128xbf16> to vector<2x8x32xbf16>
    "tpu.trace_start"() <{level = 10 : i32, message = "bqd,bkd->bqk"}> : () -> ()
    %cst_23 = arith.constant dense<0.000000e+00> : vector<2x8x8xf32>
    %45 = tpu.matmul %43, %44, %cst_23 {dimension_numbers = #tpu.dot_dimension_numbers<[2], [2], [1], [1], [0, 0, 0, 1, 1, 1], [0], [0]>} : vector<2x8x32xbf16>, vector<2x8x32xbf16>, vector<2x8x8xf32> -> vector<2x8x8xf32>
    "tpu.trace_stop"() : () -> ()
    %46 = arith.addf %45, %4 : vector<2x8x8xf32>
    %cst_24 = arith.constant dense<0xFF800000> : vector<2x8xf32>
    %47 = vector.multi_reduction <maximumf>, %46, %cst_24 [2] : vector<2x8x8xf32> to vector<2x8xf32>
    %48 = vector.shape_cast %47 : vector<2x8xf32> to vector<2x8x1xf32>
    %49 = vector.broadcast %48 : vector<2x8x1xf32> to vector<2x8x8xf32>
    %50 = arith.subf %46, %49 : vector<2x8x8xf32>
    %51 = math.exp %50 : vector<2x8x8xf32>
    %cst_25 = arith.constant dense<0.000000e+00> : vector<2x8xf32>
    %52 = vector.multi_reduction <add>, %51, %cst_25 [2] : vector<2x8x8xf32> to vector<2x8xf32>
    %53 = vector.shape_cast %52 : vector<2x8xf32> to vector<2x8x1xf32>
    %54 = tpu.reciprocal %53 {approx = true} : vector<2x8x1xf32> -> vector<2x8x1xf32>
    %55 = vector.broadcast %54 : vector<2x8x1xf32> to vector<2x8x8xf32>
    %56 = arith.mulf %51, %55 : vector<2x8x8xf32>
    %57 = arith.truncf %56 : vector<2x8x8xf32> to vector<2x8x8xbf16>
    %58 = vector.extract_strided_slice %42 {offsets = [0, 0, 0], sizes = [2, 8, 32], strides = [1, 1, 1]} : vector<2x8x128xbf16> to vector<2x8x32xbf16>
    "tpu.trace_start"() <{level = 10 : i32, message = "bqk,bkd->bqd"}> : () -> ()
    %cst_26 = arith.constant dense<0.000000e+00> : vector<2x8x32xf32>
    %59 = tpu.matmul %57, %58, %cst_26 {dimension_numbers = #tpu.dot_dimension_numbers<[2], [1], [1], [2], [0, 0, 0, 1, 1, 2], [0], [0]>} : vector<2x8x8xbf16>, vector<2x8x32xbf16>, vector<2x8x32xf32> -> vector<2x8x32xf32>
    "tpu.trace_stop"() : () -> ()
    %c0_27 = arith.constant 0 : index
    %c0_28 = arith.constant 0 : index
    %c0_29 = arith.constant 0 : index
    %60 = vector.load %arg22[%c0_27, %c0_28, %c0_29] : memref<2x8x128xf32, #tpu.memory_space<vmem>>, vector<2x8x32xf32>
    tpu.vector_store %arg22[%c0_27, %c0_28, %c0_29], %59 {strides = array<i32>} : memref<2x8x128xf32, #tpu.memory_space<vmem>>, vector<2x8x32xf32>,
    %61 = vector.extract_strided_slice %40 {offsets = [0, 0, 32], sizes = [2, 8, 32], strides = [1, 1, 1]} : vector<2x8x128xbf16> to vector<2x8x32xbf16>
    %62 = vector.extract_strided_slice %41 {offsets = [0, 0, 32], sizes = [2, 8, 32], strides = [1, 1, 1]} : vector<2x8x128xbf16> to vector<2x8x32xbf16>
    "tpu.trace_start"() <{level = 10 : i32, message = "bqd,bkd->bqk"}> : () -> ()
    %cst_30 = arith.constant dense<0.000000e+00> : vector<2x8x8xf32>
    %63 = tpu.matmul %61, %62, %cst_30 {dimension_numbers = #tpu.dot_dimension_numbers<[2], [2], [1], [1], [0, 0, 0, 1, 1, 1], [0], [0]>} : vector<2x8x32xbf16>, vector<2x8x32xbf16>, vector<2x8x8xf32> -> vector<2x8x8xf32>
    "tpu.trace_stop"() : () -> ()
    %64 = arith.addf %63, %4 : vector<2x8x8xf32>
    %cst_31 = arith.constant dense<0xFF800000> : vector<2x8xf32>
    %65 = vector.multi_reduction <maximumf>, %64, %cst_31 [2] : vector<2x8x8xf32> to vector<2x8xf32>
    %66 = vector.shape_cast %65 : vector<2x8xf32> to vector<2x8x1xf32>
    %67 = vector.broadcast %66 : vector<2x8x1xf32> to vector<2x8x8xf32>
    %68 = arith.subf %64, %67 : vector<2x8x8xf32>
    %69 = math.exp %68 : vector<2x8x8xf32>
    %cst_32 = arith.constant dense<0.000000e+00> : vector<2x8xf32>
    %70 = vector.multi_reduction <add>, %69, %cst_32 [2] : vector<2x8x8xf32> to vector<2x8xf32>
    %71 = vector.shape_cast %70 : vector<2x8xf32> to vector<2x8x1xf32>
    %72 = tpu.reciprocal %71 {approx = true} : vector<2x8x1xf32> -> vector<2x8x1xf32>
    %73 = vector.broadcast %72 : vector<2x8x1xf32> to vector<2x8x8xf32>
    %74 = arith.mulf %69, %73 : vector<2x8x8xf32>
    %75 = arith.truncf %74 : vector<2x8x8xf32> to vector<2x8x8xbf16>
    %76 = vector.extract_strided_slice %42 {offsets = [0, 0, 32], sizes = [2, 8, 32], strides = [1, 1, 1]} : vector<2x8x128xbf16> to vector<2x8x32xbf16>
    "tpu.trace_start"() <{level = 10 : i32, message = "bqk,bkd->bqd"}> : () -> ()
    %cst_33 = arith.constant dense<0.000000e+00> : vector<2x8x32xf32>
    %77 = tpu.matmul %75, %76, %cst_33 {dimension_numbers = #tpu.dot_dimension_numbers<[2], [1], [1], [2], [0, 0, 0, 1, 1, 2], [0], [0]>} : vector<2x8x8xbf16>, vector<2x8x32xbf16>, vector<2x8x32xf32> -> vector<2x8x32xf32>
    "tpu.trace_stop"() : () -> ()
    %c0_34 = arith.constant 0 : index
    %c0_35 = arith.constant 0 : index
    %c32 = arith.constant 32 : index
    %78 = vector.load %arg22[%c0_34, %c0_35, %c32] : memref<2x8x128xf32, #tpu.memory_space<vmem>>, vector<2x8x32xf32>
    tpu.vector_store %arg22[%c0_34, %c0_35, %c32], %77 {strides = array<i32>} : memref<2x8x128xf32, #tpu.memory_space<vmem>>, vector<2x8x32xf32>,
    %79 = vector.extract_strided_slice %40 {offsets = [0, 0, 64], sizes = [2, 8, 32], strides = [1, 1, 1]} : vector<2x8x128xbf16> to vector<2x8x32xbf16>
    %80 = vector.extract_strided_slice %41 {offsets = [0, 0, 64], sizes = [2, 8, 32], strides = [1, 1, 1]} : vector<2x8x128xbf16> to vector<2x8x32xbf16>
    "tpu.trace_start"() <{level = 10 : i32, message = "bqd,bkd->bqk"}> : () -> ()
    %cst_36 = arith.constant dense<0.000000e+00> : vector<2x8x8xf32>
    %81 = tpu.matmul %79, %80, %cst_36 {dimension_numbers = #tpu.dot_dimension_numbers<[2], [2], [1], [1], [0, 0, 0, 1, 1, 1], [0], [0]>} : vector<2x8x32xbf16>, vector<2x8x32xbf16>, vector<2x8x8xf32> -> vector<2x8x8xf32>
    "tpu.trace_stop"() : () -> ()
    %82 = arith.addf %81, %4 : vector<2x8x8xf32>
    %cst_37 = arith.constant dense<0xFF800000> : vector<2x8xf32>
    %83 = vector.multi_reduction <maximumf>, %82, %cst_37 [2] : vector<2x8x8xf32> to vector<2x8xf32>
    %84 = vector.shape_cast %83 : vector<2x8xf32> to vector<2x8x1xf32>
    %85 = vector.broadcast %84 : vector<2x8x1xf32> to vector<2x8x8xf32>
    %86 = arith.subf %82, %85 : vector<2x8x8xf32>
    %87 = math.exp %86 : vector<2x8x8xf32>
    %cst_38 = arith.constant dense<0.000000e+00> : vector<2x8xf32>
    %88 = vector.multi_reduction <add>, %87, %cst_38 [2] : vector<2x8x8xf32> to vector<2x8xf32>
    %89 = vector.shape_cast %88 : vector<2x8xf32> to vector<2x8x1xf32>
    %90 = tpu.reciprocal %89 {approx = true} : vector<2x8x1xf32> -> vector<2x8x1xf32>
    %91 = vector.broadcast %90 : vector<2x8x1xf32> to vector<2x8x8xf32>
    %92 = arith.mulf %87, %91 : vector<2x8x8xf32>
    %93 = arith.truncf %92 : vector<2x8x8xf32> to vector<2x8x8xbf16>
    %94 = vector.extract_strided_slice %42 {offsets = [0, 0, 64], sizes = [2, 8, 32], strides = [1, 1, 1]} : vector<2x8x128xbf16> to vector<2x8x32xbf16>
    "tpu.trace_start"() <{level = 10 : i32, message = "bqk,bkd->bqd"}> : () -> ()
    %cst_39 = arith.constant dense<0.000000e+00> : vector<2x8x32xf32>
    %95 = tpu.matmul %93, %94, %cst_39 {dimension_numbers = #tpu.dot_dimension_numbers<[2], [1], [1], [2], [0, 0, 0, 1, 1, 2], [0], [0]>} : vector<2x8x8xbf16>, vector<2x8x32xbf16>, vector<2x8x32xf32> -> vector<2x8x32xf32>
    "tpu.trace_stop"() : () -> ()
    %c0_40 = arith.constant 0 : index
    %c0_41 = arith.constant 0 : index
    %c64 = arith.constant 64 : index
    %96 = vector.load %arg22[%c0_40, %c0_41, %c64] : memref<2x8x128xf32, #tpu.memory_space<vmem>>, vector<2x8x32xf32>
    tpu.vector_store %arg22[%c0_40, %c0_41, %c64], %95 {strides = array<i32>} : memref<2x8x128xf32, #tpu.memory_space<vmem>>, vector<2x8x32xf32>,
    %97 = vector.extract_strided_slice %40 {offsets = [0, 0, 96], sizes = [2, 8, 32], strides = [1, 1, 1]} : vector<2x8x128xbf16> to vector<2x8x32xbf16>
    %98 = vector.extract_strided_slice %41 {offsets = [0, 0, 96], sizes = [2, 8, 32], strides = [1, 1, 1]} : vector<2x8x128xbf16> to vector<2x8x32xbf16>
    "tpu.trace_start"() <{level = 10 : i32, message = "bqd,bkd->bqk"}> : () -> ()
    %cst_42 = arith.constant dense<0.000000e+00> : vector<2x8x8xf32>
    %99 = tpu.matmul %97, %98, %cst_42 {dimension_numbers = #tpu.dot_dimension_numbers<[2], [2], [1], [1], [0, 0, 0, 1, 1, 1], [0], [0]>} : vector<2x8x32xbf16>, vector<2x8x32xbf16>, vector<2x8x8xf32> -> vector<2x8x8xf32>
    "tpu.trace_stop"() : () -> ()
    %100 = arith.addf %99, %4 : vector<2x8x8xf32>
    %cst_43 = arith.constant dense<0xFF800000> : vector<2x8xf32>
    %101 = vector.multi_reduction <maximumf>, %100, %cst_43 [2] : vector<2x8x8xf32> to vector<2x8xf32>
    %102 = vector.shape_cast %101 : vector<2x8xf32> to vector<2x8x1xf32>
    %103 = vector.broadcast %102 : vector<2x8x1xf32> to vector<2x8x8xf32>
    %104 = arith.subf %100, %103 : vector<2x8x8xf32>
    %105 = math.exp %104 : vector<2x8x8xf32>
    %cst_44 = arith.constant dense<0.000000e+00> : vector<2x8xf32>
    %106 = vector.multi_reduction <add>, %105, %cst_44 [2] : vector<2x8x8xf32> to vector<2x8xf32>
    %107 = vector.shape_cast %106 : vector<2x8xf32> to vector<2x8x1xf32>
    %108 = tpu.reciprocal %107 {approx = true} : vector<2x8x1xf32> -> vector<2x8x1xf32>
    %109 = vector.broadcast %108 : vector<2x8x1xf32> to vector<2x8x8xf32>
    %110 = arith.mulf %105, %109 : vector<2x8x8xf32>
    %111 = arith.truncf %110 : vector<2x8x8xf32> to vector<2x8x8xbf16>
    %112 = vector.extract_strided_slice %42 {offsets = [0, 0, 96], sizes = [2, 8, 32], strides = [1, 1, 1]} : vector<2x8x128xbf16> to vector<2x8x32xbf16>
    "tpu.trace_start"() <{level = 10 : i32, message = "bqk,bkd->bqd"}> : () -> ()
    %cst_45 = arith.constant dense<0.000000e+00> : vector<2x8x32xf32>
    %113 = tpu.matmul %111, %112, %cst_45 {dimension_numbers = #tpu.dot_dimension_numbers<[2], [1], [1], [2], [0, 0, 0, 1, 1, 2], [0], [0]>} : vector<2x8x8xbf16>, vector<2x8x32xbf16>, vector<2x8x32xf32> -> vector<2x8x32xf32>
    "tpu.trace_stop"() : () -> ()
    %c0_46 = arith.constant 0 : index
    %c0_47 = arith.constant 0 : index
    %c96 = arith.constant 96 : index
    %114 = vector.load %arg22[%c0_46, %c0_47, %c96] : memref<2x8x128xf32, #tpu.memory_space<vmem>>, vector<2x8x32xf32>
    tpu.vector_store %arg22[%c0_46, %c0_47, %c96], %113 {strides = array<i32>} : memref<2x8x128xf32, #tpu.memory_space<vmem>>, vector<2x8x32xf32>,
    %c0_48 = arith.constant 0 : index
    %c0_49 = arith.constant 0 : index
    %c0_50 = arith.constant 0 : index
    %115 = vector.load %arg22[%c0_48, %c0_49, %c0_50] : memref<2x8x128xf32, #tpu.memory_space<vmem>>, vector<2x8x128xf32>
    %116 = vector.shape_cast %115 : vector<2x8x128xf32> to vector<16x128xf32>
    %117 = arith.truncf %116 : vector<16x128xf32> to vector<16x128xbf16>
    %c0_51 = arith.constant 0 : index
    %c0_52 = arith.constant 0 : index
    %c0_53 = arith.constant 0 : index
    %118 = vector.load %arg12[%c0_51, %c0_52, %c0_53] : memref<1x128x128xbf16, #tpu.memory_space<vmem>>, vector<1x128x128xbf16>
    %119 = vector.shape_cast %118 : vector<1x128x128xbf16> to vector<128x128xbf16>
    %cst_54 = arith.constant dense<0.000000e+00> : vector<16x128xf32>
    %120 = tpu.matmul %117, %119, %cst_54 {dimension_numbers = #tpu.dot_dimension_numbers<[1], [0], [0], [1], [0, 0, 1, 1], [], []>} : vector<16x128xbf16>, vector<128x128xbf16>, vector<16x128xf32> -> vector<16x128xf32>
    %c0_55 = arith.constant 0 : index
    %c0_56 = arith.constant 0 : index
    %c0_57 = arith.constant 0 : index
    %121 = vector.load %arg13[%c0_55, %c0_56, %c0_57] : memref<1x1x128xf32, #tpu.memory_space<vmem>>, vector<1x1x128xf32>
    %122 = vector.shape_cast %121 : vector<1x1x128xf32> to vector<1x128xf32>
    %123 = vector.broadcast %122 : vector<1x128xf32> to vector<16x128xf32>
    %124 = arith.addf %120, %123 : vector<16x128xf32>
    %125 = vector.shape_cast %124 : vector<16x128xf32> to vector<2x8x128xf32>
    %126 = arith.addf %3, %125 : vector<2x8x128xf32>
    %127 = vector.shape_cast %126 : vector<2x8x128xf32> to vector<16x128xf32>
    %c0_58 = arith.constant 0 : index
    %c0_59 = arith.constant 0 : index
    %c0_60 = arith.constant 0 : index
    %128 = vector.load %arg14[%c0_58, %c0_59, %c0_60] : memref<1x1x128xf32, #tpu.memory_space<vmem>>, vector<1x1x128xf32>
    %129 = vector.shape_cast %128 : vector<1x1x128xf32> to vector<1x128xf32>
    %c0_61 = arith.constant 0 : index
    %c0_62 = arith.constant 0 : index
    %c0_63 = arith.constant 0 : index
    %130 = vector.load %arg15[%c0_61, %c0_62, %c0_63] : memref<1x1x128xf32, #tpu.memory_space<vmem>>, vector<1x1x128xf32>
    %131 = vector.shape_cast %130 : vector<1x1x128xf32> to vector<1x128xf32>
    %cst_64 = arith.constant dense<0.000000e+00> : vector<16xf32>
    %132 = vector.multi_reduction <add>, %127, %cst_64 [1] : vector<16x128xf32> to vector<16xf32>
    %133 = vector.shape_cast %132 : vector<16xf32> to vector<16x1xf32>
    %cst_65 = arith.constant 1.280000e+02 : f32
    %134 = vector.broadcast %cst_65 : f32 to vector<16x1xf32>
    %135 = arith.divf %133, %134 : vector<16x1xf32>
    %136 = vector.broadcast %135 : vector<16x1xf32> to vector<16x128xf32>
    %137 = arith.subf %127, %136 : vector<16x128xf32>
    %138 = arith.mulf %137, %137 : vector<16x128xf32>
    %cst_66 = arith.constant dense<0.000000e+00> : vector<16xf32>
    %139 = vector.multi_reduction <add>, %138, %cst_66 [1] : vector<16x128xf32> to vector<16xf32>
    %140 = vector.shape_cast %139 : vector<16xf32> to vector<16x1xf32>
    %cst_67 = arith.constant 1.280000e+02 : f32
    %141 = vector.broadcast %cst_67 : f32 to vector<16x1xf32>
    %142 = arith.divf %140, %141 : vector<16x1xf32>
    %cst_68 = arith.constant 9.99999974E-6 : f32
    %143 = vector.broadcast %cst_68 : f32 to vector<16x1xf32>
    %144 = arith.addf %142, %143 : vector<16x1xf32>
    %145 = math.rsqrt %144 : vector<16x1xf32>
    %146 = vector.broadcast %145 : vector<16x1xf32> to vector<16x128xf32>
    %147 = arith.mulf %137, %146 : vector<16x128xf32>
    %148 = vector.broadcast %129 : vector<1x128xf32> to vector<16x128xf32>
    %149 = arith.mulf %147, %148 : vector<16x128xf32>
    %150 = vector.broadcast %131 : vector<1x128xf32> to vector<16x128xf32>
    %151 = arith.addf %149, %150 : vector<16x128xf32>
    %152 = arith.truncf %151 : vector<16x128xf32> to vector<16x128xbf16>
    %c0_69 = arith.constant 0 : index
    %c0_70 = arith.constant 0 : index
    %c0_71 = arith.constant 0 : index
    %153 = vector.load %arg16[%c0_69, %c0_70, %c0_71] : memref<1x128x512xbf16, #tpu.memory_space<vmem>>, vector<1x128x512xbf16>
    %154 = vector.shape_cast %153 : vector<1x128x512xbf16> to vector<128x512xbf16>
    %cst_72 = arith.constant dense<0.000000e+00> : vector<16x512xf32>
    %155 = tpu.matmul %152, %154, %cst_72 {dimension_numbers = #tpu.dot_dimension_numbers<[1], [0], [0], [1], [0, 0, 1, 1], [], []>} : vector<16x128xbf16>, vector<128x512xbf16>, vector<16x512xf32> -> vector<16x512xf32>
    %c0_73 = arith.constant 0 : index
    %c0_74 = arith.constant 0 : index
    %c0_75 = arith.constant 0 : index
    %156 = vector.load %arg17[%c0_73, %c0_74, %c0_75] : memref<1x1x512xf32, #tpu.memory_space<vmem>>, vector<1x1x512xf32>
    %157 = vector.shape_cast %156 : vector<1x1x512xf32> to vector<1x512xf32>
    %158 = vector.broadcast %157 : vector<1x512xf32> to vector<16x512xf32>
    %159 = arith.addf %155, %158 : vector<16x512xf32>
    %cst_76 = arith.constant 5.000000e-01 : f32
    %160 = vector.broadcast %cst_76 : f32 to vector<16x512xf32>
    %161 = arith.mulf %160, %159 : vector<16x512xf32>
    %cst_77 = arith.constant 4.471500e-02 : f32
    %162 = vector.broadcast %cst_77 : f32 to vector<16x512xf32>
    %163 = arith.mulf %162, %159 : vector<16x512xf32>
    %164 = arith.mulf %163, %159 : vector<16x512xf32>
    %165 = arith.mulf %164, %159 : vector<16x512xf32>
    %166 = arith.addf %159, %165 : vector<16x512xf32>
    %cst_78 = arith.constant 0.797884583 : f32
    %167 = vector.broadcast %cst_78 : f32 to vector<16x512xf32>
    %168 = arith.mulf %167, %166 : vector<16x512xf32>
    %169 = math.tanh %168 : vector<16x512xf32>
    %cst_79 = arith.constant 1.000000e+00 : f32
    %170 = vector.broadcast %cst_79 : f32 to vector<16x512xf32>
    %171 = arith.addf %170, %169 : vector<16x512xf32>
    %172 = arith.mulf %161, %171 : vector<16x512xf32>
    %173 = arith.truncf %172 : vector<16x512xf32> to vector<16x512xbf16>
    %c0_80 = arith.constant 0 : index
    %c0_81 = arith.constant 0 : index
    %c0_82 = arith.constant 0 : index
    %174 = vector.load %arg18[%c0_80, %c0_81, %c0_82] : memref<1x512x128xbf16, #tpu.memory_space<vmem>>, vector<1x512x128xbf16>
    %175 = vector.shape_cast %174 : vector<1x512x128xbf16> to vector<512x128xbf16>
    %cst_83 = arith.constant dense<0.000000e+00> : vector<16x128xf32>
    %176 = tpu.matmul %173, %175, %cst_83 {dimension_numbers = #tpu.dot_dimension_numbers<[1], [0], [0], [1], [0, 0, 1, 1], [], []>} : vector<16x512xbf16>, vector<512x128xbf16>, vector<16x128xf32> -> vector<16x128xf32>
    %c0_84 = arith.constant 0 : index
    %c0_85 = arith.constant 0 : index
    %c0_86 = arith.constant 0 : index
    %177 = vector.load %arg19[%c0_84, %c0_85, %c0_86] : memref<1x1x128xf32, #tpu.memory_space<vmem>>, vector<1x1x128xf32>
    %178 = vector.shape_cast %177 : vector<1x1x128xf32> to vector<1x128xf32>
    %179 = vector.broadcast %178 : vector<1x128xf32> to vector<16x128xf32>
    %180 = arith.addf %176, %179 : vector<16x128xf32>
    %181 = vector.shape_cast %180 : vector<16x128xf32> to vector<2x8x128xf32>
    %182 = arith.addf %126, %181 : vector<2x8x128xf32>
    %c0_87 = arith.constant 0 : index
    %c0_88 = arith.constant 0 : index
    %c0_89 = arith.constant 0 : index
    %183 = vector.load %arg20[%c0_87, %c0_88, %c0_89] : memref<2x8x128xf32, #tpu.memory_space<vmem>>, vector<2x8x128xf32>
    tpu.vector_store %arg20[%c0_87, %c0_88, %c0_89], %182 {strides = array<i32>} : memref<2x8x128xf32, #tpu.memory_space<vmem>>, vector<2x8x128xf32>,
    return
  }
  func.func @transform_0(%arg0: i32, %arg1: i32) -> (i32, i32, i32) {
    %c0_i32 = arith.constant 0 : i32
    %c0_i32_0 = arith.constant 0 : i32
    %c0_i32_1 = arith.constant 0 : i32
    return %arg0, %c0_i32, %c0_i32_0 : i32, i32, i32
  }
  func.func @transform_1(%arg0: i32, %arg1: i32) -> (i32, i32, i32) {
    %c0_i32 = arith.constant 0 : i32
    %c0_i32_0 = arith.constant 0 : i32
    %c0_i32_1 = arith.constant 0 : i32
    return %arg0, %c0_i32, %c0_i32_0 : i32, i32, i32
  }
  func.func @transform_2(%arg0: i32, %arg1: i32) -> (i32, i32, i32) {
    %c0_i32 = arith.constant 0 : i32
    %c0_i32_0 = arith.constant 0 : i32
    %c0_i32_1 = arith.constant 0 : i32
    %c0_i32_2 = arith.constant 0 : i32
    return %c0_i32, %c0_i32_0, %c0_i32_1 : i32, i32, i32
  }
  func.func @transform_3(%arg0: i32, %arg1: i32) -> (i32, i32, i32) {
    %c0_i32 = arith.constant 0 : i32
    %c0_i32_0 = arith.constant 0 : i32
    %c0_i32_1 = arith.constant 0 : i32
    return %arg0, %c0_i32, %c0_i32_0 : i32, i32, i32
  }
  func.func @transform_4(%arg0: i32, %arg1: i32) -> (i32, i32) {
    %c0_i32 = arith.constant 0 : i32
    %c0_i32_0 = arith.constant 0 : i32
    %c0_i32_1 = arith.constant 0 : i32
    return %c0_i32, %c0_i32_0 : i32, i32
  }
  func.func @transform_5(%arg0: i32, %arg1: i32) -> (i32, i32) {
    %c0_i32 = arith.constant 0 : i32
    %c0_i32_0 = arith.constant 0 : i32
    %c0_i32_1 = arith.constant 0 : i32
    return %c0_i32, %c0_i32_0 : i32, i32
  }
  func.func @transform_6(%arg0: i32, %arg1: i32) -> (i32, i32, i32) {
    %c0_i32 = arith.constant 0 : i32
    %c0_i32_0 = arith.constant 0 : i32
    %c0_i32_1 = arith.constant 0 : i32
    return %arg1, %c0_i32, %c0_i32_0 : i32, i32, i32
  }
  func.func @transform_7(%arg0: i32, %arg1: i32) -> (i32, i32, i32) {
    %c0_i32 = arith.constant 0 : i32
    %c0_i32_0 = arith.constant 0 : i32
    %c0_i32_1 = arith.constant 0 : i32
    return %arg1, %c0_i32, %c0_i32_0 : i32, i32, i32
  }
  func.func @transform_8(%arg0: i32, %arg1: i32) -> (i32, i32, i32) {
    %c0_i32 = arith.constant 0 : i32
    %c0_i32_0 = arith.constant 0 : i32
    %c0_i32_1 = arith.constant 0 : i32
    return %arg1, %c0_i32, %c0_i32_0 : i32, i32, i32
  }
  func.func @transform_9(%arg0: i32, %arg1: i32) -> (i32, i32, i32) {
    %c0_i32 = arith.constant 0 : i32
    %c0_i32_0 = arith.constant 0 : i32
    %c0_i32_1 = arith.constant 0 : i32
    return %arg1, %c0_i32, %c0_i32_0 : i32, i32, i32
  }
  func.func @transform_10(%arg0: i32, %arg1: i32) -> (i32, i32, i32) {
    %c0_i32 = arith.constant 0 : i32
    %c0_i32_0 = arith.constant 0 : i32
    %c0_i32_1 = arith.constant 0 : i32
    return %arg1, %c0_i32, %c0_i32_0 : i32, i32, i32
  }
  func.func @transform_11(%arg0: i32, %arg1: i32) -> (i32, i32, i32) {
    %c0_i32 = arith.constant 0 : i32
    %c0_i32_0 = arith.constant 0 : i32
    %c0_i32_1 = arith.constant 0 : i32
    return %arg1, %c0_i32, %c0_i32_0 : i32, i32, i32
  }
  func.func @transform_12(%arg0: i32, %arg1: i32) -> (i32, i32, i32) {
    %c0_i32 = arith.constant 0 : i32
    %c0_i32_0 = arith.constant 0 : i32
    %c0_i32_1 = arith.constant 0 : i32
    return %arg1, %c0_i32, %c0_i32_0 : i32, i32, i32
  }
  func.func @transform_13(%arg0: i32, %arg1: i32) -> (i32, i32, i32) {
    %c0_i32 = arith.constant 0 : i32
    %c0_i32_0 = arith.constant 0 : i32
    %c0_i32_1 = arith.constant 0 : i32
    return %arg1, %c0_i32, %c0_i32_0 : i32, i32, i32
  }
  func.func @transform_14(%arg0: i32, %arg1: i32) -> (i32, i32, i32) {
    %c0_i32 = arith.constant 0 : i32
    %c0_i32_0 = arith.constant 0 : i32
    %c0_i32_1 = arith.constant 0 : i32
    return %arg1, %c0_i32, %c0_i32_0 : i32, i32, i32
  }
  func.func @transform_15(%arg0: i32, %arg1: i32) -> (i32, i32, i32) {
    %c0_i32 = arith.constant 0 : i32
    %c0_i32_0 = arith.constant 0 : i32
    %c0_i32_1 = arith.constant 0 : i32
    return %arg1, %c0_i32, %c0_i32_0 : i32, i32, i32
  }
  func.func @transform_16(%arg0: i32, %arg1: i32) -> (i32, i32, i32) {
    %c0_i32 = arith.constant 0 : i32
    %c0_i32_0 = arith.constant 0 : i32
    %c0_i32_1 = arith.constant 0 : i32
    return %arg1, %c0_i32, %c0_i32_0 : i32, i32, i32
  }
  func.func @transform_17(%arg0: i32, %arg1: i32) -> (i32, i32, i32) {
    %c0_i32 = arith.constant 0 : i32
    %c0_i32_0 = arith.constant 0 : i32
    %c0_i32_1 = arith.constant 0 : i32
    return %arg1, %c0_i32, %c0_i32_0 : i32, i32, i32
  }
  func.func @transform_18(%arg0: i32, %arg1: i32) -> (i32, i32, i32) {
    %c0_i32 = arith.constant 0 : i32
    %c0_i32_0 = arith.constant 0 : i32
    %c0_i32_1 = arith.constant 0 : i32
    return %arg0, %c0_i32, %c0_i32_0 : i32, i32, i32
  }
}

</mosaic_0001>

<bundles_post_ra>
// kernel: gpt2_forward.3
= control target key start
LH: loop header
LB: loop body
LE: loop exit
PB: predicated region body
PF: predicated region fallthrough
CT: control target
= control target key end

     0   :  { %11 = vsyncpa [#allocation4], 0  ;;  %s895_s0 = inlined_call_operand.vmem [shape: f32[2,8,128], index: 0, kind: input, shape index: {}]   ;;  %s896_s1 = inlined_call_operand.vmem [shape: f32[1,128], index: 1, kind: input, shape index: {}]   ;;  %s897_s2 = inlined_call_operand.vmem [shape: f32[1,128], index: 2, kind: input, shape index: {}]   ;;  %s898_s3 = inlined_call_operand.vmem [shape: bf16[256,128], index: 3, kind: input, shape index: {}]   ;;  %s899_s4 = inlined_call_operand.hbm [shape: f32[2,8,128], index: 4, kind: output, shape index: {0}]   ;;  %s900_s5 = inlined_call_operand.hbm [shape: f32[2,8,256], index: 5, kind: output, shape index: {1}]  }
   0x1   :  { %12 = vsyncpa [#allocation6], 0 }
   0x2   :  { %14 = vsyncpa [#allocation6 + $0x1], 0  ;;  %s732_s18 = smov 0   ;;  %s734_s19 = smov 0  }
   0x3   :  { %s736_s20 = smov 0   ;;  %s738_s21 = smov 0  }
   0x4 LB: > { %s753_s22 = sadd.s32 4294967295, %s693_s21   ;;  %s485_s23 = sadd.s32 4294967294, %s693_s21   ;;  %s693_s21 = sphi %s738_s21, %s906_s21   ;;  %s689_s20 = sphi %s736_s20, %s905_s20   ;;  %s685_s19 = sphi %s734_s19, %s904_s19   ;;  %s681_s18 = sphi %s732_s18, %s903_s18  }
   0x5   : > { %s757_s24 = sadd.s32 1, %s693_s21   ;;  %s137_s25 = sadd.s32 1, %s689_s20 }
   0x6   : > { %s134_s26 = ssub.s32 %s693_s21, %s757_s24  ;;  %p147_p0 = scmp.ne.s32.totalorder %s689_s20, %s685_s19 }
   0x7   : > { %p135_p1 = scmp.eq.s32.totalorder %s134_s26, 0  ;;  %p148_p2 = scmp.eq.s32.totalorder %s753_s22, 1 }
   0x8   : > { %p153_p3 = scmp.ne.s32.totalorder %s685_s19, %s681_s18  ;;  %p154_p4 = scmp.eq.s32.totalorder %s485_s23, 1 }
   0x9   : > { %s768_s27 = scalar_select %p135_p1, %s689_s20, %s137_s25  }
   0xa   : > { %p772_p5 = por %p148_p2, %p147_p0  ;;  %p776_p6 = por %p154_p4, %p153_p3 }
   0xb   : > { %p488_p7 = scmp.ge.s32.totalorder %s693_s21, 1  ;;  %p190_p8 = scmp.lt.s32.totalorder %s693_s21, 3 }
   0xd   : > { %p191_p9 = pnand %p488_p7, %p190_p8 }
   0xe   : > { %s215_s30 = sand.u32 (!%p191_p9), 1, %s685_s19   ;;  %s490_s6 = sshll.u32 (!%p191_p9), %s753_s22, 4 }
   0xf   : > { %194 = sbr.rel (%p191_p9) target bundleno = 638 (0x27e), region = 36  ;;  %s489_s7 = sshll.u32 (!%p191_p9), %s215_s30, 4 }
  0x10   : > { %p219_p10 = scmp.lt.s32.totalorder (!%p191_p9), %s490_s6, 31  ;;  %s791_s12 = scalar_lea.vmem (!%p191_p9), [#allocation5], %s489_s7 }
  0x11   : > { %p492_p11 = scmp.ne.s32.totalorder (!%p191_p9), %s753_s22, 0 }
  0x16   : > { %s908_s6 = smov (!%p219_p10, %s490_s6), 31  ;;  %228 = sbr.rel (%p492_p11) target bundleno = 342 (0x156), region = 40 }
  0x17   : > { %s491_s8 = sshll.u32 %s908_s6, 2  ;;  %v229_v0 = vld [vmem:[%s895_s0] sm:$0xff] (!%p492_p11)  ;;  %v230_v1 = vld [vmem:[%s895_s0 + $0x8] sm:$0xff] (!%p492_p11) }
  0x18   : > { %s789_s11 = scalar_lea.vmem %s898_s3, %s491_s8  ;;  %233 = vadd.xlane.f32.xlu0 (!%p492_p11), %v229_v0  ;;  %v493_v17 = vld [vmem:[%s896_s1] ss:$0 sm:$0xff] (!%p492_p11) }
  0x19   : > { %v494_v19 = vld [vmem:[%s897_s2] ss:$0 sm:$0xff] (!%p492_p11) }
  0x1c   : > { %235 = vadd.xlane.f32.xlu0 (!%p492_p11), %v230_v1 }
  0xa5   : > { %v234_v2 = vpop.xlane.xlu0 %233 }
  0xa6   : > { %v238_v3 = vmul.f32 0.0078125, %v234_v2 }
  0xa8   : > { %v240_v4 = vsub.f32 %v229_v0, %v238_v3 }
  0xa9   : > { %v236_v5 = vpop.xlane.xlu0 %235 }
  0xaa   : > { %v239_v6 = vmul.f32 0.0078125, %v236_v5  ;;  %v242_v7 = vmul.f32 %v240_v4, %v240_v4 }
  0xac   : > { %v241_v8 = vsub.f32 %v230_v1, %v239_v6  ;;  %244 = vadd.xlane.f32.xlu1 %v242_v7 }
  0xae   : > { %v243_v9 = vmul.f32 %v241_v8, %v241_v8 }
  0xb0   : > { %246 = vadd.xlane.f32.xlu1 %v243_v9 }
 0x139   : > { %v245_v10 = vpop.xlane.xlu1 %244 }
 0x13a   : > { %v248_v11 = vmul.f32 0.0078125, %v245_v10 }
 0x13c   : > { %v250_v12 = vadd.f32 1e-05, %v248_v11 }
 0x13d   : > { %v247_v13 = vpop.xlane.xlu1 %246 }
 0x13e   : > { %589 = vrsqrt.f32 %v250_v12  ;;  %v249_v14 = vmul.f32 0.0078125, %v247_v13 }
 0x140   : > { %v251_v15 = vadd.f32 1e-05, %v249_v14 }
 0x142   : > { %591 = vrsqrt.f32 %v251_v15 }
 0x148   : > { %v590_v16 = vpop.eup %589 }
 0x149   : > { %v254_v18 = vmul.f32 %v590_v16, %v240_v4 }
 0x14b   : > { %v262_v20 = vmul.f32 %v493_v17, %v254_v18 }
 0x14c   : > { %v592_v21 = vpop.eup %591 }
 0x14d   : > { %v270_v22 = vadd.f32 %v494_v19, %v262_v20  ;;  %v255_v23 = vmul.f32 %v592_v21, %v241_v8 }
 0x14f   : > { %272 = vst [vmem:[#allocation3] sm:$0xff] %v270_v22  ;;  %v263_v24 = vmul.f32 %v493_v17, %v255_v23 }
 0x151   : > { %v271_v25 = vadd.f32 %v494_v19, %v263_v24 }
 0x153   : > { %273 = vst [vmem:[#allocation3 + $0x8] sm:$0xff] %v271_v25  ;;  %v274_v26 = vpack.c.bf16 %v271_v25, %v270_v22 }
 0x155   : > { %275 = vst [vmem:[#allocation2] sm:$0xff] %v274_v26 }
 0x156 PF: > { %v593_v27 = vld [vmem:[%s789_s11] sm:$0xff]   ;;  %v695_v28 = vmov 0.0   ;;  %vm696_vm0 = vmmov 0   ;;  %v594_v29 = vld [vmem:[%s789_s11 + $0x8] sm:$0xff]   ;;  %v595_v30 = vld [vmem:[%s789_s11 + $0x10] sm:$0xff]   ;;  %s697_s6 = smov [#allocation3]  }
 0x157   : > { %518 = vmatprep.subr.bf16.mxu0 %v695_v28  ;;  %534 = vmatprep.mubr.msk.bf16.mxu0 %vm696_vm0, %v695_v28  ;;  %v596_v31 = vld [vmem:[%s789_s11 + $0x18] sm:$0xff]   ;;  %v597_v32 = vld [vmem:[%s789_s11 + $0x20] sm:$0xff]   ;;  %v598_v33 = vld [vmem:[%s789_s11 + $0x28] sm:$0xff]   ;;  %s395_s7 = sshll.u32 %s697_s6, 4  ;;  %s396_s7 = int_to_ptr.vmem [resolvable:$true] %s395_s7 }
 0x158   : > { %519 = vmatpush3.bf16.xpose.msra.mxu0 %v593_v27  ;;  %v599_v34 = vld [vmem:[%s789_s11 + $0x30] sm:$0xff]   ;;  %v600_v35 = vld [vmem:[%s789_s11 + $0x38] sm:$0xff]   ;;  %s601_s8 = scalar_lea.vmem %s396_s7, 256  ;;  %p608_p1 = scmp.lt.s32.totalorder %s396_s7, %s396_s7 }
 0x159   : > { %520 = vmatprep.subr.bf16.mxu0 %v695_v28  ;;  %p602_p12 = scmp.ne.s32.totalorder %s396_s7, %s601_s8  ;;  %p609_p3 = scmp.lt.s32.totalorder %s601_s8, %s601_s8 }
 0x15b   : > { %p603_p13 = pnand %p602_p12, %p148_p2  ;;  %p610_p4 = por %p609_p3, %p608_p1 }
 0x15c   : > { %v276_v36 = vld [vmem:[#allocation2] sm:$0xff] }
 0x15d   : > { %p604_p0 = pneg %p603_p13 }
 0x15f   : > { %p611_p7 = pnand %p610_p4, %p604_p0 }
 0x160   : > { %521 = vmatpush3.bf16.xpose.msra.mxu0 %v594_v29 }
 0x161   : > { %522 = vmatprep.subr.bf16.mxu0 %v695_v28 }
 0x168   : > { %523 = vmatpush3.bf16.xpose.msra.mxu0 %v595_v30 }
 0x169   : > { %524 = vmatprep.subr.bf16.mxu0 %v695_v28 }
 0x170   : > { %525 = vmatpush3.bf16.xpose.msra.mxu0 %v596_v31 }
 0x171   : > { %526 = vmatprep.subr.bf16.mxu0 %v695_v28 }
 0x178   : > { %527 = vmatpush3.bf16.xpose.msra.mxu0 %v597_v32 }
 0x179   : > { %528 = vmatprep.subr.bf16.mxu0 %v695_v28 }
 0x180   : > { %529 = vmatpush3.bf16.xpose.msra.mxu0 %v598_v33 }
 0x181   : > { %530 = vmatprep.subr.bf16.mxu0 %v695_v28 }
 0x188   : > { %531 = vmatpush3.bf16.xpose.msra.mxu0 %v599_v34 }
 0x189   : > { %532 = vmatprep.subr.bf16.mxu0 %v695_v28 }
 0x190   : > { %533 = vmatpush3.bf16.xpose.msra.mxu0 %v600_v35 }
 0x197   : > { %535 = vmatmul.mubr.bf16.vlgmr.msra.gmra.mrb[0].mxu0 %v276_v36 }
 0x198   : > { %614 = shalt.err (!%p611_p7)
}
 0x199   : > { %s615_s11 = scalar_lea.hbm %s899_s4, 256 }
 0x19a   : > { %p616_p8 = scmp.ne.s32.totalorder %s899_s4, %s615_s11  ;;  %p621_p11 = scmp.lt.u32.totalorder %s615_s11, %s899_s4 }
 0x19c   : > { %p617_p9 = pnand %p616_p8, %p148_p2 }
 0x19e   : > { %p618_p10 = pneg %p617_p9 }
 0x1a0   : > { %p623_p12 = pnand %p621_p11, %p618_p10 }
 0x1a2   : > { %626 = shalt.err (!%p623_p12)
}
 0x1a3   : > { %s698_s17 = smov 128   ;;  %s699_s23 = smov 8  }
 0x1a4   : > { %539 = dma.vmem_to_hbm [thread:$0]  (%p148_p2), %s396_s7, 256, %s899_s4, [#allocation4], %s698_s17, %s698_s17, %s699_s23  }
 0x1a5   : > { %s505_s6 = sshll.u32 %s753_s22, 7  ;;  %s410_s8 = sshll.u32 %s791_s12, 4  ;;  %s843_s8 = int_to_ptr.vmem [resolvable:$true] %s410_s8 }
 0x1a6   : > { %s840_s11 = scalar_lea.hbm %s900_s5, %s505_s6  ;;  %s848_s7 = scalar_lea.sflag [#allocation6], %s215_s30 }
 0x1a7   : > { %s627_s13 = scalar_lea.vmem %s843_s8, 256  ;;  %s700_s14 = smov [#allocation5]  }
 0x1a8   : > { %p628_p13 = scmp.ne.s32.totalorder %s843_s8, %s627_s13  ;;  %s631_s15 = sshll.u32 %s700_s14, 4  ;;  %s632_s15 = int_to_ptr.vmem [resolvable:$false] %s631_s15 }
 0x1a9   : > { %s633_s16 = scalar_lea.vmem %s632_s15, 512  ;;  %p634_p3 = scmp.lt.s32.totalorder %s843_s8, %s632_s15 }
 0x1aa   : > { %p629_p0 = pnand %p628_p13, %p772_p5  ;;  %p635_p4 = scmp.lt.s32.totalorder %s633_s16, %s627_s13 }
 0x1ac   : > { %p630_p1 = pneg %p629_p0  ;;  %p636_p7 = por %p635_p4, %p634_p3 }
 0x1ae   : > { %p637_p8 = pnand %p636_p7, %p630_p1 }
 0x26a   : > { %v375_v37 = vpop.f32.mrb[0].mxu0 }
 0x26b   : > { %382 = vst [vmem:[%s791_s12] sm:$0xff] %v375_v37  ;;  %v536_v38 = vpop.f32.mrb[1].mxu0 }
 0x26c   : > { %v378_v39 = vpop.f32.mrb[2].mxu0 }
 0x26d   : > { %383 = vst [vmem:[%s791_s12 + $0x8] sm:$0xff] %v378_v39  ;;  %v537_v40 = vpop.f32.mrb[3].mxu0 }
 0x26e   : > { %640 = shalt.err (!%p637_p8)
}
 0x26f   : > { %s641_s30 = scalar_lea.hbm %s840_s11, 256  ;;  %s645_s26 = scalar_lea.hbm %s900_s5, 512 }
 0x270   : > { %p642_p9 = scmp.ne.s32.totalorder %s840_s11, %s641_s30  ;;  %p646_p12 = scmp.lt.u32.totalorder %s840_s11, %s900_s5 }
 0x271   : > { %p647_p13 = scmp.lt.u32.totalorder %s645_s26, %s641_s30  ;;  %p649_p1 = scmp.lt.u32.totalorder %s641_s30, %s840_s11 }
 0x272   : > { %p643_p10 = pnand %p642_p9, %p772_p5 }
 0x273   : > { %p648_p0 = por %p647_p13, %p646_p12 }
 0x274   : > { %p644_p11 = pneg %p643_p10 }
 0x275   : > { %p650_p3 = por %p649_p1, %p648_p0 }
 0x277   : > { %p651_p4 = pnand %p650_p3, %p644_p11 }
 0x279   : > { %654 = shalt.err (!%p651_p4)
}
 0x27a   : > { %s701_s10 = smov 256  }
 0x27b   : > { %540 = dma.vmem_to_hbm [thread:$0]  (%p772_p5), %s843_s8, 256, %s840_s11, %s848_s7, %s698_s17, %s701_s10, %s699_s23  }
 0x27c   : > { %672 = dma.done.wait (%p148_p2), [#allocation4], 256  }
 0x27d   : > { %674 = vsyncadd (%p148_p2), [#allocation4], 4294967040 }
 0x27e PF: > { %p550_p7 = scmp.ge.s32.totalorder %s693_s21, 2  ;;  %s429_s13 = sand.u32 1, %s681_s18  }
 0x27f   : > { %s430_s28 = scalar_lea.sflag [#allocation6], %s429_s13 }
 0x280   : > { %p545_p8 = pnand %p550_p7, %p776_p6 }
 0x282   : > { %676 = dma.done.wait (!%p545_p8), %s430_s28, 256  }
 0x283   : > { %678 = vsyncadd (!%p545_p8), %s430_s28, 4294967040  ;;  %p17_p5 = scmp.ge.s32.totalorder %s757_s24, 4   ;;  %s903_s18 = smov %s685_s19 }
 0x284   : > { %s904_s19 = smov %s689_s20  ;;  %s905_s20 = smov %s768_s27 }
 0x285   : > { %s906_s21 = smov %s757_s24  ;;  %19 = sbr.rel (!%p17_p5) target bundleno = 4 (0x4), region = 84 }
 0x28c   :  { %435 = vsyncpa [#allocation4], 1 }
 0x28d   :  { %437 = vsyncpa [#allocation4 + $0x1], 1 }
 0x28e   :  { %438 = vsyncpa [#allocation6], 1 }
 0x28f   :  { %440 = vsyncpa [#allocation6 + $0x1], 1 }

// kernel: gpt2_forward.2
= control target key start
LH: loop header
LB: loop body
LE: loop exit
PB: predicated region body
PF: predicated region fallthrough
CT: control target
= control target key end

     0   :  { %s5305_s0 = inlined_call_operand.vmem [shape: f32[2,1,8], index: 0, kind: input, shape index: {}]   ;;  %s5306_s1 = inlined_call_operand.vmem [shape: bf16[2,8,128], index: 1, kind: input, shape index: {}]   ;;  %s5307_s2 = inlined_call_operand.vmem [shape: f32[1,8,128], index: 2, kind: input, shape index: {}]   ;;  %s5308_s3 = inlined_call_operand.vmem [shape: f32[2,1,128], index: 3, kind: input, shape index: {}]   ;;  %s5309_s4 = inlined_call_operand.vmem [shape: bf16[128,128], index: 4, kind: input, shape index: {}]   ;;  %s5310_s5 = inlined_call_operand.vmem [shape: f32[1,128], index: 5, kind: input, shape index: {}]   ;;  %s5311_s6 = inlined_call_operand.vmem [shape: f32[2,1,128], index: 6, kind: input, shape index: {}]   ;;  %s5312_s7 = inlined_call_operand.vmem [shape: f32[2,1,128], index: 7, kind: input, shape index: {}]   ;;  %s5313_s8 = inlined_call_operand.hbm [shape: bf16[2,128,384], index: 8, kind: input, shape index: {}]   ;;  %s5314_s9 = inlined_call_operand.vmem [shape: f32[2,1,384], index: 9, kind: input, shape index: {}]   ;;  %s5315_s10 = inlined_call_operand.vmem [shape: bf16[2,128,128], index: 10, kind: input, shape index: {}]   ;;  %s5316_s11 = inlined_call_operand.vmem [shape: f32[2,1,128], index: 11, kind: input, shape index: {}]   ;;  %s5317_s12 = inlined_call_operand.vmem [shape: f32[2,1,128], index: 12, kind: input, shape index: {}]   ;;  %s5318_s13 = inlined_call_operand.vmem [shape: f32[2,1,128], index: 13, kind: input, shape index: {}]   ;;  %s5319_s14 = inlined_call_operand.hbm [shape: bf16[2,128,512], index: 14, kind: input, shape index: {}]   ;;  %s5320_s15 = inlined_call_operand.vmem [shape: f32[2,1,512], index: 15, kind: input, shape index: {}]   ;;  %s5321_s16 = inlined_call_operand.hbm [shape: bf16[2,512,128], index: 16, kind: input, shape index: {}]   ;;  %s5322_s17 = inlined_call_operand.vmem [shape: f32[2,1,128], index: 17, kind: input, shape index: {}]   ;;  %s5323_s18 = inlined_call_operand.vmem [shape: f32[2,8,128], index: 18, kind: output, shape index: {}]  }
   0x1   :  { %5338 = sst [smem:[#allocation16_spill]] %s5305_s0 }
   0x2   :  { %5339 = sst [smem:[#allocation17_spill]] %s5306_s1 }
   0x3   :  { %5340 = sst [smem:[#allocation18_spill]] %s5307_s2 }
   0x4   :  { %5341 = sst [smem:[#allocation19_spill]] %s5308_s3 }
   0x5   :  { %5342 = sst [smem:[#allocation20_spill]] %s5309_s4 }
   0x6   :  { %5343 = sst [smem:[#allocation21_spill]] %s5310_s5 }
   0x7   :  { %5344 = sst [smem:[#allocation22_spill]] %s5313_s8 }
   0x8   :  { %5345 = sst [smem:[#allocation23_spill]] %s5315_s10 }
   0x9   :  { %5346 = sst [smem:[#allocation24_spill]] %s5319_s14 }
   0xa   :  { %5347 = sst [smem:[#allocation25_spill]] %s5320_s15 }
   0xb   :  { %5348 = sst [smem:[#allocation26_spill]] %s5321_s16 }
   0xc   :  { %5349 = sst [smem:[#allocation27_spill]] %s5322_s17 }
   0xd   :  { %5350 = sst [smem:[#allocation28_spill]] %s5323_s18 }
   0xe   :  { %23 = vsyncpa [#allocation5], 0 }
   0xf   :  { %25 = vsyncpa [#allocation5 + $0x1], 0 }
  0x10   :  { %26 = vsyncpa [#allocation7], 0 }
  0x11   :  { %28 = vsyncpa [#allocation7 + $0x1], 0  ;;  %s4525_s27 = smov 0   ;;  %s4527_s28 = smov 0  }
  0x12   :  { %s4529_s29 = smov 0   ;;  %s4531_s30 = smov 0  }
  0x13   :  { %s4533_s0 = smov 0   ;;  %s4535_s19 = smov 0  }
  0x14 LB: > { %5351 = sst [smem:[#allocation11_spill]] %s4393_s28  ;;  %s5325_s1 = sadd.s32 4294967295, %s4409_s19   ;;  %s4409_s19 = sphi %s4535_s19, %s34_s19   ;;  %s4405_s0 = sphi %s4533_s0, %s5388_s0   ;;  %s4401_s30 = sphi %s4531_s30, %s5387_s30   ;;  %s4397_s29 = sphi %s4529_s29, %s5386_s29   ;;  %s4393_s28 = sphi %s4527_s28, %s5385_s28   ;;  %s4389_s27 = sphi %s4525_s27, %s5384_s27  }
  0x15   : > { %5352 = sst [smem:[#allocation12_spill]] %s4397_s29  ;;  %s43_s20 = sadd.s32 1, %s4405_s0 }
  0x16   : > { %5353 = sst [smem:[#allocation13_spill]] %s4405_s0  ;;  %p44_p0 = scmp.ge.s32.totalorder %s43_s20, 2 }
  0x17   : > { %s246_s21 = sadd.s32 1, %s4397_s29  ;;  %p253_p1 = scmp.ne.s32.totalorder %s4397_s29, %s4393_s28 }
  0x18   : > { %p254_p2 = scmp.eq.s32.totalorder %s4409_s19, 0  ;;  %s5390_s20 = smov (%p44_p0, %s43_s20), 0 }
  0x19   : > { %5354 = sst [smem:[#allocation14_spill]] %s5390_s20  ;;  %p259_p4 = scmp.ne.s32.totalorder %s4393_s28, %s4389_s27 }
  0x1a   : > { %p255_p3 = por %p254_p2, %p253_p1  ;;  %s243_s22 = ssub.s32 %s4405_s0, %s5390_s20 }
  0x1b   : > { %p260_p5 = scmp.eq.s32.totalorder %s5325_s1, 0  ;;  %p244_p6 = scmp.eq.s32.totalorder %s243_s22, 0 }
  0x1c   : > { %p4006_p8 = scmp.lt.s32.totalorder %s4409_s19, 2  ;;  %s4575_s24 = sand.u32 1, %s4397_s29  }
  0x1d   : > { %p4566_p7 = por %p260_p5, %p259_p4  ;;  %s643_s26 = sand.u32 1, %s4409_s19  }
  0x1e   : > { %s4572_s23 = scalar_select %p244_p6, %s4397_s29, %s246_s21  }
  0x1f   : > { %s5355_s2 = scalar_select %p4566_p7, 1, 0 }
  0x20   : > { %5356 = sst [smem:[#allocation15_spill]] %s4572_s23  ;;  %p4577_p9 = pnand %p4006_p8, %p255_p3 }
  0x21   : > { %s5332_s27 = sshll.u32 %s4575_s24, 8  ;;  %s5333_s1 = sshll.u32 %s4405_s0, 12 }
  0x22   : > { %s5358_s14 = sld [smem:[#allocation24_spill]]  ;;  %s647_s21 = scalar_lea.vmem [#allocation6], %s5332_s27 }
  0x23   : > { %s654_s23 = sshll.u32 %s647_s21, 4  ;;  %s4595_s29 = scalar_lea.sflag [#allocation7], %s643_s26  ;;  %s4593_s23 = int_to_ptr.vmem [resolvable:$true] %s654_s23 }
  0x24   : > { %p4601_p11 = pneg %p4577_p9 }
  0x28   : > { %s4589_s18 = scalar_lea.hbm %s5358_s14, %s5333_s1  ;;  %s4270_s27 = scalar_lea.hbm %s5358_s14, 8192 }
  0x29   : > { %s4265_s5 = scalar_lea.hbm %s4589_s18, 4096  ;;  %p4271_p0 = scmp.lt.u32.totalorder %s4589_s18, %s5358_s14 }
  0x2a   : > { %p4266_p10 = scmp.ne.s32.totalorder %s4589_s18, %s4265_s5  ;;  %p4272_p1 = scmp.lt.u32.totalorder %s4270_s27, %s4265_s5 }
  0x2b   : > { %p4274_p3 = scmp.lt.u32.totalorder %s4265_s5, %s4589_s18 }
  0x2c   : > { %p4268_p12 = pnand %p4601_p11, %p4266_p10  ;;  %p4273_p2 = por %p4272_p1, %p4271_p0 }
  0x2e   : > { %p4269_p13 = pneg %p4268_p12  ;;  %p4275_p4 = por %p4274_p3, %p4273_p2 }
  0x30   : > { %p4276_p5 = pnand %p4275_p4, %p4269_p13 }
  0x32   : > { %4279 = shalt.err (!%p4276_p5)
}
  0x33   : > { %s4280_s26 = scalar_lea.vmem %s4593_s23, 4096  ;;  %s4411_s20 = smov [#allocation6]  }
  0x34   : > { %p4281_p6 = scmp.ne.s32.totalorder %s4593_s23, %s4280_s26  ;;  %s4285_s22 = sshll.u32 %s4411_s20, 4  ;;  %s4286_s22 = int_to_ptr.vmem [resolvable:$false] %s4285_s22 }
  0x35   : > { %s4287_s1 = scalar_lea.vmem %s4286_s22, 8192  ;;  %p4288_p12 = scmp.lt.s32.totalorder %s4593_s23, %s4286_s22 }
  0x36   : > { %p4283_p8 = pnand %p4281_p6, %p4601_p11  ;;  %p4289_p7 = scmp.lt.s32.totalorder %s4287_s1, %s4280_s26 }
  0x38   : > { %p4284_p10 = pneg %p4283_p8  ;;  %p4290_p0 = por %p4289_p7, %p4288_p12 }
  0x3a   : > { %p4291_p1 = pnand %p4290_p0, %p4284_p10 }
  0x3c   : > { %4294 = shalt.err (!%p4291_p1)
}
  0x3d   : > { %s4412_s5 = smov 256   ;;  %s4413_s27 = smov 16  }
  0x3e   : > { %4002 = dma.hbm_to_vmem [thread:$0]  (!%p4577_p9), %s4589_s18, 4096, %s4593_s23, %s4595_s29, %s4412_s5, %s4412_s5, %s4413_s27  }
  0x3f   : > { %s5360_s21 = sshll.u32 %s4405_s0, 12  ;;  %s5361_s16 = sld [smem:[#allocation26_spill]] }
  0x40   : > { %s5362_s1 = sshll.u32 %s4575_s24, 8  ;;  %p3535_p7 = scmp.ge.s32.totalorder %s4409_s19, 1 }
  0x41   : > { %s675_s14 = scalar_lea.vmem [#allocation8], %s5362_s1  ;;  %p696_p13 = scmp.lt.s32.totalorder %s4409_s19, 3 }
  0x42   : > { %s682_s4 = sshll.u32 %s675_s14, 4  ;;  %s3986_s15 = smul.u32 192, %s4575_s24  ;;  %s4634_s4 = int_to_ptr.vmem [resolvable:$true] %s682_s4 }
  0x43   : > { %p4638_p2 = pnand %p3535_p7, %p696_p13  ;;  %s3987_s18 = smul.u32 3072, %s4405_s0 }
  0x44   : > { %s5364_s8 = sld [smem:[#allocation22_spill]]  ;;  %s593_s14 = scalar_lea.vmem [#allocation4], %s3986_s15 }
  0x45   : > { %s4630_s22 = scalar_lea.hbm %s5361_s16, %s5360_s21  ;;  %s600_s21 = sshll.u32 %s593_s14, 4  ;;  %s4649_s21 = int_to_ptr.vmem [resolvable:$true] %s600_s21 }
  0x46   : > { %s5363_s17 = scalar_select %p4638_p2, 1, 0 }
  0x47   : > { %s590_s26 = scalar_lea.sflag [#allocation5], %s4575_s24 }
  0x4a   : > { %s4647_s27 = scalar_lea.hbm %s5364_s8, %s3987_s18  ;;  %s4300_s23 = scalar_lea.hbm %s5364_s8, 6144 }
  0x4b   : > { %s4295_s20 = scalar_lea.hbm %s4647_s27, 3072  ;;  %p4301_p6 = scmp.lt.u32.totalorder %s4647_s27, %s5364_s8 }
  0x4c   : > { %p4296_p3 = scmp.ne.s32.totalorder %s4647_s27, %s4295_s20  ;;  %p4302_p8 = scmp.lt.u32.totalorder %s4300_s23, %s4295_s20 }
  0x4d   : > { %p4304_p12 = scmp.lt.u32.totalorder %s4295_s20, %s4647_s27 }
  0x4e   : > { %p4298_p4 = pnand %p4296_p3, %p4601_p11  ;;  %p4303_p10 = por %p4302_p8, %p4301_p6 }
  0x50   : > { %p4299_p5 = pneg %p4298_p4  ;;  %p4305_p0 = por %p4304_p12, %p4303_p10 }
  0x52   : > { %p4306_p1 = pnand %p4305_p0, %p4299_p5 }
  0x54   : > { %4309 = shalt.err (!%p4306_p1)
}
  0x55   : > { %s4310_s15 = scalar_lea.vmem %s4649_s21, 3072  ;;  %s4414_s0 = smov [#allocation4]  }
  0x56   : > { %p4311_p7 = scmp.ne.s32.totalorder %s4649_s21, %s4310_s15  ;;  %s4315_s14 = sshll.u32 %s4414_s0, 4  ;;  %s4316_s14 = int_to_ptr.vmem [resolvable:$false] %s4315_s14 }
  0x57   : > { %s4317_s1 = scalar_lea.vmem %s4316_s14, 6144  ;;  %p4318_p4 = scmp.lt.s32.totalorder %s4649_s21, %s4316_s14 }
  0x58   : > { %p4313_p13 = pnand %p4311_p7, %p4601_p11  ;;  %p4319_p2 = scmp.lt.s32.totalorder %s4317_s1, %s4310_s15 }
  0x5a   : > { %p4314_p3 = pneg %p4313_p13  ;;  %p4320_p6 = por %p4319_p2, %p4318_p4 }
  0x5c   : > { %p4321_p8 = pnand %p4320_p6, %p4314_p3 }
  0x5e   : > { %4324 = shalt.err (!%p4321_p8)
}
  0x5f   : > { %s4415_s20 = smov 192   ;;  %s4416_s23 = smov 12  }
  0x60   : > { %3999 = dma.hbm_to_vmem [thread:$0]  (!%p4577_p9), %s4647_s27, 3072, %s4649_s21, %s590_s26, %s4415_s20, %s4415_s20, %s4416_s23  }
  0x61   : > { %s4325_s18 = scalar_lea.hbm %s4630_s22, 4096  ;;  %s4330_s0 = scalar_lea.hbm %s5361_s16, 8192 }
  0x62   : > { %p4326_p5 = scmp.ne.s32.totalorder %s4630_s22, %s4325_s18  ;;  %p4331_p12 = scmp.lt.u32.totalorder %s4630_s22, %s5361_s16 }
  0x63   : > { %p4332_p0 = scmp.lt.u32.totalorder %s4330_s0, %s4325_s18  ;;  %p4334_p7 = scmp.lt.u32.totalorder %s4325_s18, %s4630_s22 }
  0x64   : > { %p4328_p2 = pnand %p4326_p5, %p4601_p11 }
  0x65   : > { %p4333_p1 = por %p4332_p0, %p4331_p12 }
  0x66   : > { %p4329_p10 = pneg %p4328_p2 }
  0x67   : > { %p4335_p13 = por %p4334_p7, %p4333_p1 }
  0x69   : > { %p4336_p3 = pnand %p4335_p13, %p4329_p10 }
  0x6b   : > { %4339 = shalt.err (!%p4336_p3)
}
  0x6c   : > { %s4340_s24 = scalar_lea.vmem %s4634_s4, 4096  ;;  %s4417_s27 = smov [#allocation8]  }
  0x6d   : > { %p4341_p4 = scmp.ne.s32.totalorder %s4634_s4, %s4340_s24  ;;  %s4345_s21 = sshll.u32 %s4417_s27, 4  ;;  %s4346_s21 = int_to_ptr.vmem [resolvable:$false] %s4345_s21 }
  0x6e   : > { %s4347_s26 = scalar_lea.vmem %s4346_s21, 8192  ;;  %p4348_p5 = scmp.lt.s32.totalorder %s4634_s4, %s4346_s21 }
  0x6f   : > { %p4343_p6 = pnand %p4341_p4, %p4601_p11  ;;  %p4349_p2 = scmp.lt.s32.totalorder %s4347_s26, %s4340_s24 }
  0x71   : > { %p4344_p8 = pneg %p4343_p6  ;;  %p4350_p12 = por %p4349_p2, %p4348_p5 }
  0x73   : > { %p4351_p0 = pnand %p4350_p12, %p4344_p8 }
  0x75   : > { %4354 = shalt.err (!%p4351_p0)
}
  0x76   : > { %s4418_s20 = smov 64   ;;  %s4419_s23 = smov 4  }
  0x77   : > { %4005 = dma.hbm_to_vmem [thread:$0]  (!%p4577_p9), %s4630_s22, 4096, %s4634_s4, %s4595_s29, %s4418_s20, %s4418_s20, %s4419_s23  }
  0x78   : > { %p5365_p11 = scmp.ne.s32.totalorder %s5363_s17, 0 }
  0x79   : > { %s702_s3 = sand.u32 (!%p5365_p11), 1, %s4393_s28   ;;  %p5366_p10 = scmp.ne.s32.totalorder (!%p5365_p11), %s5355_s2, 0 }
  0x7a   : > { %700 = sbr.rel (%p5365_p11) target bundleno = 4444 (0x115c), region = 92  ;;  %s703_s5 = scalar_lea.sflag (!%p5365_p11), [#allocation5], %s702_s3 }
  0x7b   : > { %s3988_s18 = smul.u32 (!%p5365_p11), 192, %s702_s3 }
  0x7d   : > { %s4700_s15 = scalar_lea.vmem (!%p5365_p11), [#allocation4], %s3988_s18 }
  0x81   : > { %4380 = dma.done.wait (%p5366_p10), %s703_s5, 3072  }
  0x82   : > { %4382 = vsyncadd (%p5366_p10), %s703_s5, 4294964224  ;;  %s5367_s0 = sadd.s32 4294967295, %s4409_s19   ;;  %s3536_s4 = sshll.u32 %s702_s3, 8 }
  0x83   : > { %s711_s25 = sand.u32 1, %s5367_s0   ;;  %s4708_s17 = scalar_lea.vmem [#allocation6], %s3536_s4 }
  0x84   : > { %s712_s29 = scalar_lea.sflag [#allocation7], %s711_s25 }
  0x85   : > { %4384 = dma.done.wait (%p5366_p10), %s712_s29, 8192  }
  0x86   : > { %4386 = vsyncadd (%p5366_p10), %s712_s29, 4294959104  ;;  %p847_p9 = scmp.lt.s32.totalorder %s4401_s30, 1  ;;  %s5368_s10 = sld [smem:[#allocation23_spill]] }
  0x87   : > { %s5370_s25 = sld [smem:[#allocation27_spill]]  ;;  %p3541_p1 = scmp.ne.s32.totalorder %s4401_s30, 0 }
  0x88   : > { %s4716_s22 = scalar_select %p847_p9, %s4401_s30, 1 }
  0x89   : > { %s5371_s14 = sld [smem:[#allocation20_spill]] (!%p3541_p1)  ;;  %v4420_v1 = vmov (!%p3541_p1), 0.0   ;;  %vm4421_vm0 = vmmov (!%p3541_p1), 0   ;;  %s5372_s30 = sld [smem:[#allocation19_spill]] (!%p3541_p1)  ;;  %v1000_v21 = vlaneseq (!%p3541_p1)  ;;  %v4422_v26 = vmov (!%p3541_p1), 0  }
  0x8a   : > { %s3989_s26 = smul.u32 3, %s4716_s22  ;;  %s3691_s20 = sshll.u32 %s4716_s22, 6  ;;  %3810 = vmatprep.subr.bf16.mxu0 (!%p3541_p1), %v4420_v1  ;;  %3830 = vmatprep.subr.bf16.mxu1 (!%p3541_p1), %v4420_v1  ;;  %v4423_v32 = vmov (!%p3541_p1), -1e+09   ;;  %vm1152_vm8 = vcmask (!%p3541_p1), 64512  }
  0x8b   : > { %s867_s2 = scalar_lea.vmem %s5317_s12, %s4716_s22  ;;  %s870_s16 = scalar_lea.vmem %s5318_s13, %s4716_s22  ;;  %3826 = vmatprep.mubr.msk.bf16.mxu0 (!%p3541_p1), %vm4421_vm0, %v4420_v1  ;;  %3846 = vmatprep.mubr.msk.bf16.mxu1 (!%p3541_p1), %vm4421_vm0, %v4420_v1  ;;  %v1001_v22 = vshrl.u32 (!%p3541_p1), %v1000_v21, 7  ;;  %v1132_v29 = vand.u32 (!%p3541_p1), 127, %v1000_v21 }
  0x8c   : > { %s4731_s18 = scalar_lea.vmem %s5368_s10, %s3691_s20  ;;  %s4740_s1 = scalar_lea.vmem %s5314_s9, %s3989_s26 }
  0x8d   : > { %s3540_s23 = sshll.u32 %s4716_s22, 2  ;;  %s5369_s10 = sld [smem:[#allocation25_spill]]  ;;  %v1002_v25 = vsub.s32 (!%p3541_p1), 0, %v1001_v22  ;;  %vm1133_vm3 = vcmp.le.s32.totalorder (!%p3541_p1), %v1132_v29, %v1001_v22 }
  0x8e   : > { %s877_s29 = scalar_lea.vmem %s5370_s25, %s4716_s22  ;;  %s4760_s26 = scalar_lea.vmem [#allocation8], %s3536_s4 }
  0x8f   : > { %888 = sbr.rel (%p3541_p1) target bundleno = 395 (0x18b), region = 108  ;;  %v4071_v0 = vld [vmem:[%s5371_s14] sm:$0xff] (!%p3541_p1)   ;;  %v4073_v3 = vld [vmem:[%s5371_s14 + $0x8] sm:$0xff] (!%p3541_p1)   ;;  %v4075_v5 = vld [vmem:[%s5371_s14 + $0x10] sm:$0xff] (!%p3541_p1)   ;;  %s5373_s4 = smov (!%p3541_p1), %s5372_s30 }
  0x90   : > { %v4072_v2 = vld [vmem:[%s5371_s14] sm:$0xff] (!%p3541_p1)   ;;  %3811 = vmatpush3.bf16.msra.mxu0 (!%p3541_p1), %v4071_v0  ;;  %v4074_v4 = vld [vmem:[%s5371_s14 + $0x8] sm:$0xff] (!%p3541_p1)   ;;  %v4076_v6 = vld [vmem:[%s5371_s14 + $0x10] sm:$0xff] (!%p3541_p1)   ;;  %s5374_s24 = sld [smem:[#allocation16_spill]] (!%p3541_p1)  ;;  %s5376_s3 = sld [smem:[#allocation18_spill]] (!%p3541_p1) }
  0x91   : > { %3831 = vmatpush3.bf16.msra.mxu1 (!%p3541_p1), %v4072_v2  ;;  %3812 = vmatprep.subr.bf16.mxu0 (!%p3541_p1), %v4420_v1  ;;  %v4077_v7 = vld [vmem:[%s5371_s14 + $0x18] sm:$0xff] (!%p3541_p1)   ;;  %v4079_v9 = vld [vmem:[%s5371_s14 + $0x20] sm:$0xff] (!%p3541_p1)   ;;  %v4081_v11 = vld [vmem:[%s5371_s14 + $0x28] sm:$0xff] (!%p3541_p1)   ;;  %s5377_s8 = sld [smem:[#allocation21_spill]] (!%p3541_p1) }
  0x92   : > { %3832 = vmatprep.subr.bf16.mxu1 (!%p3541_p1), %v4420_v1  ;;  %v4078_v8 = vld [vmem:[%s5371_s14 + $0x18] sm:$0xff] (!%p3541_p1)   ;;  %v4080_v10 = vld [vmem:[%s5371_s14 + $0x20] sm:$0xff] (!%p3541_p1)   ;;  %v4082_v12 = vld [vmem:[%s5371_s14 + $0x28] sm:$0xff] (!%p3541_p1)  }
  0x93   : > { %s4754_s28 = scalar_lea.vmem %s5369_s10, %s3540_s23  ;;  %v4083_v13 = vld [vmem:[%s5371_s14 + $0x30] sm:$0xff] (!%p3541_p1)   ;;  %v4085_v15 = vld [vmem:[%s5371_s14 + $0x38] sm:$0xff] (!%p3541_p1)   ;;  %v890_v16 = vld [vmem:[%s5372_s30] sm:$0x1] (!%p3541_p1)  ;;  %s5375_s30 = sld [smem:[#allocation17_spill]] (!%p3541_p1) }
  0x94   : > { %3813 = vmatpush3.bf16.msra.mxu0 (!%p3541_p1), %v4073_v3  ;;  %v4084_v14 = vld [vmem:[%s5371_s14 + $0x30] sm:$0xff] (!%p3541_p1)   ;;  %v4086_v17 = vld [vmem:[%s5371_s14 + $0x38] sm:$0xff] (!%p3541_p1)   ;;  %v3550_v18 = vld [vmem:[%s5373_s4 + $0x1] sm:$0x1] (!%p3541_p1)  ;;  %v891_v19 = vpack.c.bf16 (!%p3541_p1), %v890_v16, %v890_v16 }
  0x95   : > { %3833 = vmatpush3.bf16.msra.mxu1 (!%p3541_p1), %v4074_v4  ;;  %3814 = vmatprep.subr.bf16.mxu0 (!%p3541_p1), %v4420_v1  ;;  %v1008_v20 = vpack.c.bf16 (!%p3541_p1), %v3550_v18, %v3550_v18 }
  0x96   : > { %3834 = vmatprep.subr.bf16.mxu1 %v4420_v1  ;;  %v1125_v23 = vld [vmem:[%s5374_s24] sm:$0x1]  ;;  %v1126_v24 = vld [vmem:[%s5374_s24 + $0x1] sm:$0x1] }
  0x97   : > { %vm1127_vm1 = vcmp.gt.f32.partialorder %v1125_v23, 0.0  ;;  %vm1128_vm2 = vcmp.gt.f32.partialorder %v1126_v24, 0.0  ;;  %v889_v37 = vld [vmem:[%s5376_s3] sm:$0xff] }
  0x98   : > { %3815 = vmatpush3.bf16.msra.mxu0 %v4075_v5  ;;  %v1136_v27 = vsel %vm1127_vm1, 1, %v4422_v26  ;;  %v1137_v28 = vsel %vm1128_vm2, 1, %v4422_v26  ;;  %v908_v38 = vld [vmem:[%s5377_s8] sm:$0x1] }
  0x99   : > { %3835 = vmatpush3.bf16.msra.mxu1 %v4076_v6  ;;  %3816 = vmatprep.subr.bf16.mxu0 %v4420_v1  ;;  %v1141_v30 = vrot.slane %v1136_v27, %v1002_v25  ;;  %v1145_v31 = vrot.slane %v1137_v28, %v1002_v25  ;;  %v997_v35 = vld [vmem:[%s5375_s30] sm:$0xff]   ;;  %s5378_s30 = sld [smem:[#allocation28_spill]] }
  0x9a   : > { %3836 = vmatprep.subr.bf16.mxu1 %v4420_v1  ;;  %v998_v36 = vunpack.c.l.bf16 %v997_v35  ;;  %v1116_v39 = vunpack.c.h.bf16 %v997_v35  ;;  %v1025_v40 = vld [vmem:[%s5377_s8] sm:$0x1] }
  0x9b   : > { %vm1146_vm4 = vcmp.eq.s32.totalorder %v1141_v30, 1  ;;  %vm1147_vm5 = vcmp.eq.s32.totalorder %v1145_v31, 1 }
  0x9c   : > { %3817 = vmatpush3.bf16.msra.mxu0 %v4077_v7  ;;  %vm1148_vm6 = vmand %vm1133_vm3, %vm1146_vm4  ;;  %v999_v43 = vadd.f32 %v998_v36, %v889_v37  ;;  %v1117_v47 = vadd.f32 %v1116_v39, %v889_v37 }
  0x9d   : > { %3837 = vmatpush3.bf16.msra.mxu1 %v4078_v8  ;;  %3818 = vmatprep.subr.bf16.mxu0 %v4420_v1  ;;  %vm1149_vm7 = vmand %vm1133_vm3, %vm1147_vm5  ;;  %v1150_v33 = vsel %vm1148_vm6, 0.0, %v4423_v32 }
  0x9e   : > { %3838 = vmatprep.subr.bf16.mxu1 %v4420_v1  ;;  %v1151_v34 = vsel %vm1149_vm7, 0.0, %v4423_v32  ;;  %1153 = vst.msk [vmem:[#allocation2] sm:$0xff] %vm1152_vm8, %v1150_v33 }
  0x9f   : > { %1154 = vst.msk [vmem:[#allocation2 + $0x8] sm:$0xff] %vm1152_vm8, %v1151_v34 }
  0xa0   : > { %3819 = vmatpush3.bf16.msra.mxu0 %v4079_v9 }
  0xa1   : > { %3839 = vmatpush3.bf16.msra.mxu1 %v4080_v10  ;;  %3820 = vmatprep.subr.bf16.mxu0 %v4420_v1 }
  0xa2   : > { %3840 = vmatprep.subr.bf16.mxu1 %v4420_v1 }
  0xa4   : > { %3821 = vmatpush3.bf16.msra.mxu0 %v4081_v11 }
  0xa5   : > { %3841 = vmatpush3.bf16.msra.mxu1 %v4082_v12  ;;  %3822 = vmatprep.subr.bf16.mxu0 %v4420_v1 }
  0xa6   : > { %3842 = vmatprep.subr.bf16.mxu1 %v4420_v1 }
  0xa8   : > { %3823 = vmatpush3.bf16.msra.mxu0 %v4083_v13 }
  0xa9   : > { %3843 = vmatpush3.bf16.msra.mxu1 %v4084_v14  ;;  %3824 = vmatprep.subr.bf16.mxu0 %v4420_v1 }
  0xaa   : > { %3844 = vmatprep.subr.bf16.mxu1 %v4420_v1 }
  0xac   : > { %3825 = vmatpush3.bf16.msra.mxu0 %v4085_v15 }
  0xad   : > { %3845 = vmatpush3.bf16.msra.mxu1 %v4086_v17 }
  0xaf   : > { %3827 = vmatmul.mubr.bf16.vlgmr.msra.gmra.mrb[0].mxu0 %v891_v19 }
  0xb0   : > { %3847 = vmatmul.mubr.bf16.vlgmr.msra.gmra.mrb[0].mxu1 %v1008_v20 }
 0x182   : > { %v991_v41 = vpop.f32.mrb[0].mxu0 }
 0x183   : > { %v992_v42 = vadd.f32 %v991_v41, %v908_v38  ;;  %v1108_v44 = vpop.f32.mrb[0].mxu1  ;;  %v3828_v45 = vpop.f32.mrb[1].mxu0 }
 0x184   : > { %v1109_v46 = vadd.f32 %v1108_v44, %v1025_v40  ;;  %v3848_v48 = vpop.f32.mrb[1].mxu1  ;;  %v994_v49 = vpop.f32.mrb[2].mxu0 }
 0x185   : > { %v1003_v50 = vrot.slane %v992_v42, %v1002_v25  ;;  %v1111_v51 = vpop.f32.mrb[2].mxu1  ;;  %v3829_v52 = vpop.f32.mrb[3].mxu0 }
 0x186   : > { %v1121_v53 = vrot.slane %v1109_v46, %v1002_v25  ;;  %v3849_v54 = vpop.f32.mrb[3].mxu1 }
 0x187   : > { %v1004_v55 = vadd.f32 %v1003_v50, %v999_v43 }
 0x188   : > { %v1122_v56 = vadd.f32 %v1121_v53, %v1117_v47 }
 0x189   : > { %1005 = vst [vmem:[%s5378_s30] sm:$0xff] %v1004_v55 }
 0x18a   : > { %3560 = vst [vmem:[%s5378_s30 + $0x8] sm:$0xff] %v1122_v56 }
 0x18b PF: > { %s5379_s0 = sld [smem:[#allocation28_spill]]  ;;  %v4087_v59 = vld [vmem:[%s4700_s15 + $0x4] ss:$12 sps:$4 sm:$0xff]   ;;  %v4089_v60 = vld [vmem:[%s4700_s15] ss:$12 sps:$4 sm:$0xff]   ;;  %v4424_v61 = vmov 0.0   ;;  %s5380_s23 = scalar_lea.vmem %s5311_s6, %s4716_s22  ;;  %v1235_v46 = vlaneseq }
 0x18c   : > { %3850 = vmatprep.subr.bf16.mxu1 %v4424_v61  ;;  %v4090_v62 = vld [vmem:[%s4700_s15 + $0x8] ss:$12 sps:$4 sm:$0xff]   ;;  %1378 = vmatprep.subr.bf16.mxu0 %v4087_v59  ;;  %v4093_v8 = vld [vmem:[%s4700_s15 + $0x18] ss:$12 sps:$4 sm:$0xff]   ;;  %v4094_v9 = vld [vmem:[%s4700_s15 + $0x20] ss:$12 sps:$4 sm:$0xff]   ;;  %s5381_s20 = scalar_lea.vmem %s5312_s7, %s4716_s22  ;;  %s5382_s27 = scalar_lea.vmem %s5316_s11, %s4716_s22 }
 0x18d   : > { %v4091_v63 = vld [vmem:[%s4700_s15 + $0x1c] ss:$12 sps:$4 sm:$0xff]   ;;  %1379 = vmatpush1.bf16.msra.mxu0 %v4089_v60  ;;  %3851 = vmatpush3.bf16.msra.mxu1 %v4090_v62  ;;  %v4095_v10 = vld [vmem:[%s4700_s15 + $0x34] ss:$12 sps:$4 sm:$0xff]   ;;  %v4098_v12 = vld [vmem:[%s4700_s15 + $0x38] ss:$12 sps:$4 sm:$0xff]  }
 0x18e   : > { %1380 = vmatprep.subr.bf16.mxu0 %v4091_v63  ;;  %3852 = vmatprep.subr.bf16.mxu1 %v4424_v61  ;;  %v4097_v11 = vld [vmem:[%s4700_s15 + $0x30] ss:$12 sps:$4 sm:$0xff]   ;;  %v4099_v13 = vld [vmem:[%s4700_s15 + $0x4c] ss:$12 sps:$4 sm:$0xff]   ;;  %v4101_v14 = vld [vmem:[%s4700_s15 + $0x48] ss:$12 sps:$4 sm:$0xff]  }
 0x18f   : > { %v4102_v15 = vld [vmem:[%s4700_s15 + $0x50] ss:$12 sps:$4 sm:$0xff]   ;;  %v4105_v17 = vld [vmem:[%s4700_s15 + $0x60] ss:$12 sps:$4 sm:$0xff]   ;;  %v4106_v18 = vld [vmem:[%s4700_s15 + $0x68] ss:$12 sps:$4 sm:$0xff]  }
 0x190   : > { %v4103_v16 = vld [vmem:[%s4700_s15 + $0x64] ss:$12 sps:$4 sm:$0xff]   ;;  %v4107_v19 = vld [vmem:[%s4700_s15 + $0x7c] ss:$12 sps:$4 sm:$0xff]   ;;  %v4110_v21 = vld [vmem:[%s4700_s15 + $0x80] ss:$12 sps:$4 sm:$0xff]  }
 0x191   : > { %v1155_v57 = vld [vmem:[%s5379_s0] sm:$0xff]  ;;  %v1156_v58 = vld [vmem:[%s5379_s0 + $0x8] sm:$0xff]  ;;  %1381 = vmatpush1.bf16.msra.mxu0 %v4093_v8  ;;  %3853 = vmatpush3.bf16.msra.mxu1 %v4094_v9  ;;  %v4425_v23 = vmov 0   ;;  %vm4426_vm9 = vmmov 0   ;;  %v4113_v24 = vld [vmem:[%s4700_s15 + $0x90] ss:$12 sps:$4 sm:$0xff]  }
 0x192   : > { %1161 = vadd.xlane.f32.xlu0 %v1155_v57  ;;  %3854 = vmatprep.subr.bf16.mxu1 %v4424_v61  ;;  %v4109_v20 = vld [vmem:[%s4700_s15 + $0x78] ss:$12 sps:$4 sm:$0xff]   ;;  %v4111_v22 = vld [vmem:[%s4700_s15 + $0x94] ss:$12 sps:$4 sm:$0xff]   ;;  %v4118_v28 = vld [vmem:[%s4700_s15 + $0xb0] ss:$12 sps:$4 sm:$0xff]  }
 0x193   : > { %1382 = vmatprep.subr.bf16.mxu0 %v4095_v10  ;;  %1410 = vmatprep.mubr.bf16.mxu0 %v4425_v23  ;;  %v4114_v25 = vld [vmem:[%s4700_s15 + $0x98] ss:$12 sps:$4 sm:$0xff]   ;;  %v4117_v27 = vld [vmem:[%s4700_s15 + $0xa8] ss:$12 sps:$4 sm:$0xff]   ;;  %v3561_v37 = vld [vmem:[%s5380_s23] ss:$0 sm:$0xff] }
 0x194   : > { %3866 = vmatprep.mubr.msk.bf16.mxu1 %vm4426_vm9, %v4424_v61  ;;  %v4115_v26 = vld [vmem:[%s4700_s15 + $0xac] ss:$12 sps:$4 sm:$0xff]   ;;  %v3562_v41 = vld [vmem:[%s5381_s20] ss:$0 sm:$0xff]  ;;  %v4908_v47 = vshrl.u32 %v1235_v46, 7  ;;  %vm1479_vm10 = vcmask 261120  }
 0x195   : > { %1383 = vmatpush1.bf16.msra.mxu0 %v4097_v11  ;;  %3855 = vmatpush3.bf16.msra.mxu1 %v4098_v12  ;;  %v1233_v49 = vld [vmem:[%s4740_s1] sm:$0x7]  ;;  %vm1601_vm11 = vcmask 1043456   ;;  %vm1573_vm12 = vcmask 64512   ;;  %s4427_s1 = smov 96   ;;  %s4428_s3 = smov 64  }
 0x196   : > { %1163 = vadd.xlane.f32.xlu0 %v1156_v58  ;;  %3856 = vmatprep.subr.bf16.mxu1 %v4424_v61  ;;  %v1237_v48 = vsub.s32 0, %v4908_v47  ;;  %v1241_v50 = vsub.s32 1, %v4908_v47  ;;  %v1245_v52 = vsub.s32 2, %v4908_v47  ;;  %s4429_s5 = smov 32   ;;  %vm1925_vm13 = vcmask 523520  }
 0x197   : > { %1384 = vmatprep.subr.bf16.mxu0 %v4099_v13  ;;  %vm2158_vm14 = vcmask 785920   ;;  %vm2391_vm15 = vcmask 1048320  }
 0x198   : > { %v1238_v51 = vrot.slane %v1233_v49, %v1237_v48  ;;  %v1242_v53 = vrot.slane %v1233_v49, %v1241_v50 }
 0x199   : > { %1385 = vmatpush1.bf16.msra.mxu0 %v4101_v14  ;;  %3857 = vmatpush3.bf16.msra.mxu1 %v4102_v15  ;;  %v4948_v14 = vld [vmem:[#allocation2] sm:$0xff] }
 0x19a   : > { %3858 = vmatprep.subr.bf16.mxu1 %v4424_v61  ;;  %1386 = vmatprep.subr.bf16.mxu0 %v4103_v16 }
 0x19d   : > { %1387 = vmatpush1.bf16.msra.mxu0 %v4105_v17  ;;  %3859 = vmatpush3.bf16.msra.mxu1 %v4106_v18 }
 0x19e   : > { %1388 = vmatprep.subr.bf16.mxu0 %v4107_v19  ;;  %3860 = vmatprep.subr.bf16.mxu1 %v4424_v61 }
 0x1a1   : > { %1389 = vmatpush1.bf16.msra.mxu0 %v4109_v20  ;;  %3861 = vmatpush3.bf16.msra.mxu1 %v4110_v21  ;;  %v4952_v21 = vld [vmem:[#allocation2 + $0x8] sm:$0xff] }
 0x1a2   : > { %1390 = vmatprep.subr.bf16.mxu0 %v4111_v22  ;;  %3862 = vmatprep.subr.bf16.mxu1 %v4424_v61 }
 0x1a5   : > { %1391 = vmatpush1.bf16.msra.mxu0 %v4113_v24  ;;  %3863 = vmatpush3.bf16.msra.mxu1 %v4114_v25 }
 0x1a6   : > { %1392 = vmatprep.subr.bf16.mxu0 %v4115_v26  ;;  %3864 = vmatprep.subr.bf16.mxu1 %v4424_v61 }
 0x1a9   : > { %1393 = vmatpush1.bf16.msra.mxu0 %v4117_v27  ;;  %3865 = vmatpush3.bf16.msra.mxu1 %v4118_v28 }
 0x1aa   : > { %3870 = vmatprep.subr.bf16.mxu1 %v4424_v61  ;;  %3894 = vmatprep.subr.bf16.mxu0 %v4424_v61 }
 0x21f   : > { %v1162_v0 = vpop.xlane.xlu0 %1161 }
 0x220   : > { %v1166_v1 = vmul.f32 0.0078125, %v1162_v0 }
 0x222   : > { %v4853_v2 = vsub.f32 %v1155_v57, %v1166_v1  ;;  %v1246_v57 = vrot.slane %v1233_v49, %v1245_v52 }
 0x223   : > { %v1164_v3 = vpop.xlane.xlu0 %1163 }
 0x224   : > { %v1167_v4 = vmul.f32 0.0078125, %v1164_v3  ;;  %v1170_v5 = vmul.f32 %v4853_v2, %v4853_v2 }
 0x226   : > { %v4857_v6 = vsub.f32 %v1156_v58, %v1167_v4  ;;  %1172 = vadd.xlane.f32.xlu1 %v1170_v5 }
 0x228   : > { %v1171_v7 = vmul.f32 %v4857_v6, %v4857_v6 }
 0x22a   : > { %1174 = vadd.xlane.f32.xlu1 %v1171_v7 }
 0x2b3   : > { %v1173_v29 = vpop.xlane.xlu1 %1172 }
 0x2b4   : > { %v1176_v30 = vmul.f32 0.0078125, %v1173_v29 }
 0x2b6   : > { %v1178_v31 = vadd.f32 1e-05, %v1176_v30 }
 0x2b7   : > { %v1175_v32 = vpop.xlane.xlu1 %1174 }
 0x2b8   : > { %4207 = vrsqrt.f32 %v1178_v31  ;;  %v1177_v33 = vmul.f32 0.0078125, %v1175_v32 }
 0x2ba   : > { %v1179_v34 = vadd.f32 1e-05, %v1177_v33 }
 0x2bc   : > { %4209 = vrsqrt.f32 %v1179_v34 }
 0x2c2   : > { %v4208_v35 = vpop.eup %4207 }
 0x2c3   : > { %v1182_v36 = vmul.f32 %v4208_v35, %v4853_v2 }
 0x2c5   : > { %v1190_v40 = vmul.f32 %v3561_v37, %v1182_v36 }
 0x2c6   : > { %v4210_v38 = vpop.eup %4209 }
 0x2c7   : > { %v1183_v39 = vmul.f32 %v4210_v38, %v4857_v6  ;;  %v1198_v43 = vadd.f32 %v3562_v41, %v1190_v40 }
 0x2c9   : > { %v1191_v42 = vmul.f32 %v3561_v37, %v1183_v39 }
 0x2cb   : > { %v1199_v44 = vadd.f32 %v3562_v41, %v1191_v42 }
 0x2cd   : > { %v1200_v45 = vpack.c.bf16 %v1199_v44, %v1198_v43 }
 0x2cf   : > { %1411 = vmatmul.mubr.bf16.vlgmr.msra.gmra.mrb[0].mxu0 %v1200_v45  ;;  %3867 = vmatmul.mubr.bf16.vlgmr.msra.gmra.mrb[0].mxu1 %v1200_v45 }
 0x2d0   : > { %3872 = vmatprep.mubr.msk.bf16.mxu1 %vm4426_vm9, %v4424_v61  ;;  %3896 = vmatprep.mubr.msk.bf16.mxu0 %vm4426_vm9, %v4424_v61 }
 0x3a2   : > { %v1412_v54 = vpop.f32.mrb[0].mxu0  ;;  %v1455_v55 = vpop.f32.mrb[0].mxu1 }
 0x3a3   : > { %v4918_v56 = vadd.f32 %v1412_v54, %v1238_v51  ;;  %v1414_v58 = vpop.f32.mrb[1].mxu0  ;;  %v3868_v59 = vpop.f32.mrb[1].mxu1  ;;  %v1456_v10 = vadd.f32 %v1455_v55, %v1246_v57 }
 0x3a4   : > { %v1415_v60 = vadd.f32 %v1414_v58, %v1242_v53  ;;  %v1416_v62 = vpop.f32.mrb[2].mxu0  ;;  %v1458_v63 = vpop.f32.mrb[2].mxu1 }
 0x3a5   : > { %v1417_v0 = vadd.f32 %v1416_v62, %v1238_v51  ;;  %v4922_v1 = vadd.f32 %v1458_v63, %v1246_v57  ;;  %v1418_v2 = vpop.f32.mrb[3].mxu0  ;;  %v3869_v3 = vpop.f32.mrb[3].mxu1  ;;  %v4939_v12 = vpack.c.bf16 %v1456_v10, %v1456_v10  ;;  %v4964_v39 = vpack.c.bf16 %v4918_v56, %v4918_v56 }
 0x3a6   : > { %v4925_v4 = vpack.c.bf16 %v1415_v60, %v4918_v56  ;;  %v1419_v5 = vadd.f32 %v1418_v2, %v1242_v53 }
 0x3a7   : > { %v1603_v13 = vsel %vm1601_vm11, %v4939_v12, 0  ;;  %v4968_v40 = vpack.c.bf16 %v1417_v0, %v1417_v0  ;;  %v4976_v51 = vpack.c.bf16 %v4922_v1, %v4922_v1 }
 0x3a8   : > { %v4927_v6 = vpack.c.bf16 %v1419_v5, %v1417_v0  ;;  %v1478_v7 = vrot.slane %v4925_v4, 4 }
 0x3a9   : > { %v1649_v56 = vsel %vm1601_vm11, %v4976_v51, 0 }
 0x3aa   : > { %v1484_v8 = vsel %vm1479_vm10, %v1478_v7, 0  ;;  %v1526_v9 = vrot.slane %v4927_v6, 4 }
 0x3ab   : > { %3871 = vmatpush3.bf16.xpose.msra.mxu1 %v1484_v8 }
 0x3ac   : > { %3876 = vmatprep.subr.bf16.mxu1 %v4424_v61  ;;  %v1531_v11 = vsel %vm1479_vm10, %v1526_v9, 0 }
 0x3b2   : > { %3873 = vmatmul.mubr.msk.bf16.vlgmr.msra.gmra.mrb[4].mxu1 %vm1479_vm10, %v4925_v4 }
 0x3b3   : > { %3877 = vmatpush3.bf16.xpose.msra.mxu1 %v1531_v11  ;;  %3878 = vmatprep.mubr.msk.bf16.mxu1 %vm4426_vm9, %v4424_v61 }
 0x3b4   : > { %3882 = vmatprep.subr.bf16.mxu1 %v4424_v61 }
 0x3ba   : > { %3879 = vmatmul.mubr.msk.bf16.vlgmr.msra.gmra.mrb[8].mxu1 %vm1479_vm10, %v4927_v6 }
 0x3bb   : > { %3883 = vmatpush3.bf16.msra.mxu1 %v1603_v13  ;;  %3884 = vmatprep.mubr.msk.bf16.mxu1 %vm4426_vm9, %v4424_v61 }
 0x3bc   : > { %3888 = vmatprep.subr.bf16.mxu1 %v4424_v61 }
 0x485   : > { %v1520_v15 = vpop.f32.mrb[4].mxu1 }
 0x486   : > { %v1521_v16 = vadd.f32 %v1520_v15, %v4948_v14  ;;  %v3874_v17 = vpop.f32.mrb[5].mxu1 }
 0x487   : > { %v1523_v18 = vpop.f32.mrb[6].mxu1 }
 0x488   : > { %v3875_v19 = vpop.f32.mrb[7].mxu1  ;;  %v1574_v20 = vsel %vm1573_vm12, %v1521_v16, -inf }
 0x489   : > { %1575 = vmax.xlane.f32.xlu0 %v1574_v20 }
 0x48d   : > { %v1567_v22 = vpop.f32.mrb[8].mxu1 }
 0x48e   : > { %v1568_v24 = vadd.f32 %v1567_v22, %v4952_v21  ;;  %v3880_v25 = vpop.f32.mrb[9].mxu1 }
 0x48f   : > { %v1570_v26 = vpop.f32.mrb[10].mxu1 }
 0x490   : > { %v3881_v27 = vpop.f32.mrb[11].mxu1  ;;  %v1577_v28 = vsel %vm1573_vm12, %v1568_v24, -inf }
 0x491   : > { %1578 = vmax.xlane.f32.xlu1 %v1577_v28 }
 0x4a2   : > { %1745 = vrot.lane.b32.xlu1 %v4927_v6, %s4427_s1 }
 0x516   : > { %v1576_v29 = vpop.xlane.xlu0 %1575 }
 0x517   : > { %v1580_v30 = vsub.f32 %v1521_v16, %v1576_v29 }
 0x519   : > { %v1582_v31 = vmul.f32 1.442695, %v1580_v30 }
 0x51b   : > { %4211 = vpow2.f32 %v1582_v31 }
 0x51e   : > { %v1579_v32 = vpop.xlane.xlu1 %1578 }
 0x51f   : > { %v1581_v33 = vsub.f32 %v1568_v24, %v1579_v32 }
 0x521   : > { %v1584_v34 = vmul.f32 1.442695, %v1581_v33 }
 0x522   : > { %v1746_v42 = vpop.permute.xlu1 %1745 }
 0x523   : > { %4213 = vpow2.f32 %v1584_v34  ;;  %v1747_v59 = vrot.slane %v1746_v42, 4 }
 0x525   : > { %v4212_v35 = vpop.eup %4211  ;;  %v1755_v62 = vsel %vm1479_vm10, %v1747_v59, 0 }
 0x526   : > { %v1586_v36 = vsel %vm1573_vm12, %v4212_v35, 0.0 }
 0x527   : > { %1587 = vadd.xlane.f32.xlu0 %v1586_v36 }
 0x52d   : > { %v4214_v37 = vpop.eup %4213 }
 0x52e   : > { %v1589_v38 = vsel %vm1573_vm12, %v4214_v37, 0.0 }
 0x52f   : > { %1590 = vadd.xlane.f32.xlu1 %v1589_v38 }
 0x53d   : > { %1693 = vrot.lane.b32.xlu0 %v4925_v4, %s4427_s1 }
 0x540   : > { %1697 = vrot.lane.b32.xlu1 %v4964_v39, %s4427_s1 }
 0x544   : > { %1749 = vrot.lane.b32.xlu1 %v4968_v40, %s4427_s1 }
 0x5b4   : > { %v1588_v41 = vpop.xlane.xlu0 %1587 }
 0x5b5   : > { %4215 = vrcp.f32 %v1588_v41 }
 0x5b8   : > { %v1694_v43 = vpop.permute.xlu0 %1693 }
 0x5b9   : > { %v1695_v44 = vrot.slane %v1694_v43, 4 }
 0x5bb   : > { %v1703_v45 = vsel %vm1479_vm10, %v1695_v44, 0 }
 0x5bc   : > { %3895 = vmatpush3.bf16.xpose.msra.mxu0 %v1703_v45  ;;  %v1591_v46 = vpop.xlane.xlu1 %1590 }
 0x5bd   : > { %4217 = vrcp.f32 %v1591_v46  ;;  %3906 = vmatprep.subr.bf16.mxu0 %v4424_v61 }
 0x5bf   : > { %v4216_v49 = vpop.eup %4215 }
 0x5c0   : > { %v1594_v53 = vmul.f32 %v4216_v49, %v4212_v35  ;;  %v1698_v54 = vpop.permute.xlu1 %1697 }
 0x5c2   : > { %v1596_v55 = vpack.c.bf16 %v1594_v53, %v1594_v53 }
 0x5c3   : > { %3897 = vmatmul.mubr.msk.bf16.vlgmr.msra.gmra.mrb[4].mxu0 %vm1479_vm10, %v1698_v54 }
 0x5c4   : > { %3885 = vmatmul.mubr.msk.bf16.vlgmr.msra.gmra.mrb[12].mxu1 %vm1573_vm12, %v1596_v55  ;;  %3908 = vmatprep.mubr.msk.bf16.mxu0 %vm4426_vm9, %v4424_v61  ;;  %v1750_v63 = vpop.permute.xlu1 %1749 }
 0x5c5   : > { %3889 = vmatpush3.bf16.msra.mxu1 %v1649_v56  ;;  %3890 = vmatprep.mubr.msk.bf16.mxu1 %vm4426_vm9, %v4424_v61 }
 0x5c6   : > { %3900 = vmatprep.subr.bf16.mxu1 %v4424_v61 }
 0x5c7   : > { %v4218_v57 = vpop.eup %4217 }
 0x5c8   : > { %v1595_v58 = vmul.f32 %v4218_v57, %v4214_v37 }
 0x5ca   : > { %v1597_v60 = vpack.c.bf16 %v1595_v58, %v1595_v58 }
 0x5cc   : > { %3891 = vmatmul.mubr.msk.bf16.vlgmr.msra.gmra.mrb[16].mxu1 %vm1573_vm12, %v1597_v60 }
 0x5cd   : > { %3902 = vmatprep.mubr.msk.bf16.mxu1 %vm4426_vm9, %v4424_v61 }
 0x5ce   : > { %3901 = vmatpush3.bf16.xpose.msra.mxu1 %v1755_v62 }
 0x5cf   : > { %3912 = vmatprep.subr.bf16.mxu1 %v4424_v61 }
 0x5d5   : > { %3903 = vmatmul.mubr.msk.bf16.vlgmr.msra.gmra.mrb[20].mxu1 %vm1479_vm10, %v1750_v63 }
 0x5d6   : > { %3914 = vmatprep.mubr.msk.bf16.mxu1 %vm4426_vm9, %v4424_v61 }
 0x696   : > { %v1739_v0 = vpop.f32.mrb[4].mxu0 }
 0x697   : > { %v1740_v1 = vadd.f32 %v1739_v0, %v4948_v14  ;;  %v1639_v2 = vpop.f32.mrb[12].mxu1  ;;  %v3898_v3 = vpop.f32.mrb[5].mxu0 }
 0x698   : > { %1691 = vst.msk [vmem:[#allocation3] sm:$0xff] %vm1479_vm10, %v1639_v2  ;;  %v3886_v5 = vpop.f32.mrb[13].mxu1  ;;  %v1742_v7 = vpop.f32.mrb[6].mxu0 }
 0x699   : > { %v1642_v8 = vpop.f32.mrb[14].mxu1  ;;  %v3899_v9 = vpop.f32.mrb[7].mxu0  ;;  %v1797_v10 = vsel %vm1573_vm12, %v1740_v1, -inf }
 0x69a   : > { %1798 = vmax.xlane.f32.xlu0 %v1797_v10  ;;  %v3887_v11 = vpop.f32.mrb[15].mxu1 }
 0x69f   : > { %v1685_v13 = vpop.f32.mrb[16].mxu1 }
 0x6a0   : > { %1692 = vst.msk [vmem:[#allocation3 + $0x8] sm:$0xff] %vm1479_vm10, %v1685_v13  ;;  %v3892_v15 = vpop.f32.mrb[17].mxu1 }
 0x6a1   : > { %v1688_v16 = vpop.f32.mrb[18].mxu1 }
 0x6a2   : > { %v3893_v17 = vpop.f32.mrb[19].mxu1 }
 0x6a8   : > { %v1791_v18 = vpop.f32.mrb[20].mxu1 }
 0x6a9   : > { %v1792_v19 = vadd.f32 %v1791_v18, %v4952_v21  ;;  %v3904_v20 = vpop.f32.mrb[21].mxu1 }
 0x6aa   : > { %v1794_v22 = vpop.f32.mrb[22].mxu1 }
 0x6ab   : > { %v3905_v24 = vpop.f32.mrb[23].mxu1  ;;  %v1800_v25 = vsel %vm1573_vm12, %v1792_v19, -inf }
 0x6ac   : > { %1801 = vmax.xlane.f32.xlu1 %v1800_v25 }
 0x6bd   : > { %1869 = vrot.lane.b32.xlu1 %v4976_v51, %s4427_s1 }
 0x6c1   : > { %1928 = vrot.lane.b32.xlu1 %v4925_v4, %s4428_s3 }
 0x6c5   : > { %1979 = vrot.lane.b32.xlu1 %v4927_v6, %s4428_s3 }
 0x6c9   : > { %1982 = vrot.lane.b32.xlu1 %v4968_v40, %s4428_s3 }
 0x727   : > { %v1799_v26 = vpop.xlane.xlu0 %1798 }
 0x728   : > { %v1803_v27 = vsub.f32 %v1740_v1, %v1799_v26 }
 0x72a   : > { %v1805_v28 = vmul.f32 1.442695, %v1803_v27 }
 0x72c   : > { %4219 = vpow2.f32 %v1805_v28 }
 0x736   : > { %v4220_v29 = vpop.eup %4219 }
 0x737   : > { %v1809_v30 = vsel %vm1573_vm12, %v4220_v29, 0.0 }
 0x738   : > { %1810 = vadd.xlane.f32.xlu0 %v1809_v30 }
 0x739   : > { %v1802_v31 = vpop.xlane.xlu1 %1801 }
 0x73a   : > { %v1804_v32 = vsub.f32 %v1792_v19, %v1802_v31 }
 0x73c   : > { %v1807_v33 = vmul.f32 1.442695, %v1804_v32 }
 0x73d   : > { %v1870_v34 = vpop.permute.xlu1 %1869 }
 0x73e   : > { %4221 = vpow2.f32 %v1807_v33  ;;  %v1875_v35 = vsel %vm1601_vm11, %v1870_v34, 0 }
 0x73f   : > { %3913 = vmatpush3.bf16.msra.mxu1 %v1875_v35 }
 0x740   : > { %3924 = vmatprep.subr.bf16.mxu1 %v4424_v61 }
 0x741   : > { %v1929_v43 = vpop.permute.xlu1 %1928 }
 0x742   : > { %v1930_v54 = vrot.slane %v1929_v43, 4 }
 0x744   : > { %v1937_v58 = vsel %vm1479_vm10, %v1930_v54, 0 }
 0x745   : > { %v1980_v53 = vpop.permute.xlu1 %1979 }
 0x746   : > { %v1981_v56 = vrot.slane %v1980_v53, 4 }
 0x748   : > { %v4222_v36 = vpop.eup %4221  ;;  %v1988_v60 = vsel %vm1479_vm10, %v1981_v56, 0 }
 0x749   : > { %v1812_v37 = vsel %vm1573_vm12, %v4222_v36, 0.0  ;;  %v1983_v63 = vpop.permute.xlu1 %1982 }
 0x74a   : > { %1813 = vadd.xlane.f32.xlu0 %v1812_v37 }
 0x760   : > { %1821 = vrot.lane.b32.xlu0 %v4939_v12, %s4427_s1 }
 0x764   : > { %1931 = vrot.lane.b32.xlu0 %v4964_v39, %s4428_s3 }
 0x7c5   : > { %v1811_v38 = vpop.xlane.xlu0 %1810 }
 0x7c6   : > { %4223 = vrcp.f32 %v1811_v38 }
 0x7d0   : > { %v4224_v41 = vpop.eup %4223 }
 0x7d1   : > { %v1817_v44 = vmul.f32 %v4224_v41, %v4220_v29 }
 0x7d3   : > { %v1819_v49 = vpack.c.bf16 %v1817_v44, %v1817_v44 }
 0x7d7   : > { %v1814_v42 = vpop.xlane.xlu0 %1813 }
 0x7d8   : > { %4225 = vrcp.f32 %v1814_v42 }
 0x7db   : > { %v1822_v45 = vpop.permute.xlu0 %1821 }
 0x7dc   : > { %v1827_v46 = vsel %vm1601_vm11, %v1822_v45, 0 }
 0x7dd   : > { %3907 = vmatpush3.bf16.msra.mxu0 %v1827_v46 }
 0x7de   : > { %3918 = vmatprep.subr.bf16.mxu0 %v4424_v61 }
 0x7df   : > { %v1932_v62 = vpop.permute.xlu0 %1931 }
 0x7e0   : > { %3909 = vmatmul.mubr.msk.bf16.vlgmr.msra.gmra.mrb[8].mxu0 %vm1573_vm12, %v1819_v49 }
 0x7e1   : > { %3920 = vmatprep.mubr.msk.bf16.mxu0 %vm4426_vm9, %v4424_v61 }
 0x7e2   : > { %v4226_v55 = vpop.eup %4225 }
 0x7e3   : > { %v1818_v57 = vmul.f32 %v4226_v55, %v4222_v36 }
 0x7e5   : > { %v1820_v59 = vpack.c.bf16 %v1818_v57, %v1818_v57 }
 0x7e6   : > { %3919 = vmatpush3.bf16.xpose.msra.mxu0 %v1937_v58 }
 0x7e7   : > { %3915 = vmatmul.mubr.msk.bf16.vlgmr.msra.gmra.mrb[24].mxu1 %vm1573_vm12, %v1820_v59  ;;  %3930 = vmatprep.subr.bf16.mxu0 %v4424_v61 }
 0x7e8   : > { %3925 = vmatpush3.bf16.xpose.msra.mxu1 %v1988_v60  ;;  %3926 = vmatprep.mubr.msk.bf16.mxu1 %vm4426_vm9, %v4424_v61 }
 0x7e9   : > { %3936 = vmatprep.subr.bf16.mxu1 %v4424_v61 }
 0x7ed   : > { %3921 = vmatmul.mubr.msk.bf16.vlgmr.msra.gmra.mrb[12].mxu0 %vm1479_vm10, %v1932_v62 }
 0x7ee   : > { %3932 = vmatprep.mubr.msk.bf16.mxu0 %vm4426_vm9, %v4424_v61 }
 0x7ef   : > { %3927 = vmatmul.mubr.msk.bf16.vlgmr.msra.gmra.mrb[28].mxu1 %vm1479_vm10, %v1983_v63 }
 0x7f0   : > { %3938 = vmatprep.mubr.msk.bf16.mxu1 %vm4426_vm9, %v4424_v61 }
 0x8b3   : > { %v5035_v0 = vpop.f32.mrb[8].mxu0 }
 0x8b4   : > { %v3910_v1 = vpop.f32.mrb[9].mxu0 }
 0x8b5   : > { %v1866_v2 = vpop.f32.mrb[10].mxu0 }
 0x8b6   : > { %v3911_v3 = vpop.f32.mrb[11].mxu0 }
 0x8ba   : > { %v5037_v5 = vpop.f32.mrb[24].mxu1 }
 0x8bb   : > { %v3916_v7 = vpop.f32.mrb[25].mxu1 }
 0x8bc   : > { %v1914_v8 = vpop.f32.mrb[26].mxu1 }
 0x8bd   : > { %v3917_v9 = vpop.f32.mrb[27].mxu1 }
 0x8c0   : > { %v1973_v10 = vpop.f32.mrb[12].mxu0 }
 0x8c1   : > { %v1974_v11 = vadd.f32 %v1973_v10, %v4948_v14  ;;  %v3922_v13 = vpop.f32.mrb[13].mxu0 }
 0x8c2   : > { %v1976_v15 = vpop.f32.mrb[14].mxu0  ;;  %v2024_v16 = vpop.f32.mrb[28].mxu1 }
 0x8c3   : > { %v2025_v17 = vadd.f32 %v2024_v16, %v4952_v21  ;;  %v3923_v18 = vpop.f32.mrb[15].mxu0  ;;  %v3928_v19 = vpop.f32.mrb[29].mxu1  ;;  %v2030_v20 = vsel %vm1573_vm12, %v1974_v11, -inf }
 0x8c4   : > { %2031 = vmax.xlane.f32.xlu0 %v2030_v20  ;;  %v2027_v22 = vpop.f32.mrb[30].mxu1 }
 0x8c5   : > { %v3929_v24 = vpop.f32.mrb[31].mxu1  ;;  %v2033_v25 = vsel %vm1573_vm12, %v2025_v17, -inf }
 0x8c6   : > { %2034 = vmax.xlane.f32.xlu1 %v2033_v25 }
 0x8d7   : > { %2102 = vrot.lane.b32.xlu1 %v4976_v51, %s4428_s3 }
 0x8db   : > { %2161 = vrot.lane.b32.xlu1 %v4925_v4, %s4429_s5 }
 0x8df   : > { %2212 = vrot.lane.b32.xlu1 %v4927_v6, %s4429_s5 }
 0x8e3   : > { %2215 = vrot.lane.b32.xlu1 %v4968_v40, %s4429_s5 }
 0x951   : > { %v2032_v26 = vpop.xlane.xlu0 %2031 }
 0x952   : > { %v2036_v27 = vsub.f32 %v1974_v11, %v2032_v26 }
 0x953   : > { %v2035_v28 = vpop.xlane.xlu1 %2034 }
 0x954   : > { %v2038_v29 = vmul.f32 1.442695, %v2036_v27  ;;  %v2037_v30 = vsub.f32 %v2025_v17, %v2035_v28 }
 0x956   : > { %4227 = vpow2.f32 %v2038_v29  ;;  %v2040_v31 = vmul.f32 1.442695, %v2037_v30 }
 0x957   : > { %v2103_v32 = vpop.permute.xlu1 %2102 }
 0x958   : > { %4229 = vpow2.f32 %v2040_v31  ;;  %v2108_v33 = vsel %vm1601_vm11, %v2103_v32, 0 }
 0x959   : > { %3937 = vmatpush3.bf16.msra.mxu1 %v2108_v33 }
 0x95a   : > { %3948 = vmatprep.subr.bf16.mxu1 %v4424_v61 }
 0x95b   : > { %v2162_v37 = vpop.permute.xlu1 %2161 }
 0x95c   : > { %v2163_v45 = vrot.slane %v2162_v37, 4 }
 0x95f   : > { %v2213_v44 = vpop.permute.xlu1 %2212 }
 0x960   : > { %v4228_v4 = vpop.eup %4227  ;;  %v2214_v53 = vrot.slane %v2213_v44, 4  ;;  %v4120_v44 = vld [vmem:[%s4731_s18 + $0x8] sm:$0xff]  }
 0x961   : > { %v2042_v6 = vsel %vm1573_vm12, %v4228_v4, 0.0 }
 0x962   : > { %v4230_v34 = vpop.eup %4229  ;;  %2043 = vadd.xlane.f32.xlu0 %v2042_v6  ;;  %v2221_v56 = vsel %vm1479_vm10, %v2214_v53, 0  ;;  %v4124_v53 = vld [vmem:[%s4731_s18 + $0x28] sm:$0xff]  }
 0x963   : > { %v2045_v40 = vsel %vm1573_vm12, %v4230_v34, 0.0  ;;  %v2216_v58 = vpop.permute.xlu1 %2215 }
 0x966   : > { %2046 = vadd.xlane.f32.xlu0 %v2045_v40 }
 0x97c   : > { %2054 = vrot.lane.b32.xlu0 %v4939_v12, %s4428_s3 }
 0x980   : > { %2164 = vrot.lane.b32.xlu0 %v4964_v39, %s4429_s5  ;;  %v2170_v39 = vsel %vm1479_vm10, %v2163_v45, 0  ;;  %v4121_v45 = vld [vmem:[%s4731_s18 + $0x10] sm:$0xff]  }
 0x9ef   : > { %v2044_v35 = vpop.xlane.xlu0 %2043 }
 0x9f0   : > { %4231 = vrcp.f32 %v2044_v35 }
 0x9f3   : > { %v2047_v36 = vpop.xlane.xlu0 %2046 }
 0x9f4   : > { %4233 = vrcp.f32 %v2047_v36 }
 0x9f7   : > { %v2055_v38 = vpop.permute.xlu0 %2054 }
 0x9f8   : > { %v2060_v41 = vsel %vm1601_vm11, %v2055_v38, 0 }
 0x9f9   : > { %3931 = vmatpush3.bf16.msra.mxu0 %v2060_v41 }
 0x9fa   : > { %v4232_v42 = vpop.eup %4231  ;;  %3942 = vmatprep.subr.bf16.mxu0 %v4424_v61 }
 0x9fb   : > { %v2050_v43 = vmul.f32 %v4232_v42, %v4228_v4  ;;  %v2165_v57 = vpop.permute.xlu0 %2164 }
 0x9fd   : > { %v2052_v46 = vpack.c.bf16 %v2050_v43, %v2050_v43  ;;  %v4119_v43 = vld [vmem:[%s4731_s18] sm:$0xff]  }
 0x9fe   : > { %v4234_v49 = vpop.eup %4233 }
 0x9ff   : > { %v2051_v54 = vmul.f32 %v4234_v49, %v4230_v34  ;;  %3933 = vmatmul.mubr.msk.bf16.vlgmr.msra.gmra.mrb[16].mxu0 %vm1573_vm12, %v2052_v46  ;;  %v4122_v46 = vld [vmem:[%s4731_s18 + $0x18] sm:$0xff]   ;;  %v4123_v49 = vld [vmem:[%s4731_s18 + $0x20] sm:$0xff]  }
 0xa00   : > { %3944 = vmatprep.mubr.msk.bf16.mxu0 %vm4426_vm9, %v4424_v61 }
 0xa01   : > { %v2053_v55 = vpack.c.bf16 %v2051_v54, %v2051_v54  ;;  %v4125_v54 = vld [vmem:[%s4731_s18 + $0x30] sm:$0xff]  }
 0xa02   : > { %3943 = vmatpush3.bf16.xpose.msra.mxu0 %v2170_v39  ;;  %v4126_v39 = vld [vmem:[%s4731_s18 + $0x38] sm:$0xff]  }
 0xa03   : > { %3939 = vmatmul.mubr.msk.bf16.vlgmr.msra.gmra.mrb[32].mxu1 %vm1573_vm12, %v2053_v55  ;;  %3954 = vmatprep.subr.bf16.mxu0 %v4424_v61 }
 0xa04   : > { %3949 = vmatpush3.bf16.xpose.msra.mxu1 %v2221_v56  ;;  %3950 = vmatprep.mubr.msk.bf16.mxu1 %vm4426_vm9, %v4424_v61 }
 0xa05   : > { %3960 = vmatprep.subr.bf16.mxu1 %v4424_v61 }
 0xa09   : > { %3945 = vmatmul.mubr.msk.bf16.vlgmr.msra.gmra.mrb[20].mxu0 %vm1479_vm10, %v2165_v57 }
 0xa0a   : > { %3956 = vmatprep.mubr.msk.bf16.mxu0 %vm4426_vm9, %v4424_v61 }
 0xa0b   : > { %3951 = vmatmul.mubr.msk.bf16.vlgmr.msra.gmra.mrb[36].mxu1 %vm1479_vm10, %v2216_v58 }
 0xa0c   : > { %3962 = vmatprep.mubr.msk.bf16.mxu1 %vm4426_vm9, %v4424_v61 }
 0xad2   : > { %v2096_v59 = vpop.f32.mrb[16].mxu0 }
 0xad3   : > { %v3934_v60 = vpop.f32.mrb[17].mxu0 }
 0xad4   : > { %v2099_v62 = vpop.f32.mrb[18].mxu0 }
 0xad5   : > { %v3935_v63 = vpop.f32.mrb[19].mxu0 }
 0xad6   : > { %v2144_v1 = vpop.f32.mrb[32].mxu1 }
 0xad7   : > { %v3940_v2 = vpop.f32.mrb[33].mxu1 }
 0xad8   : > { %v2147_v3 = vpop.f32.mrb[34].mxu1 }
 0xad9   : > { %v3941_v7 = vpop.f32.mrb[35].mxu1 }
 0xadc   : > { %v2206_v8 = vpop.f32.mrb[20].mxu0 }
 0xadd   : > { %v2207_v9 = vadd.f32 %v2206_v8, %v4948_v14  ;;  %v3946_v10 = vpop.f32.mrb[21].mxu0  ;;  %v3609_v8 = vld [vmem:[%s5382_s27] ss:$0 sm:$0xff] }
 0xade   : > { %v2209_v11 = vpop.f32.mrb[22].mxu0  ;;  %v2257_v13 = vpop.f32.mrb[36].mxu1 }
 0xadf   : > { %v2258_v15 = vadd.f32 %v2257_v13, %v4952_v21  ;;  %v3947_v16 = vpop.f32.mrb[23].mxu0  ;;  %v3952_v17 = vpop.f32.mrb[37].mxu1  ;;  %v2263_v18 = vsel %vm1573_vm12, %v2207_v9, -inf }
 0xae0   : > { %2264 = vmax.xlane.f32.xlu0 %v2263_v18  ;;  %v2260_v19 = vpop.f32.mrb[38].mxu1  ;;  %v4264_v18 = vld [vmem:[%s5379_s0 + $0x8] sm:$0xff] }
 0xae1   : > { %v3953_v20 = vpop.f32.mrb[39].mxu1  ;;  %v2266_v22 = vsel %vm1573_vm12, %v2258_v15, -inf }
 0xae2   : > { %2267 = vmax.xlane.f32.xlu1 %v2266_v22  ;;  %v4127_v20 = vld [vmem:[%s4708_s17] ss:$16 sps:$4 sm:$0xff]   ;;  %v4129_v22 = vld [vmem:[%s4708_s17 + $0x4] ss:$16 sps:$4 sm:$0xff]  }
 0xaf3   : > { %2335 = vrot.lane.b32.xlu1 %v4976_v51, %s4429_s5 }
 0xaf7   : > { %1919 = vrot.lane.b32.xlu1 %v5035_v0, %s4429_s5 }
 0xafb   : > { %1921 = vrot.lane.b32.xlu1 %v5037_v5, %s4429_s5 }
 0xaff   : > { %2154 = vrot.lane.b32.xlu1 %v2144_v1, %s4428_s3 }
 0xb6d   : > { %v2265_v14 = vpop.xlane.xlu0 %2264 }
 0xb6e   : > { %v2269_v21 = vsub.f32 %v2207_v9, %v2265_v14  ;;  %v4130_v14 = vld [vmem:[%s4708_s17 + $0x8] ss:$16 sps:$4 sm:$0xff]  }
 0xb6f   : > { %v2268_v24 = vpop.xlane.xlu1 %2267 }
 0xb70   : > { %v2271_v25 = vmul.f32 1.442695, %v2269_v21  ;;  %v2270_v26 = vsub.f32 %v2258_v15, %v2268_v24  ;;  %v4263_v15 = vld [vmem:[%s5379_s0] sm:$0xff]  ;;  %v4132_v21 = vld [vmem:[%s4708_s17 + $0xc] ss:$16 sps:$4 sm:$0xff]  }
 0xb71   : > { %v4135_v24 = vld [vmem:[%s4708_s17 + $0x24] ss:$16 sps:$4 sm:$0xff]  }
 0xb72   : > { %4235 = vpow2.f32 %v2271_v25  ;;  %v2273_v27 = vmul.f32 1.442695, %v2270_v26  ;;  %v4138_v25 = vld [vmem:[%s4708_s17 + $0x2c] ss:$16 sps:$4 sm:$0xff]   ;;  %v4133_v26 = vld [vmem:[%s4708_s17 + $0x20] ss:$16 sps:$4 sm:$0xff]  }
 0xb73   : > { %v2336_v28 = vpop.permute.xlu1 %2335 }
 0xb74   : > { %4237 = vpow2.f32 %v2273_v27  ;;  %v2341_v29 = vsel %vm1601_vm11, %v2336_v28, 0  ;;  %v4136_v27 = vld [vmem:[%s4708_s17 + $0x28] ss:$16 sps:$4 sm:$0xff]  }
 0xb75   : > { %3961 = vmatpush3.bf16.msra.mxu1 %v2341_v29 }
 0xb76   : > { %2766 = vmatprep.subr.bf16.mxu1 %v4129_v22  ;;  %v4177_v22 = vld [vmem:[%s4760_s26] sm:$0xff]  }
 0xb77   : > { %v1920_v51 = vpop.permute.xlu1 %1919 }
 0xb78   : > { %1926 = vst.msk [vmem:[#allocation3] sm:$0xff] %vm1925_vm13, %v1920_v51 }
 0xb7b   : > { %v1922_v0 = vpop.permute.xlu1 %1921 }
 0xb7c   : > { %v4236_v30 = vpop.eup %4235  ;;  %1927 = vst.msk [vmem:[#allocation3 + $0x8] sm:$0xff] %vm1925_vm13, %v1922_v0 }
 0xb7d   : > { %v2275_v5 = vsel %vm1573_vm12, %v4236_v30, 0.0 }
 0xb7e   : > { %v4238_v31 = vpop.eup %4237  ;;  %2276 = vadd.xlane.f32.xlu0 %v2275_v5 }
 0xb7f   : > { %v2155_v32 = vpop.permute.xlu1 %2154  ;;  %v2278_v33 = vsel %vm1573_vm12, %v4238_v31, 0.0 }
 0xb80   : > { %2160 = vst.msk [vmem:[#allocation3 + $0x8] sm:$0xff] %vm2158_vm14, %v2155_v32 }
 0xb82   : > { %2279 = vadd.xlane.f32.xlu0 %v2278_v33  ;;  %v4141_v33 = vld [vmem:[%s4708_s17 + $0x44] ss:$16 sps:$4 sm:$0xff]  }
 0xb98   : > { %2287 = vrot.lane.b32.xlu0 %v4939_v12, %s4429_s5 }
 0xb9c   : > { %2152 = vrot.lane.b32.xlu0 %v2096_v59, %s4428_s3 }
 0xc0b   : > { %v2277_v4 = vpop.xlane.xlu0 %2276 }
 0xc0c   : > { %4239 = vrcp.f32 %v2277_v4  ;;  %v4144_v4 = vld [vmem:[%s4708_s17 + $0x4c] ss:$16 sps:$4 sm:$0xff]  }
 0xc0f   : > { %v2280_v6 = vpop.xlane.xlu0 %2279 }
 0xc10   : > { %4241 = vrcp.f32 %v2280_v6  ;;  %v4139_v6 = vld [vmem:[%s4708_s17 + $0x40] ss:$16 sps:$4 sm:$0xff]  }
 0xc13   : > { %v2288_v34 = vpop.permute.xlu0 %2287 }
 0xc14   : > { %v2293_v40 = vsel %vm1601_vm11, %v2288_v34, 0  ;;  %v4142_v34 = vld [vmem:[%s4708_s17 + $0x48] ss:$16 sps:$4 sm:$0xff]  }
 0xc15   : > { %3955 = vmatpush3.bf16.msra.mxu0 %v2293_v40  ;;  %v4147_v40 = vld [vmem:[%s4708_s17 + $0x64] ss:$16 sps:$4 sm:$0xff]  }
 0xc16   : > { %v4240_v35 = vpop.eup %4239  ;;  %3966 = vmatprep.subr.bf16.mxu0 %v4424_v61 }
 0xc17   : > { %v2283_v36 = vmul.f32 %v4240_v35, %v4236_v30  ;;  %v2153_v37 = vpop.permute.xlu0 %2152  ;;  %v4150_v35 = vld [vmem:[%s4708_s17 + $0x6c] ss:$16 sps:$4 sm:$0xff]  }
 0xc18   : > { %2159 = vst.msk [vmem:[#allocation3] sm:$0xff] %vm2158_vm14, %v2153_v37  ;;  %v4148_v37 = vld [vmem:[%s4708_s17 + $0x68] ss:$16 sps:$4 sm:$0xff]  }
 0xc19   : > { %v2285_v12 = vpack.c.bf16 %v2283_v36, %v2283_v36  ;;  %v4145_v36 = vld [vmem:[%s4708_s17 + $0x60] ss:$16 sps:$4 sm:$0xff]  }
 0xc1a   : > { %v4242_v38 = vpop.eup %4241 }
 0xc1b   : > { %v2284_v41 = vmul.f32 %v4242_v38, %v4238_v31  ;;  %3957 = vmatmul.mubr.msk.bf16.vlgmr.msra.gmra.mrb[24].mxu0 %vm1573_vm12, %v2285_v12  ;;  %v4153_v12 = vld [vmem:[%s4708_s17 + $0x84] ss:$16 sps:$4 sm:$0xff]   ;;  %v4156_v38 = vld [vmem:[%s4708_s17 + $0x8c] ss:$16 sps:$4 sm:$0xff]  }
 0xc1c   : > { %3982 = vmatprep.mubr.msk.bf16.mxu0 %vm4426_vm9, %v4424_v61  ;;  %3967 = vmatpush3.bf16.msra.mxu0 %v4119_v43  ;;  %v4159_v43 = vld [vmem:[%s4708_s17 + $0xa4] ss:$16 sps:$4 sm:$0xff]  }
 0xc1d   : > { %v2286_v42 = vpack.c.bf16 %v2284_v41, %v2284_v41  ;;  %3968 = vmatprep.subr.bf16.mxu0 %v4424_v61  ;;  %v4151_v41 = vld [vmem:[%s4708_s17 + $0x80] ss:$16 sps:$4 sm:$0xff]  }
 0xc1f   : > { %3963 = vmatmul.mubr.msk.bf16.vlgmr.msra.gmra.mrb[40].mxu1 %vm1573_vm12, %v2286_v42  ;;  %v4154_v42 = vld [vmem:[%s4708_s17 + $0x88] ss:$16 sps:$4 sm:$0xff]  }
 0xc20   : > { %2798 = vmatprep.mubr.bf16.mxu1 %v4425_v23  ;;  %3969 = vmatpush3.bf16.msra.mxu0 %v4120_v44  ;;  %v4162_v44 = vld [vmem:[%s4708_s17 + $0xac] ss:$16 sps:$4 sm:$0xff]  }
 0xc21   : > { %3970 = vmatprep.subr.bf16.mxu0 %v4424_v61  ;;  %2767 = vmatpush1.bf16.msra.mxu1 %v4127_v20  ;;  %v4176_v20 = vld [vmem:[%s4760_s26 + $0xc0] sm:$0xff]  }
 0xc22   : > { %2768 = vmatprep.subr.bf16.mxu1 %v4135_v24  ;;  %v4180_v24 = vld [vmem:[%s4760_s26 + $0xc8] sm:$0xff]  }
 0xc24   : > { %3971 = vmatpush3.bf16.msra.mxu0 %v4121_v45  ;;  %v4157_v45 = vld [vmem:[%s4708_s17 + $0xa0] ss:$16 sps:$4 sm:$0xff]  }
 0xc25   : > { %3972 = vmatprep.subr.bf16.mxu0 %v4424_v61  ;;  %2769 = vmatpush1.bf16.msra.mxu1 %v4133_v26  ;;  %v4182_v26 = vld [vmem:[%s4760_s26 + $0x88] sm:$0xff]  }
 0xc26   : > { %2770 = vmatprep.subr.bf16.mxu1 %v4141_v33  ;;  %v4192_v33 = vld [vmem:[%s4760_s26 + $0xe0] sm:$0xff]  }
 0xc28   : > { %3973 = vmatpush3.bf16.msra.mxu0 %v4122_v46  ;;  %v4160_v46 = vld [vmem:[%s4708_s17 + $0xa8] ss:$16 sps:$4 sm:$0xff]  }
 0xc29   : > { %3974 = vmatprep.subr.bf16.mxu0 %v4424_v61  ;;  %2771 = vmatpush1.bf16.msra.mxu1 %v4139_v6  ;;  %v4194_v6 = vld [vmem:[%s4760_s26 + $0xa0] sm:$0xff]  }
 0xc2a   : > { %2772 = vmatprep.subr.bf16.mxu1 %v4147_v40  ;;  %v4196_v40 = vld [vmem:[%s4760_s26 + $0xe8] sm:$0xff]  }
 0xc2c   : > { %3975 = vmatpush3.bf16.msra.mxu0 %v4123_v49  ;;  %v4165_v49 = vld [vmem:[%s4708_s17 + $0xc4] ss:$16 sps:$4 sm:$0xff]  }
 0xc2d   : > { %3976 = vmatprep.subr.bf16.mxu0 %v4424_v61  ;;  %2773 = vmatpush1.bf16.msra.mxu1 %v4145_v36  ;;  %v4198_v36 = vld [vmem:[%s4760_s26 + $0xa8] sm:$0xff]  }
 0xc2e   : > { %2774 = vmatprep.subr.bf16.mxu1 %v4153_v12  ;;  %v4200_v12 = vld [vmem:[%s4760_s26 + $0xf0] sm:$0xff]  }
 0xc30   : > { %3977 = vmatpush3.bf16.msra.mxu0 %v4124_v53  ;;  %v4168_v53 = vld [vmem:[%s4708_s17 + $0xcc] ss:$16 sps:$4 sm:$0xff]  }
 0xc31   : > { %3978 = vmatprep.subr.bf16.mxu0 %v4424_v61  ;;  %2775 = vmatpush1.bf16.msra.mxu1 %v4151_v41  ;;  %v4202_v41 = vld [vmem:[%s4760_s26 + $0xb0] sm:$0xff]  }
 0xc32   : > { %2776 = vmatprep.subr.bf16.mxu1 %v4159_v43  ;;  %v4204_v43 = vld [vmem:[%s4760_s26 + $0xf8] sm:$0xff]  }
 0xc34   : > { %3979 = vmatpush3.bf16.msra.mxu0 %v4125_v54  ;;  %v4163_v54 = vld [vmem:[%s4708_s17 + $0xc0] ss:$16 sps:$4 sm:$0xff]  }
 0xc35   : > { %3980 = vmatprep.subr.bf16.mxu0 %v4424_v61  ;;  %2777 = vmatpush1.bf16.msra.mxu1 %v4157_v45  ;;  %v4206_v45 = vld [vmem:[%s4760_s26 + $0xb8] sm:$0xff]  }
 0xc36   : > { %2778 = vmatprep.subr.bf16.mxu1 %v4165_v49  ;;  %v2600_v49 = vsub.s32 3, %v4908_v47 }
 0xc38   : > { %3981 = vmatpush3.bf16.msra.mxu0 %v4126_v39  ;;  %v4166_v39 = vld [vmem:[%s4708_s17 + $0xc8] ss:$16 sps:$4 sm:$0xff]  }
 0xc39   : > { %2809 = vmatprep.subr.bf16.mxu0 %v4132_v21  ;;  %2779 = vmatpush1.bf16.msra.mxu1 %v4163_v54  ;;  %v4179_v21 = vld [vmem:[%s4760_s26 + $0x48] sm:$0xff]  }
 0xcee   : > { %v2329_v55 = vpop.f32.mrb[24].mxu0 }
 0xcef   : > { %2385 = vrot.lane.b32.xlu0 %v2329_v55, %s4427_s1  ;;  %v3958_v56 = vpop.f32.mrb[25].mxu0  ;;  %v4171_v55 = vld [vmem:[%s4708_s17 + $0xe4] ss:$16 sps:$4 sm:$0xff]  }
 0xcf0   : > { %v2332_v57 = vpop.f32.mrb[26].mxu0  ;;  %v4174_v56 = vld [vmem:[%s4708_s17 + $0xec] ss:$16 sps:$4 sm:$0xff]   ;;  %2780 = vmatprep.subr.bf16.mxu1 %v4171_v55 }
 0xcf1   : > { %v3959_v58 = vpop.f32.mrb[27].mxu0  ;;  %v4169_v57 = vld [vmem:[%s4708_s17 + $0xe0] ss:$16 sps:$4 sm:$0xff]  }
 0xcf2   : > { %v2377_v59 = vpop.f32.mrb[40].mxu1  ;;  %v4172_v58 = vld [vmem:[%s4708_s17 + $0xe8] ss:$16 sps:$4 sm:$0xff]   ;;  %2781 = vmatpush1.bf16.msra.mxu1 %v4169_v57 }
 0xcf3   : > { %2387 = vrot.lane.b32.xlu1 %v2377_v59, %s4427_s1  ;;  %v3964_v60 = vpop.f32.mrb[41].mxu1 }
 0xcf4   : > { %v2380_v62 = vpop.f32.mrb[42].mxu1 }
 0xcf5   : > { %v3965_v63 = vpop.f32.mrb[43].mxu1 }
 0xd61   : > { %v2386_v1 = vpop.permute.xlu0 %2385 }
 0xd62   : > { %2392 = vst.msk [vmem:[#allocation3] sm:$0xff] %vm2391_vm15, %v2386_v1 }
 0xd65   : > { %v2388_v2 = vpop.permute.xlu1 %2387 }
 0xd66   : > { %2393 = vst.msk [vmem:[#allocation3 + $0x8] sm:$0xff] %vm2391_vm15, %v2388_v2 }
 0xd69   : > { %v2394_v61 = vld [vmem:[#allocation3] sm:$0xff] }
 0xd6d   : > { %v2395_v3 = vld [vmem:[#allocation3 + $0x8] sm:$0xff] }
 0xd6e   : > { %v2396_v7 = vpack.c.bf16 %v2395_v3, %v2394_v61 }
 0xd70   : > { %3983 = vmatmul.mubr.bf16.vlgmr.msra.gmra.mrb[28].mxu0 %v2396_v7  ;;  %v3618_v7 = vld [vmem:[%s867_s2] ss:$0 sm:$0xff] }
 0xd71   : > { %2841 = vmatprep.mubr.bf16.mxu0 %v4425_v23  ;;  %2810 = vmatpush1.bf16.msra.mxu0 %v4130_v14  ;;  %v4178_v14 = vld [vmem:[%s4760_s26 + $0x80] sm:$0xff]  }
 0xd72   : > { %2811 = vmatprep.subr.bf16.mxu0 %v4138_v25  ;;  %v4181_v25 = vld [vmem:[%s4760_s26 + $0x8] sm:$0xff]  }
 0xd75   : > { %2812 = vmatpush1.bf16.msra.mxu0 %v4136_v27  ;;  %v4183_v27 = vld [vmem:[%s4760_s26 + $0x50] sm:$0xff]  }
 0xd76   : > { %2813 = vmatprep.subr.bf16.mxu0 %v4144_v4  ;;  %v4193_v4 = vld [vmem:[%s4760_s26 + $0x20] sm:$0xff]  }
 0xd79   : > { %2814 = vmatpush1.bf16.msra.mxu0 %v4142_v34  ;;  %v4195_v34 = vld [vmem:[%s4760_s26 + $0x68] sm:$0xff]  }
 0xd7a   : > { %2815 = vmatprep.subr.bf16.mxu0 %v4150_v35  ;;  %v4197_v35 = vld [vmem:[%s4760_s26 + $0x28] sm:$0xff]  }
 0xd7d   : > { %2816 = vmatpush1.bf16.msra.mxu0 %v4148_v37  ;;  %v4199_v37 = vld [vmem:[%s4760_s26 + $0x70] sm:$0xff]  }
 0xd7e   : > { %2817 = vmatprep.subr.bf16.mxu0 %v4156_v38  ;;  %v4201_v38 = vld [vmem:[%s4760_s26 + $0x30] sm:$0xff]  }
 0xd81   : > { %2818 = vmatpush1.bf16.msra.mxu0 %v4154_v42  ;;  %v4203_v42 = vld [vmem:[%s4760_s26 + $0x78] sm:$0xff]  }
 0xd82   : > { %2819 = vmatprep.subr.bf16.mxu0 %v4162_v44  ;;  %v4205_v44 = vld [vmem:[%s4760_s26 + $0x38] sm:$0xff]  }
 0xd85   : > { %2820 = vmatpush1.bf16.msra.mxu0 %v4160_v46  ;;  %v2584_v46 = vld [vmem:[%s4754_s28] sm:$0xf] }
 0xd86   : > { %2821 = vmatprep.subr.bf16.mxu0 %v4168_v53  ;;  %v2589_v53 = vrot.slane %v2584_v46, %v1237_v48  ;;  %v2597_v54 = vrot.slane %v2584_v46, %v1245_v52  ;;  %v2601_v55 = vrot.slane %v2584_v46, %v2600_v49 }
 0xd89   : > { %2822 = vmatpush1.bf16.msra.mxu0 %v4166_v39  ;;  %v2593_v39 = vrot.slane %v2584_v46, %v1241_v50 }
 0xd8a   : > { %2823 = vmatprep.subr.bf16.mxu0 %v4174_v56 }
 0xd8d   : > { %2824 = vmatpush1.bf16.msra.mxu0 %v4172_v58 }
 0xd8e   : > { %3788 = vmatprep.subr.bf16.mxu0 %v4176_v20 }
 0xe43   : > { %v2502_v9 = vpop.f32.mrb[28].mxu0 }
 0xe44   : > { %v2503_v10 = vadd.f32 %v3609_v8, %v2502_v9  ;;  %v3984_v11 = vpop.f32.mrb[29].mxu0 }
 0xe45   : > { %v2505_v13 = vpop.f32.mrb[30].mxu0  ;;  %v3619_v11 = vld [vmem:[%s870_s16] ss:$0 sm:$0xff] }
 0xe46   : > { %v5129_v16 = vadd.f32 %v4263_v15, %v2503_v10  ;;  %v2506_v23 = vadd.f32 %v3609_v8, %v2505_v13  ;;  %v3985_v17 = vpop.f32.mrb[31].mxu0 }
 0xe48   : > { %v5134_v19 = vadd.f32 %v4264_v18, %v2506_v23  ;;  %2513 = vadd.xlane.f32.xlu0 %v5129_v16  ;;  %v4175_v18 = vld [vmem:[%s4760_s26 + $0x40] sm:$0xff]  }
 0xe49   : > { %3766 = vmatprep.subr.bf16.mxu1 %v4175_v18 }
 0xe4a   : > { %2515 = vadd.xlane.f32.xlu1 %v5134_v19 }
 0xed5   : > { %v2514_v28 = vpop.xlane.xlu0 %2513 }
 0xed6   : > { %v2517_v29 = vmul.f32 0.0078125, %v2514_v28  ;;  %v4184_v28 = vld [vmem:[%s4760_s26 + $0xd0] sm:$0xff]  }
 0xed7   : > { %v2516_v51 = vpop.xlane.xlu1 %2515 }
 0xed8   : > { %v5147_v0 = vsub.f32 %v5129_v16, %v2517_v29  ;;  %v2518_v30 = vmul.f32 0.0078125, %v2516_v51  ;;  %v4185_v29 = vld [vmem:[%s4760_s26 + $0x10] sm:$0xff]  }
 0xed9   : > { %v4186_v51 = vld [vmem:[%s4760_s26 + $0x90] sm:$0xff]  }
 0xeda   : > { %v5150_v5 = vsub.f32 %v5134_v19, %v2518_v30  ;;  %v2521_v31 = vmul.f32 %v5147_v0, %v5147_v0  ;;  %v4188_v30 = vld [vmem:[%s4760_s26 + $0xd8] sm:$0xff]  }
 0xedc   : > { %2523 = vadd.xlane.f32.xlu0 %v2521_v31  ;;  %v2522_v32 = vmul.f32 %v5150_v5, %v5150_v5  ;;  %v4190_v31 = vld [vmem:[%s4760_s26 + $0x98] sm:$0xff]  }
 0xee0   : > { %2525 = vadd.xlane.f32.xlu0 %v2522_v32  ;;  %v4191_v32 = vld [vmem:[%s4760_s26 + $0x60] sm:$0xff]  }
 0xf69   : > { %v2524_v59 = vpop.xlane.xlu0 %2523 }
 0xf6a   : > { %v2527_v60 = vmul.f32 0.0078125, %v2524_v59 }
 0xf6c   : > { %v2529_v62 = vadd.f32 1e-05, %v2527_v60 }
 0xf6d   : > { %v2526_v63 = vpop.xlane.xlu0 %2525 }
 0xf6e   : > { %4243 = vrsqrt.f32 %v2529_v62  ;;  %v2528_v1 = vmul.f32 0.0078125, %v2526_v63 }
 0xf70   : > { %v2530_v2 = vadd.f32 1e-05, %v2528_v1 }
 0xf72   : > { %4245 = vrsqrt.f32 %v2530_v2 }
 0xf78   : > { %v4244_v61 = vpop.eup %4243 }
 0xf79   : > { %v2533_v3 = vmul.f32 %v4244_v61, %v5147_v0  ;;  %v4187_v0 = vld [vmem:[%s4760_s26 + $0x58] sm:$0xff]  }
 0xf7b   : > { %v2541_v10 = vmul.f32 %v3618_v7, %v2533_v3 }
 0xf7c   : > { %v4246_v8 = vpop.eup %4245 }
 0xf7d   : > { %v2534_v9 = vmul.f32 %v4246_v8, %v5150_v5  ;;  %v2549_v15 = vadd.f32 %v3619_v11, %v2541_v10  ;;  %v4189_v5 = vld [vmem:[%s4760_s26 + $0x18] sm:$0xff]  }
 0xf7f   : > { %v2542_v13 = vmul.f32 %v3618_v7, %v2534_v9 }
 0xf81   : > { %v2550_v23 = vadd.f32 %v3619_v11, %v2542_v13 }
 0xf83   : > { %v2551_v17 = vpack.c.bf16 %v2550_v23, %v2549_v15 }
 0xf85   : > { %2799 = vmatmul.mubr.bf16.vlgmr.msra.gmra.mrb[44].mxu1 %v2551_v17  ;;  %2842 = vmatmul.mubr.bf16.vlgmr.msra.gmra.mrb[32].mxu0 %v2551_v17 }
 0xf86   : > { %3767 = vmatpush3.bf16.msra.mxu1 %v4177_v22  ;;  %3789 = vmatpush3.bf16.msra.mxu0 %v4178_v14 }
 0xf87   : > { %3768 = vmatprep.subr.bf16.mxu1 %v4179_v21  ;;  %3790 = vmatprep.subr.bf16.mxu0 %v4180_v24 }
 0xf8a   : > { %3769 = vmatpush3.bf16.msra.mxu1 %v4181_v25  ;;  %3791 = vmatpush3.bf16.msra.mxu0 %v4182_v26 }
 0xf8b   : > { %3770 = vmatprep.subr.bf16.mxu1 %v4183_v27  ;;  %3792 = vmatprep.subr.bf16.mxu0 %v4184_v28 }
 0xf8e   : > { %3771 = vmatpush3.bf16.msra.mxu1 %v4185_v29  ;;  %3793 = vmatpush3.bf16.msra.mxu0 %v4186_v51 }
 0xf8f   : > { %3772 = vmatprep.subr.bf16.mxu1 %v4187_v0  ;;  %3794 = vmatprep.subr.bf16.mxu0 %v4188_v30 }
 0xf92   : > { %3773 = vmatpush3.bf16.msra.mxu1 %v4189_v5  ;;  %3795 = vmatpush3.bf16.msra.mxu0 %v4190_v31 }
 0xf93   : > { %3774 = vmatprep.subr.bf16.mxu1 %v4191_v32  ;;  %3796 = vmatprep.subr.bf16.mxu0 %v4192_v33 }
 0xf96   : > { %3775 = vmatpush3.bf16.msra.mxu1 %v4193_v4  ;;  %3797 = vmatpush3.bf16.msra.mxu0 %v4194_v6 }
 0xf97   : > { %3776 = vmatprep.subr.bf16.mxu1 %v4195_v34  ;;  %3798 = vmatprep.subr.bf16.mxu0 %v4196_v40 }
 0xf9a   : > { %3777 = vmatpush3.bf16.msra.mxu1 %v4197_v35  ;;  %3799 = vmatpush3.bf16.msra.mxu0 %v4198_v36 }
 0xf9b   : > { %3778 = vmatprep.subr.bf16.mxu1 %v4199_v37  ;;  %3800 = vmatprep.subr.bf16.mxu0 %v4200_v12 }
 0xf9e   : > { %3779 = vmatpush3.bf16.msra.mxu1 %v4201_v38  ;;  %3801 = vmatpush3.bf16.msra.mxu0 %v4202_v41 }
 0xf9f   : > { %3780 = vmatprep.subr.bf16.mxu1 %v4203_v42  ;;  %3802 = vmatprep.subr.bf16.mxu0 %v4204_v43 }
 0xfa2   : > { %3781 = vmatpush3.bf16.msra.mxu1 %v4205_v44  ;;  %3803 = vmatpush3.bf16.msra.mxu0 %v4206_v45 }
0x1058   : > { %v2800_v56 = vpop.f32.mrb[44].mxu1  ;;  %v2843_v57 = vpop.f32.mrb[32].mxu0 }
0x1059   : > { %v5232_v58 = vadd.f32 %v2800_v56, %v2589_v53  ;;  %v5234_v59 = vadd.f32 %v2843_v57, %v2597_v54  ;;  %v2802_v60 = vpop.f32.mrb[45].mxu1  ;;  %v2845_v62 = vpop.f32.mrb[33].mxu0 }
0x105a   : > { %v5236_v63 = vadd.f32 %v2802_v60, %v2593_v39  ;;  %v5238_v1 = vadd.f32 %v2845_v62, %v2601_v55  ;;  %v2804_v48 = vpop.f32.mrb[46].mxu1  ;;  %v2847_v2 = vpop.f32.mrb[34].mxu0 }
0x105b   : > { %v2860_v52 = vmul.f32 0.044715, %v5232_v58  ;;  %v2862_v47 = vmul.f32 0.044715, %v5234_v59  ;;  %v2805_v50 = vadd.f32 %v2804_v48, %v2589_v53  ;;  %v2848_v61 = vadd.f32 %v2847_v2, %v2597_v54  ;;  %v2806_v3 = vpop.f32.mrb[47].mxu1  ;;  %v2849_v7 = vpop.f32.mrb[35].mxu0 }
0x105c   : > { %v2861_v8 = vmul.f32 0.044715, %v5236_v63  ;;  %v2863_v9 = vmul.f32 0.044715, %v5238_v1  ;;  %v5244_v10 = vadd.f32 %v2806_v3, %v2593_v39  ;;  %v5246_v11 = vadd.f32 %v2849_v7, %v2601_v55 }
0x105d   : > { %v2868_v13 = vmul.f32 %v2860_v52, %v5232_v58  ;;  %v2870_v15 = vmul.f32 %v2862_v47, %v5234_v59  ;;  %v2864_v23 = vmul.f32 0.044715, %v2805_v50  ;;  %v2866_v17 = vmul.f32 0.044715, %v2848_v61 }
0x105e   : > { %v2869_v18 = vmul.f32 %v2861_v8, %v5236_v63  ;;  %v2871_v20 = vmul.f32 %v2863_v9, %v5238_v1  ;;  %v2865_v22 = vmul.f32 0.044715, %v5244_v10  ;;  %v2867_v14 = vmul.f32 0.044715, %v5246_v11 }
0x105f   : > { %v2876_v21 = vmul.f32 %v2868_v13, %v5232_v58  ;;  %v2878_v24 = vmul.f32 %v2870_v15, %v5234_v59  ;;  %v2872_v25 = vmul.f32 %v2864_v23, %v2805_v50  ;;  %v2874_v26 = vmul.f32 %v2866_v17, %v2848_v61 }
0x1060   : > { %v2877_v27 = vmul.f32 %v2869_v18, %v5236_v63  ;;  %v2879_v28 = vmul.f32 %v2871_v20, %v5238_v1  ;;  %v2873_v29 = vmul.f32 %v2865_v22, %v5244_v10  ;;  %v2875_v51 = vmul.f32 %v2867_v14, %v5246_v11 }
0x1061   : > { %v2884_v0 = vadd.f32 %v2876_v21, %v5232_v58  ;;  %v2886_v30 = vadd.f32 %v2878_v24, %v5234_v59  ;;  %v2880_v5 = vmul.f32 %v2872_v25, %v2805_v50  ;;  %v2882_v31 = vmul.f32 %v2874_v26, %v2848_v61 }
0x1062   : > { %v2881_v32 = vmul.f32 %v2873_v29, %v5244_v10  ;;  %v2883_v33 = vmul.f32 %v2875_v51, %v5246_v11  ;;  %v2885_v35 = vadd.f32 %v2877_v27, %v5236_v63  ;;  %v2887_v38 = vadd.f32 %v2879_v28, %v5238_v1 }
0x1063   : > { %v2892_v4 = vmul.f32 0.7978846, %v2884_v0  ;;  %v2894_v6 = vmul.f32 0.7978846, %v2886_v30  ;;  %v2888_v34 = vadd.f32 %v2880_v5, %v2805_v50  ;;  %v2890_v40 = vadd.f32 %v2882_v31, %v2848_v61 }
0x1064   : > { %v2889_v36 = vadd.f32 %v2881_v32, %v5244_v10  ;;  %v2893_v41 = vmul.f32 0.7978846, %v2885_v35  ;;  %v2891_v43 = vadd.f32 %v2883_v33, %v5246_v11  ;;  %v2895_v44 = vmul.f32 0.7978846, %v2887_v38 }
0x1065   : > { %4247 = vtanh.f32 %v2892_v4  ;;  %v2896_v37 = vmul.f32 0.7978846, %v2888_v34  ;;  %v2898_v12 = vmul.f32 0.7978846, %v2890_v40  ;;  %v2852_v56 = vmul.f32 0.5, %v5232_v58 }
0x1066   : > { %4249 = vtanh.f32 %v2894_v6  ;;  %v2897_v42 = vmul.f32 0.7978846, %v2889_v36  ;;  %v2899_v45 = vmul.f32 0.7978846, %v2891_v43  ;;  %v2856_v57 = vmul.f32 0.5, %v2805_v50 }
0x1067   : > { %4251 = vtanh.f32 %v2896_v37  ;;  %v2854_v48 = vmul.f32 0.5, %v5234_v59  ;;  %v2858_v2 = vmul.f32 0.5, %v2848_v61  ;;  %v2853_v3 = vmul.f32 0.5, %v5236_v63 }
0x1068   : > { %4253 = vtanh.f32 %v2898_v12  ;;  %v2857_v15 = vmul.f32 0.5, %v5244_v10  ;;  %v2855_v50 = vmul.f32 0.5, %v5238_v1  ;;  %v2859_v20 = vmul.f32 0.5, %v5246_v11  ;;  %v3652_v1 = vld [vmem:[%s877_s29] ss:$0 sm:$0xff] }
0x1069   : > { %4255 = vtanh.f32 %v2893_v41 }
0x106a   : > { %4257 = vtanh.f32 %v2897_v42 }
0x106b   : > { %4259 = vtanh.f32 %v2895_v44 }
0x106c   : > { %4261 = vtanh.f32 %v2899_v45 }
0x106f   : > { %v4248_v46 = vpop.eup %4247 }
0x1070   : > { %v4250_v49 = vpop.eup %4249  ;;  %v2908_v53 = vadd.f32 1.0, %v4248_v46 }
0x1071   : > { %v4252_v54 = vpop.eup %4251  ;;  %v2910_v39 = vadd.f32 1.0, %v4250_v49 }
0x1072   : > { %v4254_v55 = vpop.eup %4253  ;;  %v2912_v60 = vadd.f32 1.0, %v4252_v54  ;;  %v2916_v8 = vmul.f32 %v2908_v53, %v2852_v56 }
0x1073   : > { %v4256_v62 = vpop.eup %4255  ;;  %v2914_v52 = vadd.f32 1.0, %v4254_v55  ;;  %v2918_v17 = vmul.f32 %v2910_v39, %v2854_v48 }
0x1074   : > { %v4258_v47 = vpop.eup %4257  ;;  %v2909_v7 = vadd.f32 1.0, %v4256_v62  ;;  %v2920_v9 = vmul.f32 %v2912_v60, %v2856_v57 }
0x1075   : > { %v4260_v13 = vpop.eup %4259  ;;  %v2913_v23 = vadd.f32 1.0, %v4258_v47  ;;  %v2922_v18 = vmul.f32 %v2914_v52, %v2858_v2 }
0x1076   : > { %v4262_v58 = vpop.eup %4261  ;;  %v2911_v59 = vadd.f32 1.0, %v4260_v13  ;;  %v2924_v61 = vpack.c.bf16 %v2920_v9, %v2916_v8  ;;  %v2917_v22 = vmul.f32 %v2909_v7, %v2853_v3 }
0x1077   : > { %v2921_v14 = vmul.f32 %v2913_v23, %v2857_v15  ;;  %v2915_v63 = vadd.f32 1.0, %v4262_v58  ;;  %v2926_v21 = vpack.c.bf16 %v2922_v18, %v2918_v17 }
0x1078   : > { %v2919_v25 = vmul.f32 %v2911_v59, %v2855_v50 }
0x1079   : > { %v2925_v24 = vpack.c.bf16 %v2921_v14, %v2917_v22  ;;  %v2923_v26 = vmul.f32 %v2915_v63, %v2859_v20 }
0x107b   : > { %3223 = vmatprep.mubr.bf16.mxu1 %v2925_v24  ;;  %v2927_v10 = vpack.c.bf16 %v2923_v26, %v2919_v25 }
0x107c   : > { %3224 = vmatmul.mubr.bf16.vlgmr.msra.gmra.mrb[48].mxu1 %v2924_v61 }
0x107d   : > { %3264 = vmatprep.mubr.bf16.mxu0 %v2927_v10 }
0x107e   : > { %3265 = vmatmul.mubr.bf16.vlgmr.msra.gmra.mrb[36].mxu0 %v2926_v21 }
0x114f   : > { %v3782_v27 = vpop.f32.mrb[48].mxu1 }
0x1150   : > { %v3783_v11 = vpop.f32.mrb[49].mxu1 }
0x1151   : > { %v3804_v28 = vpop.f32.mrb[36].mxu0  ;;  %v3784_v29 = vadd.f32 %v3783_v11, %v3782_v27  ;;  %v3785_v51 = vpop.f32.mrb[50].mxu1 }
0x1152   : > { %v3805_v0 = vpop.f32.mrb[37].mxu0  ;;  %v3786_v30 = vpop.f32.mrb[51].mxu1 }
0x1153   : > { %v3226_v5 = vadd.f32 %v3784_v29, %v3652_v1  ;;  %v3806_v31 = vadd.f32 %v3805_v0, %v3804_v28  ;;  %v3807_v32 = vpop.f32.mrb[38].mxu0  ;;  %v3787_v33 = vadd.f32 %v3786_v30, %v3785_v51 }
0x1154   : > { %v3808_v4 = vpop.f32.mrb[39].mxu0 }
0x1155   : > { %v3267_v6 = vadd.f32 %v3806_v31, %v3226_v5  ;;  %v3229_v34 = vadd.f32 %v3787_v33, %v3652_v1  ;;  %v3809_v40 = vadd.f32 %v3808_v4, %v3807_v32 }
0x1157   : > { %v3273_v35 = vadd.f32 %v3267_v6, %v5129_v16  ;;  %v3270_v36 = vadd.f32 %v3809_v40, %v3229_v34 }
0x1159   : > { %3275 = vst [vmem:[%s5379_s0] sm:$0xff] %v3273_v35  ;;  %v3274_v37 = vadd.f32 %v3270_v36, %v5134_v19 }
0x115b   : > { %3276 = vst [vmem:[%s5379_s0 + $0x8] sm:$0xff] %v3274_v37 }
0x115c PF: > { %s34_s19 = sadd.s32 1, %s4409_s19   ;;  %s5384_s27 = sld [smem:[#allocation11_spill]] }
0x115d   : > { %p31_p7 = scmp.ge.s32.totalorder %s34_s19, 4   ;;  %s5385_s28 = sld [smem:[#allocation12_spill]] }
0x115e   : > { %s5386_s29 = sld [smem:[#allocation15_spill]]  ;;  %s5387_s30 = sld [smem:[#allocation13_spill]] }
0x115f   : > { %s5388_s0 = sld [smem:[#allocation14_spill]]  ;;  %33 = sbr.rel (!%p31_p7) target bundleno = 20 (0x14), region = 199 }
0x1166   :  { %3299 = vsyncpa [#allocation5], 1 }
0x1167   :  { %3301 = vsyncpa [#allocation5 + $0x1], 1 }
0x1168   :  { %3302 = vsyncpa [#allocation7], 1 }
0x1169   :  { %3304 = vsyncpa [#allocation7 + $0x1], 1 }

</bundles_post_ra>
